<compile_context>
chip_gen: v5e
topology: v5e:2x2
jax: 0.10.0
libtpu: 0.0.40
codegen_flags: <defaults>
</compile_context>

<pallas_src>
import jax
import jax.numpy as jnp
from jax import lax
from jax.experimental import pallas as pl
from jax.experimental.pallas import tpu as pltpu

NUM_LAYERS = 3


def _lstm_kernel(x_ref, wi0_ref, wh0_ref, b0_ref, w1_ref, b1_ref, w2_ref, b2_ref,
                 fc_w_ref, fc_b_ref, y_ref):
    B, T, D = x_ref.shape
    H = wh0_ref.shape[0]
    H3 = 3 * H
    H4 = 4 * H
    f32 = jnp.float32
    bf16 = jnp.bfloat16

    # Hoist weight loads / bf16 casts / bias broadcasts out of the recurrent loop.
    wh0 = wh0_ref[...].astype(bf16)                       # (H, 4H)   layer-0 recurrent
    w1 = w1_ref[...].astype(bf16)                         # (2H, 4H)  fused [W_ih; W_hh]
    w2 = w2_ref[...].astype(bf16)                         # (2H, 4H)
    b1 = jnp.broadcast_to(b1_ref[...], (B, H4))
    b2 = jnp.broadcast_to(b2_ref[...], (B, H4))

    # Layer-0 input projection for the WHOLE sequence as one (B*T, D) x (D, 4H) matmul,
    # off the serial recurrence.  Bias folded in.
    x_flat = x_ref[...].reshape(B * T, D).astype(bf16)
    x0 = (jnp.dot(x_flat, wi0_ref[...].astype(bf16), preferred_element_type=f32)
          + jnp.broadcast_to(b0_ref[...], (B * T, H4)))
    x0 = x0.reshape(B, T, H4)                             # index [:, t, :] per timestep

    def gates_to_hc(gates, c):
        # Gate layout [i, f, o, g]: one sigmoid over a contiguous (B, 3H) slab and one
        # tanh over (B, H) -> 2 EUP dispatches per cell (was 4).
        sig = jax.nn.sigmoid(gates[:, :H3])
        g = jnp.tanh(gates[:, H3:])
        i_g = sig[:, 0:H]
        f_g = sig[:, H:2 * H]
        o_g = sig[:, 2 * H:H3]
        c_new = f_g * c + i_g * g
        h_new = o_g * jnp.tanh(c_new)
        return h_new, c_new

    z = jnp.zeros((B, H), f32)
    h0, c0, h1, c1, h2, c2 = z, z, z, z, z, z

    # Small fixed T: full static unroll (static indices into x0; LLO can overlap the next
    # cell's MXU push with the current cell's EUP/VPU gate math).
    for t in range(T):
        # Layer 0: input projection precomputed; only the recurrent matmul remains.
        g0 = x0[:, t, :] + jnp.dot(h0.astype(bf16), wh0, preferred_element_type=f32)
        h0, c0 = gates_to_hc(g0, c0)
        # Layers 1/2: single fused [x_t | h] @ [W_ih; W_hh] matmul per cell.
        # (Eval mode: no inter-layer dropout.)
        g1 = jnp.dot(jnp.concatenate([h0, h1], axis=-1).astype(bf16), w1,
                     preferred_element_type=f32) + b1
        h1, c1 = gates_to_hc(g1, c1)
        g2 = jnp.dot(jnp.concatenate([h1, h2], axis=-1).astype(bf16), w2,
                     preferred_element_type=f32) + b2
        h2, c2 = gates_to_hc(g2, c2)

    # fc: Linear(H, 1) as VPU multiply + lane reduction (avoids an N=1 MXU matmul).
    y_ref[...] = jnp.sum(h2 * fc_w_ref[...], axis=-1, keepdims=True) + fc_b_ref[...]


def _prepare_kernel_params(params):
    """PyTorch-layout fused weights -> kernel layout.

    * Gate columns permuted [i, f, g, o] -> [i, f, o, g].
    * Layers 1/2: W_ih and W_hh stacked along K into a single (2H, 4H) matrix.
    """
    H = params["w_hh"][0].shape[0]

    def reorder(w):
        return jnp.concatenate([w[..., :2 * H], w[..., 3 * H:], w[..., 2 * H:3 * H]],
                               axis=-1)

    wi0 = reorder(params["w_ih"][0])
    wh0 = reorder(params["w_hh"][0])
    b0 = reorder(params["b"][0])
    w1 = jnp.concatenate([reorder(params["w_ih"][1]), reorder(params["w_hh"][1])], axis=0)
    b1 = reorder(params["b"][1])
    w2 = jnp.concatenate([reorder(params["w_ih"][2]), reorder(params["w_hh"][2])], axis=0)
    b2 = reorder(params["b"][2])
    return (wi0, wh0, b0, w1, b1, w2, b2, params["fc_w"], params["fc_b"])


def lstm_model_forward(x, params):
    """x: (B, T, D) float32, batch-first like the PyTorch module. Returns (B, 1)."""
    B, T, D = x.shape
    inputs = (x,) + _prepare_kernel_params(params)        # no wrapper-side transpose of x

    vmem = pltpu.MemorySpace.VMEM
    return pl.pallas_call(
        _lstm_kernel,
        out_shape=jax.ShapeDtypeStruct((B, 1), jnp.float32),
        in_specs=[pl.BlockSpec(memory_space=vmem) for _ in inputs],
        out_specs=pl.BlockSpec(memory_space=vmem),
    )(*inputs)


def init_params(key, input_dim, hidden_dim):
    """Deterministic init mimicking PyTorch's U(-1/sqrt(H), 1/sqrt(H)).

    Fused-gate layout (PyTorch order): w_ih (D_in, 4H), w_hh (H, 4H), b (1, 4H) with gate
    order [i, f, g, o] along the 4H axis (row-block order, transposed for right-mult).
    """
    H = hidden_dim
    k = 1.0 / jnp.sqrt(jnp.float32(H))
    keys = jax.random.split(key, 4 * NUM_LAYERS + 2)
    w_ih, w_hh, b = [], [], []
    ki = 0
    for l in range(NUM_LAYERS):
        d_in = input_dim if l == 0 else H
        w_ih.append(jax.random.uniform(keys[ki], (d_in, 4 * H), jnp.float32, -k, k)); ki += 1
        w_hh.append(jax.random.uniform(keys[ki], (H, 4 * H), jnp.float32, -k, k)); ki += 1
        b_ih = jax.random.uniform(keys[ki], (1, 4 * H), jnp.float32, -k, k); ki += 1
        b_hh = jax.random.uniform(keys[ki], (1, 4 * H), jnp.float32, -k, k); ki += 1
        b.append(b_ih + b_hh)                              # combined bias, as in the cell eqs
    fc_w = jax.random.uniform(keys[ki], (1, H), jnp.float32, -k, k); ki += 1
    fc_b = jax.random.uniform(keys[ki], (1, 1), jnp.float32, -k, k)
    return {"w_ih": w_ih, "w_hh": w_hh, "b": b, "fc_w": fc_w, "fc_b": fc_b}


def reference_forward(x, params):
    """Pure-JAX reference matching PyTorch LSTM (eval mode, no dropout) semantics."""
    B, T, D = x.shape
    H = params["w_hh"][0].shape[0]
    seq = x
    for l in range(NUM_LAYERS):
        wi, wh, bb = params["w_ih"][l], params["w_hh"][l], params["b"][l]

        def step(carry, x_t):
            h, c = carry
            gates = x_t @ wi + h @ wh + bb
            i_g = jax.nn.sigmoid(gates[:, 0:H])
            f_g = jax.nn.sigmoid(gates[:, H:2 * H])
            g_g = jnp.tanh(gates[:, 2 * H:3 * H])
            o_g = jax.nn.sigmoid(gates[:, 3 * H:4 * H])
            c_new = f_g * c + i_g * g_g
            h_new = o_g * jnp.tanh(c_new)
            return (h_new, c_new), h_new

        init = (jnp.zeros((B, H), jnp.float32), jnp.zeros((B, H), jnp.float32))
        _, outs = lax.scan(step, init, jnp.transpose(seq, (1, 0, 2)))
        seq = jnp.transpose(outs, (1, 0, 2))
    return seq[:, -1, :] @ params["fc_w"].T + params["fc_b"]


if __name__ == "__main__":
    B, T, D, H = 2, 8, 16, 32  # batch, seq_len, input_dim, hidden_dim (small; 4H = 128)
    key = jax.random.PRNGKey(0)
    k_x, k_p = jax.random.split(key)
    x = jax.random.normal(k_x, (B, T, D), jnp.float32)
    params = init_params(k_p, D, H)

    y = lstm_model_forward(x, params)
    y = jax.block_until_ready(y)

    y_ref = reference_forward(x, params)
    assert y.shape == (B, 1)
    assert jnp.allclose(y, y_ref, atol=2e-2, rtol=2e-2), (y, y_ref)

    print("KERNEL_OK")
</pallas_src>

<mosaic_0001>
module attributes {stable_mosaic.version = 11 : i64} {
  func.func @_lstm_kernel(%arg0: memref<2x8x16xf32, #tpu.memory_space<vmem>>, %arg1: memref<16x128xf32, #tpu.memory_space<vmem>>, %arg2: memref<32x128xf32, #tpu.memory_space<vmem>>, %arg3: memref<1x128xf32, #tpu.memory_space<vmem>>, %arg4: memref<64x128xf32, #tpu.memory_space<vmem>>, %arg5: memref<1x128xf32, #tpu.memory_space<vmem>>, %arg6: memref<64x128xf32, #tpu.memory_space<vmem>>, %arg7: memref<1x128xf32, #tpu.memory_space<vmem>>, %arg8: memref<1x32xf32, #tpu.memory_space<vmem>>, %arg9: memref<1x1xf32, #tpu.memory_space<vmem>>, %arg10: memref<2x1xf32, #tpu.memory_space<vmem>>) attributes {dimension_semantics = [], scalar_prefetch = 0 : i64, scratch_operands = 0 : i64, tpu.core_type = #tpu.core_type<tc>} {
    %c0 = arith.constant 0 : index
    %c0_0 = arith.constant 0 : index
    %0 = vector.load %arg2[%c0, %c0_0] : memref<32x128xf32, #tpu.memory_space<vmem>>, vector<32x128xf32>
    %1 = arith.truncf %0 : vector<32x128xf32> to vector<32x128xbf16>
    %c0_1 = arith.constant 0 : index
    %c0_2 = arith.constant 0 : index
    %2 = vector.load %arg4[%c0_1, %c0_2] : memref<64x128xf32, #tpu.memory_space<vmem>>, vector<64x128xf32>
    %3 = arith.truncf %2 : vector<64x128xf32> to vector<64x128xbf16>
    %c0_3 = arith.constant 0 : index
    %c0_4 = arith.constant 0 : index
    %4 = vector.load %arg6[%c0_3, %c0_4] : memref<64x128xf32, #tpu.memory_space<vmem>>, vector<64x128xf32>
    %5 = arith.truncf %4 : vector<64x128xf32> to vector<64x128xbf16>
    %c0_5 = arith.constant 0 : index
    %c0_6 = arith.constant 0 : index
    %6 = vector.load %arg5[%c0_5, %c0_6] : memref<1x128xf32, #tpu.memory_space<vmem>>, vector<1x128xf32>
    %7 = vector.shape_cast %6 : vector<1x128xf32> to vector<1x128xf32>
    %8 = vector.broadcast %7 : vector<1x128xf32> to vector<2x128xf32>
    %c0_7 = arith.constant 0 : index
    %c0_8 = arith.constant 0 : index
    %9 = vector.load %arg7[%c0_7, %c0_8] : memref<1x128xf32, #tpu.memory_space<vmem>>, vector<1x128xf32>
    %10 = vector.shape_cast %9 : vector<1x128xf32> to vector<1x128xf32>
    %11 = vector.broadcast %10 : vector<1x128xf32> to vector<2x128xf32>
    %c0_9 = arith.constant 0 : index
    %c0_10 = arith.constant 0 : index
    %c0_11 = arith.constant 0 : index
    %12 = vector.load %arg0[%c0_9, %c0_10, %c0_11] : memref<2x8x16xf32, #tpu.memory_space<vmem>>, vector<2x8x16xf32>
    %13 = vector.shape_cast %12 : vector<2x8x16xf32> to vector<16x16xf32>
    %14 = arith.truncf %13 : vector<16x16xf32> to vector<16x16xbf16>
    %c0_12 = arith.constant 0 : index
    %c0_13 = arith.constant 0 : index
    %15 = vector.load %arg1[%c0_12, %c0_13] : memref<16x128xf32, #tpu.memory_space<vmem>>, vector<16x128xf32>
    %16 = arith.truncf %15 : vector<16x128xf32> to vector<16x128xbf16>
    %cst = arith.constant dense<0.000000e+00> : vector<16x128xf32>
    %17 = tpu.matmul %14, %16, %cst {dimension_numbers = #tpu.dot_dimension_numbers<[1], [0], [0], [1], [0, 0, 1, 1], [], []>} : vector<16x16xbf16>, vector<16x128xbf16>, vector<16x128xf32> -> vector<16x128xf32>
    %c0_14 = arith.constant 0 : index
    %c0_15 = arith.constant 0 : index
    %18 = vector.load %arg3[%c0_14, %c0_15] : memref<1x128xf32, #tpu.memory_space<vmem>>, vector<1x128xf32>
    %19 = vector.shape_cast %18 : vector<1x128xf32> to vector<1x128xf32>
    %20 = vector.broadcast %19 : vector<1x128xf32> to vector<16x128xf32>
    %21 = arith.addf %17, %20 : vector<16x128xf32>
    %22 = vector.shape_cast %21 : vector<16x128xf32> to vector<2x8x128xf32>
    %cst_16 = arith.constant 0.000000e+00 : f32
    %23 = vector.broadcast %cst_16 : f32 to vector<2x32xf32>
    %24 = vector.extract_strided_slice %22 {offsets = [0, 0, 0], sizes = [2, 1, 128], strides = [1, 1, 1]} : vector<2x8x128xf32> to vector<2x1x128xf32>
    %25 = vector.shape_cast %24 : vector<2x1x128xf32> to vector<2x128xf32>
    %26 = arith.truncf %23 : vector<2x32xf32> to vector<2x32xbf16>
    %cst_17 = arith.constant dense<0.000000e+00> : vector<2x128xf32>
    %27 = tpu.matmul %26, %1, %cst_17 {dimension_numbers = #tpu.dot_dimension_numbers<[1], [0], [0], [1], [0, 0, 1, 1], [], []>} : vector<2x32xbf16>, vector<32x128xbf16>, vector<2x128xf32> -> vector<2x128xf32>
    %28 = arith.addf %25, %27 : vector<2x128xf32>
    %29 = vector.extract_strided_slice %28 {offsets = [0, 0], sizes = [2, 96], strides = [1, 1]} : vector<2x128xf32> to vector<2x96xf32>
    %30 = arith.negf %29 : vector<2x96xf32>
    %31 = math.exp %30 : vector<2x96xf32>
    %cst_18 = arith.constant 1.000000e+00 : f32
    %32 = vector.broadcast %cst_18 : f32 to vector<2x96xf32>
    %33 = arith.addf %32, %31 : vector<2x96xf32>
    %34 = arith.divf %32, %33 : vector<2x96xf32>
    %35 = vector.extract_strided_slice %28 {offsets = [0, 96], sizes = [2, 32], strides = [1, 1]} : vector<2x128xf32> to vector<2x32xf32>
    %36 = math.tanh %35 : vector<2x32xf32>
    %37 = vector.extract_strided_slice %34 {offsets = [0, 0], sizes = [2, 32], strides = [1, 1]} : vector<2x96xf32> to vector<2x32xf32>
    %38 = vector.extract_strided_slice %34 {offsets = [0, 32], sizes = [2, 32], strides = [1, 1]} : vector<2x96xf32> to vector<2x32xf32>
    %39 = vector.extract_strided_slice %34 {offsets = [0, 64], sizes = [2, 32], strides = [1, 1]} : vector<2x96xf32> to vector<2x32xf32>
    %40 = arith.mulf %38, %23 : vector<2x32xf32>
    %41 = arith.mulf %37, %36 : vector<2x32xf32>
    %42 = arith.addf %40, %41 : vector<2x32xf32>
    %43 = math.tanh %42 : vector<2x32xf32>
    %44 = arith.mulf %39, %43 : vector<2x32xf32>
    %45 = tpu.concatenate %44, %23 in 1 : vector<2x32xf32>, vector<2x32xf32> -> vector<2x64xf32>
    %46 = arith.truncf %45 : vector<2x64xf32> to vector<2x64xbf16>
    %cst_19 = arith.constant dense<0.000000e+00> : vector<2x128xf32>
    %47 = tpu.matmul %46, %3, %cst_19 {dimension_numbers = #tpu.dot_dimension_numbers<[1], [0], [0], [1], [0, 0, 1, 1], [], []>} : vector<2x64xbf16>, vector<64x128xbf16>, vector<2x128xf32> -> vector<2x128xf32>
    %48 = arith.addf %47, %8 : vector<2x128xf32>
    %49 = vector.extract_strided_slice %48 {offsets = [0, 0], sizes = [2, 96], strides = [1, 1]} : vector<2x128xf32> to vector<2x96xf32>
    %50 = arith.negf %49 : vector<2x96xf32>
    %51 = math.exp %50 : vector<2x96xf32>
    %cst_20 = arith.constant 1.000000e+00 : f32
    %52 = vector.broadcast %cst_20 : f32 to vector<2x96xf32>
    %53 = arith.addf %52, %51 : vector<2x96xf32>
    %54 = arith.divf %52, %53 : vector<2x96xf32>
    %55 = vector.extract_strided_slice %48 {offsets = [0, 96], sizes = [2, 32], strides = [1, 1]} : vector<2x128xf32> to vector<2x32xf32>
    %56 = math.tanh %55 : vector<2x32xf32>
    %57 = vector.extract_strided_slice %54 {offsets = [0, 0], sizes = [2, 32], strides = [1, 1]} : vector<2x96xf32> to vector<2x32xf32>
    %58 = vector.extract_strided_slice %54 {offsets = [0, 32], sizes = [2, 32], strides = [1, 1]} : vector<2x96xf32> to vector<2x32xf32>
    %59 = vector.extract_strided_slice %54 {offsets = [0, 64], sizes = [2, 32], strides = [1, 1]} : vector<2x96xf32> to vector<2x32xf32>
    %60 = arith.mulf %58, %23 : vector<2x32xf32>
    %61 = arith.mulf %57, %56 : vector<2x32xf32>
    %62 = arith.addf %60, %61 : vector<2x32xf32>
    %63 = math.tanh %62 : vector<2x32xf32>
    %64 = arith.mulf %59, %63 : vector<2x32xf32>
    %65 = tpu.concatenate %64, %23 in 1 : vector<2x32xf32>, vector<2x32xf32> -> vector<2x64xf32>
    %66 = arith.truncf %65 : vector<2x64xf32> to vector<2x64xbf16>
    %cst_21 = arith.constant dense<0.000000e+00> : vector<2x128xf32>
    %67 = tpu.matmul %66, %5, %cst_21 {dimension_numbers = #tpu.dot_dimension_numbers<[1], [0], [0], [1], [0, 0, 1, 1], [], []>} : vector<2x64xbf16>, vector<64x128xbf16>, vector<2x128xf32> -> vector<2x128xf32>
    %68 = arith.addf %67, %11 : vector<2x128xf32>
    %69 = vector.extract_strided_slice %68 {offsets = [0, 0], sizes = [2, 96], strides = [1, 1]} : vector<2x128xf32> to vector<2x96xf32>
    %70 = arith.negf %69 : vector<2x96xf32>
    %71 = math.exp %70 : vector<2x96xf32>
    %cst_22 = arith.constant 1.000000e+00 : f32
    %72 = vector.broadcast %cst_22 : f32 to vector<2x96xf32>
    %73 = arith.addf %72, %71 : vector<2x96xf32>
    %74 = arith.divf %72, %73 : vector<2x96xf32>
    %75 = vector.extract_strided_slice %68 {offsets = [0, 96], sizes = [2, 32], strides = [1, 1]} : vector<2x128xf32> to vector<2x32xf32>
    %76 = math.tanh %75 : vector<2x32xf32>
    %77 = vector.extract_strided_slice %74 {offsets = [0, 0], sizes = [2, 32], strides = [1, 1]} : vector<2x96xf32> to vector<2x32xf32>
    %78 = vector.extract_strided_slice %74 {offsets = [0, 32], sizes = [2, 32], strides = [1, 1]} : vector<2x96xf32> to vector<2x32xf32>
    %79 = vector.extract_strided_slice %74 {offsets = [0, 64], sizes = [2, 32], strides = [1, 1]} : vector<2x96xf32> to vector<2x32xf32>
    %80 = arith.mulf %78, %23 : vector<2x32xf32>
    %81 = arith.mulf %77, %76 : vector<2x32xf32>
    %82 = arith.addf %80, %81 : vector<2x32xf32>
    %83 = math.tanh %82 : vector<2x32xf32>
    %84 = arith.mulf %79, %83 : vector<2x32xf32>
    %85 = vector.extract_strided_slice %22 {offsets = [0, 1, 0], sizes = [2, 1, 128], strides = [1, 1, 1]} : vector<2x8x128xf32> to vector<2x1x128xf32>
    %86 = vector.shape_cast %85 : vector<2x1x128xf32> to vector<2x128xf32>
    %87 = arith.truncf %44 : vector<2x32xf32> to vector<2x32xbf16>
    %cst_23 = arith.constant dense<0.000000e+00> : vector<2x128xf32>
    %88 = tpu.matmul %87, %1, %cst_23 {dimension_numbers = #tpu.dot_dimension_numbers<[1], [0], [0], [1], [0, 0, 1, 1], [], []>} : vector<2x32xbf16>, vector<32x128xbf16>, vector<2x128xf32> -> vector<2x128xf32>
    %89 = arith.addf %86, %88 : vector<2x128xf32>
    %90 = vector.extract_strided_slice %89 {offsets = [0, 0], sizes = [2, 96], strides = [1, 1]} : vector<2x128xf32> to vector<2x96xf32>
    %91 = arith.negf %90 : vector<2x96xf32>
    %92 = math.exp %91 : vector<2x96xf32>
    %cst_24 = arith.constant 1.000000e+00 : f32
    %93 = vector.broadcast %cst_24 : f32 to vector<2x96xf32>
    %94 = arith.addf %93, %92 : vector<2x96xf32>
    %95 = arith.divf %93, %94 : vector<2x96xf32>
    %96 = vector.extract_strided_slice %89 {offsets = [0, 96], sizes = [2, 32], strides = [1, 1]} : vector<2x128xf32> to vector<2x32xf32>
    %97 = math.tanh %96 : vector<2x32xf32>
    %98 = vector.extract_strided_slice %95 {offsets = [0, 0], sizes = [2, 32], strides = [1, 1]} : vector<2x96xf32> to vector<2x32xf32>
    %99 = vector.extract_strided_slice %95 {offsets = [0, 32], sizes = [2, 32], strides = [1, 1]} : vector<2x96xf32> to vector<2x32xf32>
    %100 = vector.extract_strided_slice %95 {offsets = [0, 64], sizes = [2, 32], strides = [1, 1]} : vector<2x96xf32> to vector<2x32xf32>
    %101 = arith.mulf %99, %42 : vector<2x32xf32>
    %102 = arith.mulf %98, %97 : vector<2x32xf32>
    %103 = arith.addf %101, %102 : vector<2x32xf32>
    %104 = math.tanh %103 : vector<2x32xf32>
    %105 = arith.mulf %100, %104 : vector<2x32xf32>
    %106 = tpu.concatenate %105, %64 in 1 : vector<2x32xf32>, vector<2x32xf32> -> vector<2x64xf32>
    %107 = arith.truncf %106 : vector<2x64xf32> to vector<2x64xbf16>
    %cst_25 = arith.constant dense<0.000000e+00> : vector<2x128xf32>
    %108 = tpu.matmul %107, %3, %cst_25 {dimension_numbers = #tpu.dot_dimension_numbers<[1], [0], [0], [1], [0, 0, 1, 1], [], []>} : vector<2x64xbf16>, vector<64x128xbf16>, vector<2x128xf32> -> vector<2x128xf32>
    %109 = arith.addf %108, %8 : vector<2x128xf32>
    %110 = vector.extract_strided_slice %109 {offsets = [0, 0], sizes = [2, 96], strides = [1, 1]} : vector<2x128xf32> to vector<2x96xf32>
    %111 = arith.negf %110 : vector<2x96xf32>
    %112 = math.exp %111 : vector<2x96xf32>
    %cst_26 = arith.constant 1.000000e+00 : f32
    %113 = vector.broadcast %cst_26 : f32 to vector<2x96xf32>
    %114 = arith.addf %113, %112 : vector<2x96xf32>
    %115 = arith.divf %113, %114 : vector<2x96xf32>
    %116 = vector.extract_strided_slice %109 {offsets = [0, 96], sizes = [2, 32], strides = [1, 1]} : vector<2x128xf32> to vector<2x32xf32>
    %117 = math.tanh %116 : vector<2x32xf32>
    %118 = vector.extract_strided_slice %115 {offsets = [0, 0], sizes = [2, 32], strides = [1, 1]} : vector<2x96xf32> to vector<2x32xf32>
    %119 = vector.extract_strided_slice %115 {offsets = [0, 32], sizes = [2, 32], strides = [1, 1]} : vector<2x96xf32> to vector<2x32xf32>
    %120 = vector.extract_strided_slice %115 {offsets = [0, 64], sizes = [2, 32], strides = [1, 1]} : vector<2x96xf32> to vector<2x32xf32>
    %121 = arith.mulf %119, %62 : vector<2x32xf32>
    %122 = arith.mulf %118, %117 : vector<2x32xf32>
    %123 = arith.addf %121, %122 : vector<2x32xf32>
    %124 = math.tanh %123 : vector<2x32xf32>
    %125 = arith.mulf %120, %124 : vector<2x32xf32>
    %126 = tpu.concatenate %125, %84 in 1 : vector<2x32xf32>, vector<2x32xf32> -> vector<2x64xf32>
    %127 = arith.truncf %126 : vector<2x64xf32> to vector<2x64xbf16>
    %cst_27 = arith.constant dense<0.000000e+00> : vector<2x128xf32>
    %128 = tpu.matmul %127, %5, %cst_27 {dimension_numbers = #tpu.dot_dimension_numbers<[1], [0], [0], [1], [0, 0, 1, 1], [], []>} : vector<2x64xbf16>, vector<64x128xbf16>, vector<2x128xf32> -> vector<2x128xf32>
    %129 = arith.addf %128, %11 : vector<2x128xf32>
    %130 = vector.extract_strided_slice %129 {offsets = [0, 0], sizes = [2, 96], strides = [1, 1]} : vector<2x128xf32> to vector<2x96xf32>
    %131 = arith.negf %130 : vector<2x96xf32>
    %132 = math.exp %131 : vector<2x96xf32>
    %cst_28 = arith.constant 1.000000e+00 : f32
    %133 = vector.broadcast %cst_28 : f32 to vector<2x96xf32>
    %134 = arith.addf %133, %132 : vector<2x96xf32>
    %135 = arith.divf %133, %134 : vector<2x96xf32>
    %136 = vector.extract_strided_slice %129 {offsets = [0, 96], sizes = [2, 32], strides = [1, 1]} : vector<2x128xf32> to vector<2x32xf32>
    %137 = math.tanh %136 : vector<2x32xf32>
    %138 = vector.extract_strided_slice %135 {offsets = [0, 0], sizes = [2, 32], strides = [1, 1]} : vector<2x96xf32> to vector<2x32xf32>
    %139 = vector.extract_strided_slice %135 {offsets = [0, 32], sizes = [2, 32], strides = [1, 1]} : vector<2x96xf32> to vector<2x32xf32>
    %140 = vector.extract_strided_slice %135 {offsets = [0, 64], sizes = [2, 32], strides = [1, 1]} : vector<2x96xf32> to vector<2x32xf32>
    %141 = arith.mulf %139, %82 : vector<2x32xf32>
    %142 = arith.mulf %138, %137 : vector<2x32xf32>
    %143 = arith.addf %141, %142 : vector<2x32xf32>
    %144 = math.tanh %143 : vector<2x32xf32>
    %145 = arith.mulf %140, %144 : vector<2x32xf32>
    %146 = vector.extract_strided_slice %22 {offsets = [0, 2, 0], sizes = [2, 1, 128], strides = [1, 1, 1]} : vector<2x8x128xf32> to vector<2x1x128xf32>
    %147 = vector.shape_cast %146 : vector<2x1x128xf32> to vector<2x128xf32>
    %148 = arith.truncf %105 : vector<2x32xf32> to vector<2x32xbf16>
    %cst_29 = arith.constant dense<0.000000e+00> : vector<2x128xf32>
    %149 = tpu.matmul %148, %1, %cst_29 {dimension_numbers = #tpu.dot_dimension_numbers<[1], [0], [0], [1], [0, 0, 1, 1], [], []>} : vector<2x32xbf16>, vector<32x128xbf16>, vector<2x128xf32> -> vector<2x128xf32>
    %150 = arith.addf %147, %149 : vector<2x128xf32>
    %151 = vector.extract_strided_slice %150 {offsets = [0, 0], sizes = [2, 96], strides = [1, 1]} : vector<2x128xf32> to vector<2x96xf32>
    %152 = arith.negf %151 : vector<2x96xf32>
    %153 = math.exp %152 : vector<2x96xf32>
    %cst_30 = arith.constant 1.000000e+00 : f32
    %154 = vector.broadcast %cst_30 : f32 to vector<2x96xf32>
    %155 = arith.addf %154, %153 : vector<2x96xf32>
    %156 = arith.divf %154, %155 : vector<2x96xf32>
    %157 = vector.extract_strided_slice %150 {offsets = [0, 96], sizes = [2, 32], strides = [1, 1]} : vector<2x128xf32> to vector<2x32xf32>
    %158 = math.tanh %157 : vector<2x32xf32>
    %159 = vector.extract_strided_slice %156 {offsets = [0, 0], sizes = [2, 32], strides = [1, 1]} : vector<2x96xf32> to vector<2x32xf32>
    %160 = vector.extract_strided_slice %156 {offsets = [0, 32], sizes = [2, 32], strides = [1, 1]} : vector<2x96xf32> to vector<2x32xf32>
    %161 = vector.extract_strided_slice %156 {offsets = [0, 64], sizes = [2, 32], strides = [1, 1]} : vector<2x96xf32> to vector<2x32xf32>
    %162 = arith.mulf %160, %103 : vector<2x32xf32>
    %163 = arith.mulf %159, %158 : vector<2x32xf32>
    %164 = arith.addf %162, %163 : vector<2x32xf32>
    %165 = math.tanh %164 : vector<2x32xf32>
    %166 = arith.mulf %161, %165 : vector<2x32xf32>
    %167 = tpu.concatenate %166, %125 in 1 : vector<2x32xf32>, vector<2x32xf32> -> vector<2x64xf32>
    %168 = arith.truncf %167 : vector<2x64xf32> to vector<2x64xbf16>
    %cst_31 = arith.constant dense<0.000000e+00> : vector<2x128xf32>
    %169 = tpu.matmul %168, %3, %cst_31 {dimension_numbers = #tpu.dot_dimension_numbers<[1], [0], [0], [1], [0, 0, 1, 1], [], []>} : vector<2x64xbf16>, vector<64x128xbf16>, vector<2x128xf32> -> vector<2x128xf32>
    %170 = arith.addf %169, %8 : vector<2x128xf32>
    %171 = vector.extract_strided_slice %170 {offsets = [0, 0], sizes = [2, 96], strides = [1, 1]} : vector<2x128xf32> to vector<2x96xf32>
    %172 = arith.negf %171 : vector<2x96xf32>
    %173 = math.exp %172 : vector<2x96xf32>
    %cst_32 = arith.constant 1.000000e+00 : f32
    %174 = vector.broadcast %cst_32 : f32 to vector<2x96xf32>
    %175 = arith.addf %174, %173 : vector<2x96xf32>
    %176 = arith.divf %174, %175 : vector<2x96xf32>
    %177 = vector.extract_strided_slice %170 {offsets = [0, 96], sizes = [2, 32], strides = [1, 1]} : vector<2x128xf32> to vector<2x32xf32>
    %178 = math.tanh %177 : vector<2x32xf32>
    %179 = vector.extract_strided_slice %176 {offsets = [0, 0], sizes = [2, 32], strides = [1, 1]} : vector<2x96xf32> to vector<2x32xf32>
    %180 = vector.extract_strided_slice %176 {offsets = [0, 32], sizes = [2, 32], strides = [1, 1]} : vector<2x96xf32> to vector<2x32xf32>
    %181 = vector.extract_strided_slice %176 {offsets = [0, 64], sizes = [2, 32], strides = [1, 1]} : vector<2x96xf32> to vector<2x32xf32>
    %182 = arith.mulf %180, %123 : vector<2x32xf32>
    %183 = arith.mulf %179, %178 : vector<2x32xf32>
    %184 = arith.addf %182, %183 : vector<2x32xf32>
    %185 = math.tanh %184 : vector<2x32xf32>
    %186 = arith.mulf %181, %185 : vector<2x32xf32>
    %187 = tpu.concatenate %186, %145 in 1 : vector<2x32xf32>, vector<2x32xf32> -> vector<2x64xf32>
    %188 = arith.truncf %187 : vector<2x64xf32> to vector<2x64xbf16>
    %cst_33 = arith.constant dense<0.000000e+00> : vector<2x128xf32>
    %189 = tpu.matmul %188, %5, %cst_33 {dimension_numbers = #tpu.dot_dimension_numbers<[1], [0], [0], [1], [0, 0, 1, 1], [], []>} : vector<2x64xbf16>, vector<64x128xbf16>, vector<2x128xf32> -> vector<2x128xf32>
    %190 = arith.addf %189, %11 : vector<2x128xf32>
    %191 = vector.extract_strided_slice %190 {offsets = [0, 0], sizes = [2, 96], strides = [1, 1]} : vector<2x128xf32> to vector<2x96xf32>
    %192 = arith.negf %191 : vector<2x96xf32>
    %193 = math.exp %192 : vector<2x96xf32>
    %cst_34 = arith.constant 1.000000e+00 : f32
    %194 = vector.broadcast %cst_34 : f32 to vector<2x96xf32>
    %195 = arith.addf %194, %193 : vector<2x96xf32>
    %196 = arith.divf %194, %195 : vector<2x96xf32>
    %197 = vector.extract_strided_slice %190 {offsets = [0, 96], sizes = [2, 32], strides = [1, 1]} : vector<2x128xf32> to vector<2x32xf32>
    %198 = math.tanh %197 : vector<2x32xf32>
    %199 = vector.extract_strided_slice %196 {offsets = [0, 0], sizes = [2, 32], strides = [1, 1]} : vector<2x96xf32> to vector<2x32xf32>
    %200 = vector.extract_strided_slice %196 {offsets = [0, 32], sizes = [2, 32], strides = [1, 1]} : vector<2x96xf32> to vector<2x32xf32>
    %201 = vector.extract_strided_slice %196 {offsets = [0, 64], sizes = [2, 32], strides = [1, 1]} : vector<2x96xf32> to vector<2x32xf32>
    %202 = arith.mulf %200, %143 : vector<2x32xf32>
    %203 = arith.mulf %199, %198 : vector<2x32xf32>
    %204 = arith.addf %202, %203 : vector<2x32xf32>
    %205 = math.tanh %204 : vector<2x32xf32>
    %206 = arith.mulf %201, %205 : vector<2x32xf32>
    %207 = vector.extract_strided_slice %22 {offsets = [0, 3, 0], sizes = [2, 1, 128], strides = [1, 1, 1]} : vector<2x8x128xf32> to vector<2x1x128xf32>
    %208 = vector.shape_cast %207 : vector<2x1x128xf32> to vector<2x128xf32>
    %209 = arith.truncf %166 : vector<2x32xf32> to vector<2x32xbf16>
    %cst_35 = arith.constant dense<0.000000e+00> : vector<2x128xf32>
    %210 = tpu.matmul %209, %1, %cst_35 {dimension_numbers = #tpu.dot_dimension_numbers<[1], [0], [0], [1], [0, 0, 1, 1], [], []>} : vector<2x32xbf16>, vector<32x128xbf16>, vector<2x128xf32> -> vector<2x128xf32>
    %211 = arith.addf %208, %210 : vector<2x128xf32>
    %212 = vector.extract_strided_slice %211 {offsets = [0, 0], sizes = [2, 96], strides = [1, 1]} : vector<2x128xf32> to vector<2x96xf32>
    %213 = arith.negf %212 : vector<2x96xf32>
    %214 = math.exp %213 : vector<2x96xf32>
    %cst_36 = arith.constant 1.000000e+00 : f32
    %215 = vector.broadcast %cst_36 : f32 to vector<2x96xf32>
    %216 = arith.addf %215, %214 : vector<2x96xf32>
    %217 = arith.divf %215, %216 : vector<2x96xf32>
    %218 = vector.extract_strided_slice %211 {offsets = [0, 96], sizes = [2, 32], strides = [1, 1]} : vector<2x128xf32> to vector<2x32xf32>
    %219 = math.tanh %218 : vector<2x32xf32>
    %220 = vector.extract_strided_slice %217 {offsets = [0, 0], sizes = [2, 32], strides = [1, 1]} : vector<2x96xf32> to vector<2x32xf32>
    %221 = vector.extract_strided_slice %217 {offsets = [0, 32], sizes = [2, 32], strides = [1, 1]} : vector<2x96xf32> to vector<2x32xf32>
    %222 = vector.extract_strided_slice %217 {offsets = [0, 64], sizes = [2, 32], strides = [1, 1]} : vector<2x96xf32> to vector<2x32xf32>
    %223 = arith.mulf %221, %164 : vector<2x32xf32>
    %224 = arith.mulf %220, %219 : vector<2x32xf32>
    %225 = arith.addf %223, %224 : vector<2x32xf32>
    %226 = math.tanh %225 : vector<2x32xf32>
    %227 = arith.mulf %222, %226 : vector<2x32xf32>
    %228 = tpu.concatenate %227, %186 in 1 : vector<2x32xf32>, vector<2x32xf32> -> vector<2x64xf32>
    %229 = arith.truncf %228 : vector<2x64xf32> to vector<2x64xbf16>
    %cst_37 = arith.constant dense<0.000000e+00> : vector<2x128xf32>
    %230 = tpu.matmul %229, %3, %cst_37 {dimension_numbers = #tpu.dot_dimension_numbers<[1], [0], [0], [1], [0, 0, 1, 1], [], []>} : vector<2x64xbf16>, vector<64x128xbf16>, vector<2x128xf32> -> vector<2x128xf32>
    %231 = arith.addf %230, %8 : vector<2x128xf32>
    %232 = vector.extract_strided_slice %231 {offsets = [0, 0], sizes = [2, 96], strides = [1, 1]} : vector<2x128xf32> to vector<2x96xf32>
    %233 = arith.negf %232 : vector<2x96xf32>
    %234 = math.exp %233 : vector<2x96xf32>
    %cst_38 = arith.constant 1.000000e+00 : f32
    %235 = vector.broadcast %cst_38 : f32 to vector<2x96xf32>
    %236 = arith.addf %235, %234 : vector<2x96xf32>
    %237 = arith.divf %235, %236 : vector<2x96xf32>
    %238 = vector.extract_strided_slice %231 {offsets = [0, 96], sizes = [2, 32], strides = [1, 1]} : vector<2x128xf32> to vector<2x32xf32>
    %239 = math.tanh %238 : vector<2x32xf32>
    %240 = vector.extract_strided_slice %237 {offsets = [0, 0], sizes = [2, 32], strides = [1, 1]} : vector<2x96xf32> to vector<2x32xf32>
    %241 = vector.extract_strided_slice %237 {offsets = [0, 32], sizes = [2, 32], strides = [1, 1]} : vector<2x96xf32> to vector<2x32xf32>
    %242 = vector.extract_strided_slice %237 {offsets = [0, 64], sizes = [2, 32], strides = [1, 1]} : vector<2x96xf32> to vector<2x32xf32>
    %243 = arith.mulf %241, %184 : vector<2x32xf32>
    %244 = arith.mulf %240, %239 : vector<2x32xf32>
    %245 = arith.addf %243, %244 : vector<2x32xf32>
    %246 = math.tanh %245 : vector<2x32xf32>
    %247 = arith.mulf %242, %246 : vector<2x32xf32>
    %248 = tpu.concatenate %247, %206 in 1 : vector<2x32xf32>, vector<2x32xf32> -> vector<2x64xf32>
    %249 = arith.truncf %248 : vector<2x64xf32> to vector<2x64xbf16>
    %cst_39 = arith.constant dense<0.000000e+00> : vector<2x128xf32>
    %250 = tpu.matmul %249, %5, %cst_39 {dimension_numbers = #tpu.dot_dimension_numbers<[1], [0], [0], [1], [0, 0, 1, 1], [], []>} : vector<2x64xbf16>, vector<64x128xbf16>, vector<2x128xf32> -> vector<2x128xf32>
    %251 = arith.addf %250, %11 : vector<2x128xf32>
    %252 = vector.extract_strided_slice %251 {offsets = [0, 0], sizes = [2, 96], strides = [1, 1]} : vector<2x128xf32> to vector<2x96xf32>
    %253 = arith.negf %252 : vector<2x96xf32>
    %254 = math.exp %253 : vector<2x96xf32>
    %cst_40 = arith.constant 1.000000e+00 : f32
    %255 = vector.broadcast %cst_40 : f32 to vector<2x96xf32>
    %256 = arith.addf %255, %254 : vector<2x96xf32>
    %257 = arith.divf %255, %256 : vector<2x96xf32>
    %258 = vector.extract_strided_slice %251 {offsets = [0, 96], sizes = [2, 32], strides = [1, 1]} : vector<2x128xf32> to vector<2x32xf32>
    %259 = math.tanh %258 : vector<2x32xf32>
    %260 = vector.extract_strided_slice %257 {offsets = [0, 0], sizes = [2, 32], strides = [1, 1]} : vector<2x96xf32> to vector<2x32xf32>
    %261 = vector.extract_strided_slice %257 {offsets = [0, 32], sizes = [2, 32], strides = [1, 1]} : vector<2x96xf32> to vector<2x32xf32>
    %262 = vector.extract_strided_slice %257 {offsets = [0, 64], sizes = [2, 32], strides = [1, 1]} : vector<2x96xf32> to vector<2x32xf32>
    %263 = arith.mulf %261, %204 : vector<2x32xf32>
    %264 = arith.mulf %260, %259 : vector<2x32xf32>
    %265 = arith.addf %263, %264 : vector<2x32xf32>
    %266 = math.tanh %265 : vector<2x32xf32>
    %267 = arith.mulf %262, %266 : vector<2x32xf32>
    %268 = vector.extract_strided_slice %22 {offsets = [0, 4, 0], sizes = [2, 1, 128], strides = [1, 1, 1]} : vector<2x8x128xf32> to vector<2x1x128xf32>
    %269 = vector.shape_cast %268 : vector<2x1x128xf32> to vector<2x128xf32>
    %270 = arith.truncf %227 : vector<2x32xf32> to vector<2x32xbf16>
    %cst_41 = arith.constant dense<0.000000e+00> : vector<2x128xf32>
    %271 = tpu.matmul %270, %1, %cst_41 {dimension_numbers = #tpu.dot_dimension_numbers<[1], [0], [0], [1], [0, 0, 1, 1], [], []>} : vector<2x32xbf16>, vector<32x128xbf16>, vector<2x128xf32> -> vector<2x128xf32>
    %272 = arith.addf %269, %271 : vector<2x128xf32>
    %273 = vector.extract_strided_slice %272 {offsets = [0, 0], sizes = [2, 96], strides = [1, 1]} : vector<2x128xf32> to vector<2x96xf32>
    %274 = arith.negf %273 : vector<2x96xf32>
    %275 = math.exp %274 : vector<2x96xf32>
    %cst_42 = arith.constant 1.000000e+00 : f32
    %276 = vector.broadcast %cst_42 : f32 to vector<2x96xf32>
    %277 = arith.addf %276, %275 : vector<2x96xf32>
    %278 = arith.divf %276, %277 : vector<2x96xf32>
    %279 = vector.extract_strided_slice %272 {offsets = [0, 96], sizes = [2, 32], strides = [1, 1]} : vector<2x128xf32> to vector<2x32xf32>
    %280 = math.tanh %279 : vector<2x32xf32>
    %281 = vector.extract_strided_slice %278 {offsets = [0, 0], sizes = [2, 32], strides = [1, 1]} : vector<2x96xf32> to vector<2x32xf32>
    %282 = vector.extract_strided_slice %278 {offsets = [0, 32], sizes = [2, 32], strides = [1, 1]} : vector<2x96xf32> to vector<2x32xf32>
    %283 = vector.extract_strided_slice %278 {offsets = [0, 64], sizes = [2, 32], strides = [1, 1]} : vector<2x96xf32> to vector<2x32xf32>
    %284 = arith.mulf %282, %225 : vector<2x32xf32>
    %285 = arith.mulf %281, %280 : vector<2x32xf32>
    %286 = arith.addf %284, %285 : vector<2x32xf32>
    %287 = math.tanh %286 : vector<2x32xf32>
    %288 = arith.mulf %283, %287 : vector<2x32xf32>
    %289 = tpu.concatenate %288, %247 in 1 : vector<2x32xf32>, vector<2x32xf32> -> vector<2x64xf32>
    %290 = arith.truncf %289 : vector<2x64xf32> to vector<2x64xbf16>
    %cst_43 = arith.constant dense<0.000000e+00> : vector<2x128xf32>
    %291 = tpu.matmul %290, %3, %cst_43 {dimension_numbers = #tpu.dot_dimension_numbers<[1], [0], [0], [1], [0, 0, 1, 1], [], []>} : vector<2x64xbf16>, vector<64x128xbf16>, vector<2x128xf32> -> vector<2x128xf32>
    %292 = arith.addf %291, %8 : vector<2x128xf32>
    %293 = vector.extract_strided_slice %292 {offsets = [0, 0], sizes = [2, 96], strides = [1, 1]} : vector<2x128xf32> to vector<2x96xf32>
    %294 = arith.negf %293 : vector<2x96xf32>
    %295 = math.exp %294 : vector<2x96xf32>
    %cst_44 = arith.constant 1.000000e+00 : f32
    %296 = vector.broadcast %cst_44 : f32 to vector<2x96xf32>
    %297 = arith.addf %296, %295 : vector<2x96xf32>
    %298 = arith.divf %296, %297 : vector<2x96xf32>
    %299 = vector.extract_strided_slice %292 {offsets = [0, 96], sizes = [2, 32], strides = [1, 1]} : vector<2x128xf32> to vector<2x32xf32>
    %300 = math.tanh %299 : vector<2x32xf32>
    %301 = vector.extract_strided_slice %298 {offsets = [0, 0], sizes = [2, 32], strides = [1, 1]} : vector<2x96xf32> to vector<2x32xf32>
    %302 = vector.extract_strided_slice %298 {offsets = [0, 32], sizes = [2, 32], strides = [1, 1]} : vector<2x96xf32> to vector<2x32xf32>
    %303 = vector.extract_strided_slice %298 {offsets = [0, 64], sizes = [2, 32], strides = [1, 1]} : vector<2x96xf32> to vector<2x32xf32>
    %304 = arith.mulf %302, %245 : vector<2x32xf32>
    %305 = arith.mulf %301, %300 : vector<2x32xf32>
    %306 = arith.addf %304, %305 : vector<2x32xf32>
    %307 = math.tanh %306 : vector<2x32xf32>
    %308 = arith.mulf %303, %307 : vector<2x32xf32>
    %309 = tpu.concatenate %308, %267 in 1 : vector<2x32xf32>, vector<2x32xf32> -> vector<2x64xf32>
    %310 = arith.truncf %309 : vector<2x64xf32> to vector<2x64xbf16>
    %cst_45 = arith.constant dense<0.000000e+00> : vector<2x128xf32>
    %311 = tpu.matmul %310, %5, %cst_45 {dimension_numbers = #tpu.dot_dimension_numbers<[1], [0], [0], [1], [0, 0, 1, 1], [], []>} : vector<2x64xbf16>, vector<64x128xbf16>, vector<2x128xf32> -> vector<2x128xf32>
    %312 = arith.addf %311, %11 : vector<2x128xf32>
    %313 = vector.extract_strided_slice %312 {offsets = [0, 0], sizes = [2, 96], strides = [1, 1]} : vector<2x128xf32> to vector<2x96xf32>
    %314 = arith.negf %313 : vector<2x96xf32>
    %315 = math.exp %314 : vector<2x96xf32>
    %cst_46 = arith.constant 1.000000e+00 : f32
    %316 = vector.broadcast %cst_46 : f32 to vector<2x96xf32>
    %317 = arith.addf %316, %315 : vector<2x96xf32>
    %318 = arith.divf %316, %317 : vector<2x96xf32>
    %319 = vector.extract_strided_slice %312 {offsets = [0, 96], sizes = [2, 32], strides = [1, 1]} : vector<2x128xf32> to vector<2x32xf32>
    %320 = math.tanh %319 : vector<2x32xf32>
    %321 = vector.extract_strided_slice %318 {offsets = [0, 0], sizes = [2, 32], strides = [1, 1]} : vector<2x96xf32> to vector<2x32xf32>
    %322 = vector.extract_strided_slice %318 {offsets = [0, 32], sizes = [2, 32], strides = [1, 1]} : vector<2x96xf32> to vector<2x32xf32>
    %323 = vector.extract_strided_slice %318 {offsets = [0, 64], sizes = [2, 32], strides = [1, 1]} : vector<2x96xf32> to vector<2x32xf32>
    %324 = arith.mulf %322, %265 : vector<2x32xf32>
    %325 = arith.mulf %321, %320 : vector<2x32xf32>
    %326 = arith.addf %324, %325 : vector<2x32xf32>
    %327 = math.tanh %326 : vector<2x32xf32>
    %328 = arith.mulf %323, %327 : vector<2x32xf32>
    %329 = vector.extract_strided_slice %22 {offsets = [0, 5, 0], sizes = [2, 1, 128], strides = [1, 1, 1]} : vector<2x8x128xf32> to vector<2x1x128xf32>
    %330 = vector.shape_cast %329 : vector<2x1x128xf32> to vector<2x128xf32>
    %331 = arith.truncf %288 : vector<2x32xf32> to vector<2x32xbf16>
    %cst_47 = arith.constant dense<0.000000e+00> : vector<2x128xf32>
    %332 = tpu.matmul %331, %1, %cst_47 {dimension_numbers = #tpu.dot_dimension_numbers<[1], [0], [0], [1], [0, 0, 1, 1], [], []>} : vector<2x32xbf16>, vector<32x128xbf16>, vector<2x128xf32> -> vector<2x128xf32>
    %333 = arith.addf %330, %332 : vector<2x128xf32>
    %334 = vector.extract_strided_slice %333 {offsets = [0, 0], sizes = [2, 96], strides = [1, 1]} : vector<2x128xf32> to vector<2x96xf32>
    %335 = arith.negf %334 : vector<2x96xf32>
    %336 = math.exp %335 : vector<2x96xf32>
    %cst_48 = arith.constant 1.000000e+00 : f32
    %337 = vector.broadcast %cst_48 : f32 to vector<2x96xf32>
    %338 = arith.addf %337, %336 : vector<2x96xf32>
    %339 = arith.divf %337, %338 : vector<2x96xf32>
    %340 = vector.extract_strided_slice %333 {offsets = [0, 96], sizes = [2, 32], strides = [1, 1]} : vector<2x128xf32> to vector<2x32xf32>
    %341 = math.tanh %340 : vector<2x32xf32>
    %342 = vector.extract_strided_slice %339 {offsets = [0, 0], sizes = [2, 32], strides = [1, 1]} : vector<2x96xf32> to vector<2x32xf32>
    %343 = vector.extract_strided_slice %339 {offsets = [0, 32], sizes = [2, 32], strides = [1, 1]} : vector<2x96xf32> to vector<2x32xf32>
    %344 = vector.extract_strided_slice %339 {offsets = [0, 64], sizes = [2, 32], strides = [1, 1]} : vector<2x96xf32> to vector<2x32xf32>
    %345 = arith.mulf %343, %286 : vector<2x32xf32>
    %346 = arith.mulf %342, %341 : vector<2x32xf32>
    %347 = arith.addf %345, %346 : vector<2x32xf32>
    %348 = math.tanh %347 : vector<2x32xf32>
    %349 = arith.mulf %344, %348 : vector<2x32xf32>
    %350 = tpu.concatenate %349, %308 in 1 : vector<2x32xf32>, vector<2x32xf32> -> vector<2x64xf32>
    %351 = arith.truncf %350 : vector<2x64xf32> to vector<2x64xbf16>
    %cst_49 = arith.constant dense<0.000000e+00> : vector<2x128xf32>
    %352 = tpu.matmul %351, %3, %cst_49 {dimension_numbers = #tpu.dot_dimension_numbers<[1], [0], [0], [1], [0, 0, 1, 1], [], []>} : vector<2x64xbf16>, vector<64x128xbf16>, vector<2x128xf32> -> vector<2x128xf32>
    %353 = arith.addf %352, %8 : vector<2x128xf32>
    %354 = vector.extract_strided_slice %353 {offsets = [0, 0], sizes = [2, 96], strides = [1, 1]} : vector<2x128xf32> to vector<2x96xf32>
    %355 = arith.negf %354 : vector<2x96xf32>
    %356 = math.exp %355 : vector<2x96xf32>
    %cst_50 = arith.constant 1.000000e+00 : f32
    %357 = vector.broadcast %cst_50 : f32 to vector<2x96xf32>
    %358 = arith.addf %357, %356 : vector<2x96xf32>
    %359 = arith.divf %357, %358 : vector<2x96xf32>
    %360 = vector.extract_strided_slice %353 {offsets = [0, 96], sizes = [2, 32], strides = [1, 1]} : vector<2x128xf32> to vector<2x32xf32>
    %361 = math.tanh %360 : vector<2x32xf32>
    %362 = vector.extract_strided_slice %359 {offsets = [0, 0], sizes = [2, 32], strides = [1, 1]} : vector<2x96xf32> to vector<2x32xf32>
    %363 = vector.extract_strided_slice %359 {offsets = [0, 32], sizes = [2, 32], strides = [1, 1]} : vector<2x96xf32> to vector<2x32xf32>
    %364 = vector.extract_strided_slice %359 {offsets = [0, 64], sizes = [2, 32], strides = [1, 1]} : vector<2x96xf32> to vector<2x32xf32>
    %365 = arith.mulf %363, %306 : vector<2x32xf32>
    %366 = arith.mulf %362, %361 : vector<2x32xf32>
    %367 = arith.addf %365, %366 : vector<2x32xf32>
    %368 = math.tanh %367 : vector<2x32xf32>
    %369 = arith.mulf %364, %368 : vector<2x32xf32>
    %370 = tpu.concatenate %369, %328 in 1 : vector<2x32xf32>, vector<2x32xf32> -> vector<2x64xf32>
    %371 = arith.truncf %370 : vector<2x64xf32> to vector<2x64xbf16>
    %cst_51 = arith.constant dense<0.000000e+00> : vector<2x128xf32>
    %372 = tpu.matmul %371, %5, %cst_51 {dimension_numbers = #tpu.dot_dimension_numbers<[1], [0], [0], [1], [0, 0, 1, 1], [], []>} : vector<2x64xbf16>, vector<64x128xbf16>, vector<2x128xf32> -> vector<2x128xf32>
    %373 = arith.addf %372, %11 : vector<2x128xf32>
    %374 = vector.extract_strided_slice %373 {offsets = [0, 0], sizes = [2, 96], strides = [1, 1]} : vector<2x128xf32> to vector<2x96xf32>
    %375 = arith.negf %374 : vector<2x96xf32>
    %376 = math.exp %375 : vector<2x96xf32>
    %cst_52 = arith.constant 1.000000e+00 : f32
    %377 = vector.broadcast %cst_52 : f32 to vector<2x96xf32>
    %378 = arith.addf %377, %376 : vector<2x96xf32>
    %379 = arith.divf %377, %378 : vector<2x96xf32>
    %380 = vector.extract_strided_slice %373 {offsets = [0, 96], sizes = [2, 32], strides = [1, 1]} : vector<2x128xf32> to vector<2x32xf32>
    %381 = math.tanh %380 : vector<2x32xf32>
    %382 = vector.extract_strided_slice %379 {offsets = [0, 0], sizes = [2, 32], strides = [1, 1]} : vector<2x96xf32> to vector<2x32xf32>
    %383 = vector.extract_strided_slice %379 {offsets = [0, 32], sizes = [2, 32], strides = [1, 1]} : vector<2x96xf32> to vector<2x32xf32>
    %384 = vector.extract_strided_slice %379 {offsets = [0, 64], sizes = [2, 32], strides = [1, 1]} : vector<2x96xf32> to vector<2x32xf32>
    %385 = arith.mulf %383, %326 : vector<2x32xf32>
    %386 = arith.mulf %382, %381 : vector<2x32xf32>
    %387 = arith.addf %385, %386 : vector<2x32xf32>
    %388 = math.tanh %387 : vector<2x32xf32>
    %389 = arith.mulf %384, %388 : vector<2x32xf32>
    %390 = vector.extract_strided_slice %22 {offsets = [0, 6, 0], sizes = [2, 1, 128], strides = [1, 1, 1]} : vector<2x8x128xf32> to vector<2x1x128xf32>
    %391 = vector.shape_cast %390 : vector<2x1x128xf32> to vector<2x128xf32>
    %392 = arith.truncf %349 : vector<2x32xf32> to vector<2x32xbf16>
    %cst_53 = arith.constant dense<0.000000e+00> : vector<2x128xf32>
    %393 = tpu.matmul %392, %1, %cst_53 {dimension_numbers = #tpu.dot_dimension_numbers<[1], [0], [0], [1], [0, 0, 1, 1], [], []>} : vector<2x32xbf16>, vector<32x128xbf16>, vector<2x128xf32> -> vector<2x128xf32>
    %394 = arith.addf %391, %393 : vector<2x128xf32>
    %395 = vector.extract_strided_slice %394 {offsets = [0, 0], sizes = [2, 96], strides = [1, 1]} : vector<2x128xf32> to vector<2x96xf32>
    %396 = arith.negf %395 : vector<2x96xf32>
    %397 = math.exp %396 : vector<2x96xf32>
    %cst_54 = arith.constant 1.000000e+00 : f32
    %398 = vector.broadcast %cst_54 : f32 to vector<2x96xf32>
    %399 = arith.addf %398, %397 : vector<2x96xf32>
    %400 = arith.divf %398, %399 : vector<2x96xf32>
    %401 = vector.extract_strided_slice %394 {offsets = [0, 96], sizes = [2, 32], strides = [1, 1]} : vector<2x128xf32> to vector<2x32xf32>
    %402 = math.tanh %401 : vector<2x32xf32>
    %403 = vector.extract_strided_slice %400 {offsets = [0, 0], sizes = [2, 32], strides = [1, 1]} : vector<2x96xf32> to vector<2x32xf32>
    %404 = vector.extract_strided_slice %400 {offsets = [0, 32], sizes = [2, 32], strides = [1, 1]} : vector<2x96xf32> to vector<2x32xf32>
    %405 = vector.extract_strided_slice %400 {offsets = [0, 64], sizes = [2, 32], strides = [1, 1]} : vector<2x96xf32> to vector<2x32xf32>
    %406 = arith.mulf %404, %347 : vector<2x32xf32>
    %407 = arith.mulf %403, %402 : vector<2x32xf32>
    %408 = arith.addf %406, %407 : vector<2x32xf32>
    %409 = math.tanh %408 : vector<2x32xf32>
    %410 = arith.mulf %405, %409 : vector<2x32xf32>
    %411 = tpu.concatenate %410, %369 in 1 : vector<2x32xf32>, vector<2x32xf32> -> vector<2x64xf32>
    %412 = arith.truncf %411 : vector<2x64xf32> to vector<2x64xbf16>
    %cst_55 = arith.constant dense<0.000000e+00> : vector<2x128xf32>
    %413 = tpu.matmul %412, %3, %cst_55 {dimension_numbers = #tpu.dot_dimension_numbers<[1], [0], [0], [1], [0, 0, 1, 1], [], []>} : vector<2x64xbf16>, vector<64x128xbf16>, vector<2x128xf32> -> vector<2x128xf32>
    %414 = arith.addf %413, %8 : vector<2x128xf32>
    %415 = vector.extract_strided_slice %414 {offsets = [0, 0], sizes = [2, 96], strides = [1, 1]} : vector<2x128xf32> to vector<2x96xf32>
    %416 = arith.negf %415 : vector<2x96xf32>
    %417 = math.exp %416 : vector<2x96xf32>
    %cst_56 = arith.constant 1.000000e+00 : f32
    %418 = vector.broadcast %cst_56 : f32 to vector<2x96xf32>
    %419 = arith.addf %418, %417 : vector<2x96xf32>
    %420 = arith.divf %418, %419 : vector<2x96xf32>
    %421 = vector.extract_strided_slice %414 {offsets = [0, 96], sizes = [2, 32], strides = [1, 1]} : vector<2x128xf32> to vector<2x32xf32>
    %422 = math.tanh %421 : vector<2x32xf32>
    %423 = vector.extract_strided_slice %420 {offsets = [0, 0], sizes = [2, 32], strides = [1, 1]} : vector<2x96xf32> to vector<2x32xf32>
    %424 = vector.extract_strided_slice %420 {offsets = [0, 32], sizes = [2, 32], strides = [1, 1]} : vector<2x96xf32> to vector<2x32xf32>
    %425 = vector.extract_strided_slice %420 {offsets = [0, 64], sizes = [2, 32], strides = [1, 1]} : vector<2x96xf32> to vector<2x32xf32>
    %426 = arith.mulf %424, %367 : vector<2x32xf32>
    %427 = arith.mulf %423, %422 : vector<2x32xf32>
    %428 = arith.addf %426, %427 : vector<2x32xf32>
    %429 = math.tanh %428 : vector<2x32xf32>
    %430 = arith.mulf %425, %429 : vector<2x32xf32>
    %431 = tpu.concatenate %430, %389 in 1 : vector<2x32xf32>, vector<2x32xf32> -> vector<2x64xf32>
    %432 = arith.truncf %431 : vector<2x64xf32> to vector<2x64xbf16>
    %cst_57 = arith.constant dense<0.000000e+00> : vector<2x128xf32>
    %433 = tpu.matmul %432, %5, %cst_57 {dimension_numbers = #tpu.dot_dimension_numbers<[1], [0], [0], [1], [0, 0, 1, 1], [], []>} : vector<2x64xbf16>, vector<64x128xbf16>, vector<2x128xf32> -> vector<2x128xf32>
    %434 = arith.addf %433, %11 : vector<2x128xf32>
    %435 = vector.extract_strided_slice %434 {offsets = [0, 0], sizes = [2, 96], strides = [1, 1]} : vector<2x128xf32> to vector<2x96xf32>
    %436 = arith.negf %435 : vector<2x96xf32>
    %437 = math.exp %436 : vector<2x96xf32>
    %cst_58 = arith.constant 1.000000e+00 : f32
    %438 = vector.broadcast %cst_58 : f32 to vector<2x96xf32>
    %439 = arith.addf %438, %437 : vector<2x96xf32>
    %440 = arith.divf %438, %439 : vector<2x96xf32>
    %441 = vector.extract_strided_slice %434 {offsets = [0, 96], sizes = [2, 32], strides = [1, 1]} : vector<2x128xf32> to vector<2x32xf32>
    %442 = math.tanh %441 : vector<2x32xf32>
    %443 = vector.extract_strided_slice %440 {offsets = [0, 0], sizes = [2, 32], strides = [1, 1]} : vector<2x96xf32> to vector<2x32xf32>
    %444 = vector.extract_strided_slice %440 {offsets = [0, 32], sizes = [2, 32], strides = [1, 1]} : vector<2x96xf32> to vector<2x32xf32>
    %445 = vector.extract_strided_slice %440 {offsets = [0, 64], sizes = [2, 32], strides = [1, 1]} : vector<2x96xf32> to vector<2x32xf32>
    %446 = arith.mulf %444, %387 : vector<2x32xf32>
    %447 = arith.mulf %443, %442 : vector<2x32xf32>
    %448 = arith.addf %446, %447 : vector<2x32xf32>
    %449 = math.tanh %448 : vector<2x32xf32>
    %450 = arith.mulf %445, %449 : vector<2x32xf32>
    %451 = vector.extract_strided_slice %22 {offsets = [0, 7, 0], sizes = [2, 1, 128], strides = [1, 1, 1]} : vector<2x8x128xf32> to vector<2x1x128xf32>
    %452 = vector.shape_cast %451 : vector<2x1x128xf32> to vector<2x128xf32>
    %453 = arith.truncf %410 : vector<2x32xf32> to vector<2x32xbf16>
    %cst_59 = arith.constant dense<0.000000e+00> : vector<2x128xf32>
    %454 = tpu.matmul %453, %1, %cst_59 {dimension_numbers = #tpu.dot_dimension_numbers<[1], [0], [0], [1], [0, 0, 1, 1], [], []>} : vector<2x32xbf16>, vector<32x128xbf16>, vector<2x128xf32> -> vector<2x128xf32>
    %455 = arith.addf %452, %454 : vector<2x128xf32>
    %456 = vector.extract_strided_slice %455 {offsets = [0, 0], sizes = [2, 96], strides = [1, 1]} : vector<2x128xf32> to vector<2x96xf32>
    %457 = arith.negf %456 : vector<2x96xf32>
    %458 = math.exp %457 : vector<2x96xf32>
    %cst_60 = arith.constant 1.000000e+00 : f32
    %459 = vector.broadcast %cst_60 : f32 to vector<2x96xf32>
    %460 = arith.addf %459, %458 : vector<2x96xf32>
    %461 = arith.divf %459, %460 : vector<2x96xf32>
    %462 = vector.extract_strided_slice %455 {offsets = [0, 96], sizes = [2, 32], strides = [1, 1]} : vector<2x128xf32> to vector<2x32xf32>
    %463 = math.tanh %462 : vector<2x32xf32>
    %464 = vector.extract_strided_slice %461 {offsets = [0, 0], sizes = [2, 32], strides = [1, 1]} : vector<2x96xf32> to vector<2x32xf32>
    %465 = vector.extract_strided_slice %461 {offsets = [0, 32], sizes = [2, 32], strides = [1, 1]} : vector<2x96xf32> to vector<2x32xf32>
    %466 = vector.extract_strided_slice %461 {offsets = [0, 64], sizes = [2, 32], strides = [1, 1]} : vector<2x96xf32> to vector<2x32xf32>
    %467 = arith.mulf %465, %408 : vector<2x32xf32>
    %468 = arith.mulf %464, %463 : vector<2x32xf32>
    %469 = arith.addf %467, %468 : vector<2x32xf32>
    %470 = math.tanh %469 : vector<2x32xf32>
    %471 = arith.mulf %466, %470 : vector<2x32xf32>
    %472 = tpu.concatenate %471, %430 in 1 : vector<2x32xf32>, vector<2x32xf32> -> vector<2x64xf32>
    %473 = arith.truncf %472 : vector<2x64xf32> to vector<2x64xbf16>
    %cst_61 = arith.constant dense<0.000000e+00> : vector<2x128xf32>
    %474 = tpu.matmul %473, %3, %cst_61 {dimension_numbers = #tpu.dot_dimension_numbers<[1], [0], [0], [1], [0, 0, 1, 1], [], []>} : vector<2x64xbf16>, vector<64x128xbf16>, vector<2x128xf32> -> vector<2x128xf32>
    %475 = arith.addf %474, %8 : vector<2x128xf32>
    %476 = vector.extract_strided_slice %475 {offsets = [0, 0], sizes = [2, 96], strides = [1, 1]} : vector<2x128xf32> to vector<2x96xf32>
    %477 = arith.negf %476 : vector<2x96xf32>
    %478 = math.exp %477 : vector<2x96xf32>
    %cst_62 = arith.constant 1.000000e+00 : f32
    %479 = vector.broadcast %cst_62 : f32 to vector<2x96xf32>
    %480 = arith.addf %479, %478 : vector<2x96xf32>
    %481 = arith.divf %479, %480 : vector<2x96xf32>
    %482 = vector.extract_strided_slice %475 {offsets = [0, 96], sizes = [2, 32], strides = [1, 1]} : vector<2x128xf32> to vector<2x32xf32>
    %483 = math.tanh %482 : vector<2x32xf32>
    %484 = vector.extract_strided_slice %481 {offsets = [0, 0], sizes = [2, 32], strides = [1, 1]} : vector<2x96xf32> to vector<2x32xf32>
    %485 = vector.extract_strided_slice %481 {offsets = [0, 32], sizes = [2, 32], strides = [1, 1]} : vector<2x96xf32> to vector<2x32xf32>
    %486 = vector.extract_strided_slice %481 {offsets = [0, 64], sizes = [2, 32], strides = [1, 1]} : vector<2x96xf32> to vector<2x32xf32>
    %487 = arith.mulf %485, %428 : vector<2x32xf32>
    %488 = arith.mulf %484, %483 : vector<2x32xf32>
    %489 = arith.addf %487, %488 : vector<2x32xf32>
    %490 = math.tanh %489 : vector<2x32xf32>
    %491 = arith.mulf %486, %490 : vector<2x32xf32>
    %492 = tpu.concatenate %491, %450 in 1 : vector<2x32xf32>, vector<2x32xf32> -> vector<2x64xf32>
    %493 = arith.truncf %492 : vector<2x64xf32> to vector<2x64xbf16>
    %cst_63 = arith.constant dense<0.000000e+00> : vector<2x128xf32>
    %494 = tpu.matmul %493, %5, %cst_63 {dimension_numbers = #tpu.dot_dimension_numbers<[1], [0], [0], [1], [0, 0, 1, 1], [], []>} : vector<2x64xbf16>, vector<64x128xbf16>, vector<2x128xf32> -> vector<2x128xf32>
    %495 = arith.addf %494, %11 : vector<2x128xf32>
    %496 = vector.extract_strided_slice %495 {offsets = [0, 0], sizes = [2, 96], strides = [1, 1]} : vector<2x128xf32> to vector<2x96xf32>
    %497 = arith.negf %496 : vector<2x96xf32>
    %498 = math.exp %497 : vector<2x96xf32>
    %cst_64 = arith.constant 1.000000e+00 : f32
    %499 = vector.broadcast %cst_64 : f32 to vector<2x96xf32>
    %500 = arith.addf %499, %498 : vector<2x96xf32>
    %501 = arith.divf %499, %500 : vector<2x96xf32>
    %502 = vector.extract_strided_slice %495 {offsets = [0, 96], sizes = [2, 32], strides = [1, 1]} : vector<2x128xf32> to vector<2x32xf32>
    %503 = math.tanh %502 : vector<2x32xf32>
    %504 = vector.extract_strided_slice %501 {offsets = [0, 0], sizes = [2, 32], strides = [1, 1]} : vector<2x96xf32> to vector<2x32xf32>
    %505 = vector.extract_strided_slice %501 {offsets = [0, 32], sizes = [2, 32], strides = [1, 1]} : vector<2x96xf32> to vector<2x32xf32>
    %506 = vector.extract_strided_slice %501 {offsets = [0, 64], sizes = [2, 32], strides = [1, 1]} : vector<2x96xf32> to vector<2x32xf32>
    %507 = arith.mulf %505, %448 : vector<2x32xf32>
    %508 = arith.mulf %504, %503 : vector<2x32xf32>
    %509 = arith.addf %507, %508 : vector<2x32xf32>
    %510 = math.tanh %509 : vector<2x32xf32>
    %511 = arith.mulf %506, %510 : vector<2x32xf32>
    %c0_65 = arith.constant 0 : index
    %c0_66 = arith.constant 0 : index
    %512 = vector.load %arg8[%c0_65, %c0_66] : memref<1x32xf32, #tpu.memory_space<vmem>>, vector<1x32xf32>
    %513 = vector.broadcast %512 : vector<1x32xf32> to vector<2x32xf32>
    %514 = arith.mulf %511, %513 : vector<2x32xf32>
    %cst_67 = arith.constant dense<0.000000e+00> : vector<2xf32>
    %515 = vector.multi_reduction <add>, %514, %cst_67 [1] : vector<2x32xf32> to vector<2xf32>
    %516 = vector.shape_cast %515 : vector<2xf32> to vector<2x1xf32>
    %c0_68 = arith.constant 0 : index
    %c0_69 = arith.constant 0 : index
    %517 = vector.load %arg9[%c0_68, %c0_69] : memref<1x1xf32, #tpu.memory_space<vmem>>, vector<1x1xf32>
    %518 = vector.broadcast %517 : vector<1x1xf32> to vector<2x1xf32>
    %519 = arith.addf %516, %518 : vector<2x1xf32>
    %c0_70 = arith.constant 0 : index
    %c0_71 = arith.constant 0 : index
    %520 = vector.load %arg10[%c0_70, %c0_71] : memref<2x1xf32, #tpu.memory_space<vmem>>, vector<2x1xf32>
    tpu.vector_store %arg10[%c0_70, %c0_71], %519 {strides = array<i32>} : memref<2x1xf32, #tpu.memory_space<vmem>>, vector<2x1xf32>,
    return
  }
}

</mosaic_0001>

<bundles_post_ra>
// kernel: tpu_custom_call.1
= control target key start
LH: loop header
LB: loop body
LE: loop exit
PB: predicated region body
PF: predicated region fallthrough
CT: control target
= control target key end

     0   :  { %s3258_s0 = inlined_call_operand.hbm [shape: f32[2,8,16], index: 0, kind: input, shape index: {}]   ;;  %s3259_s1 = inlined_call_operand.hbm [shape: f32[16,128], index: 1, kind: input, shape index: {}]   ;;  %s3260_s2 = inlined_call_operand.hbm [shape: f32[32,128], index: 2, kind: input, shape index: {}]   ;;  %s3261_s3 = inlined_call_operand.vmem [shape: f32[1,128], index: 3, kind: input, shape index: {}]   ;;  %s3262_s4 = inlined_call_operand.hbm [shape: f32[64,128], index: 4, kind: input, shape index: {}]   ;;  %s3263_s5 = inlined_call_operand.vmem [shape: f32[1,128], index: 5, kind: input, shape index: {}]   ;;  %s3264_s6 = inlined_call_operand.hbm [shape: f32[64,128], index: 6, kind: input, shape index: {}]   ;;  %s3265_s7 = inlined_call_operand.vmem [shape: f32[1,128], index: 7, kind: input, shape index: {}]   ;;  %s3266_s8 = inlined_call_operand.vmem [shape: f32[1,32], index: 8, kind: input, shape index: {}]   ;;  %s3267_s9 = inlined_call_operand.<no memory space> [shape: f32[1,1], index: 9, kind: input, shape index: {}]   ;;  %s3268_s10 = inlined_call_operand.vmem [shape: f32[2,1], index: 10, kind: output, shape index: {}]  }
   0x1   :  { %v15_v0 = vstv %s3267_s9 }
   0x2   :  { %16 = vst [vmem:[#allocation2] sm:$0x1] %v15_v0 }
   0x3   :  { %17 = vsyncpa [#allocation4], 0 }
   0x4   :  { %18 = vsyncpa [#allocation6], 0 }
   0x5   :  { %19 = vsyncpa [#allocation9], 0  ;;  %s37_s17 = sshll.u32 %s3259_s1, 4  ;;  %s2655_s18 = smov [#allocation5]   ;;  %s38_s17 = int_to_ptr.hbm [resolvable:$true] %s37_s17 }
   0x6   :  { %s39_s19 = sshll.u32 %s2655_s18, 4  ;;  %s65_s22 = sshll.u32 %s3262_s4, 4  ;;  %s40_s19 = int_to_ptr.vmem [resolvable:$true] %s39_s19  ;;  %s66_s22 = int_to_ptr.hbm [resolvable:$true] %s65_s22 }
   0x7   :  { %s2656_s23 = smov 128   ;;  %s2657_s24 = smov 8  }
   0x8   :  { %45 = dma.hbm_to_vmem [thread:$0]  %s38_s17, 256, %s40_s19, [#allocation6], %s2656_s23, %s2656_s23, %s2657_s24  }
   0x9   :  { %s2658_s9 = smov [#allocation8]   ;;  %s24_s28 = sshll.u32 %s3258_s0, 4  ;;  %s25_s28 = int_to_ptr.hbm [resolvable:$true] %s24_s28 }
   0xa   :  { %s67_s25 = sshll.u32 %s2658_s9, 4  ;;  %s50_s30 = sshll.u32 %s3260_s2, 4  ;;  %s68_s25 = int_to_ptr.vmem [resolvable:$true] %s67_s25  ;;  %s51_s30 = int_to_ptr.hbm [resolvable:$true] %s50_s30 }
   0xb   :  { %73 = dma.hbm_to_vmem [thread:$0]  %s66_s22, 1024, %s68_s25, [#allocation9], %s2656_s23, %s2656_s23, %s2657_s24  }
   0xc   :  { %s2659_s11 = smov [#allocation3]   ;;  %s2660_s4 = smov [#allocation7]  }
   0xd   :  { %s26_s12 = sshll.u32 %s2659_s11, 4  ;;  %s52_s13 = sshll.u32 %s2660_s4, 4  ;;  %s27_s12 = int_to_ptr.vmem [resolvable:$true] %s26_s12  ;;  %s53_s13 = int_to_ptr.vmem [resolvable:$true] %s52_s13 }
   0xe   :  { %32 = dma.hbm_to_vmem [thread:$0]  %s25_s28, 256, %s27_s12, [#allocation4], %s2656_s23, %s2656_s23, %s2657_s24  }
   0xf   :  { %s80_s16 = sshll.u32 %s3264_s6, 4  ;;  %s2661_s0 = smov [#allocation10]   ;;  %s81_s16 = int_to_ptr.hbm [resolvable:$true] %s80_s16 }
  0x10   :  { %58 = dma.hbm_to_vmem [thread:$0]  %s51_s30, 512, %s53_s13, [#allocation6], %s2656_s23, %s2656_s23, %s2657_s24  }
  0x11   :  { %s82_s17 = sshll.u32 %s2661_s0, 4  ;;  %s83_s17 = int_to_ptr.vmem [resolvable:$true] %s82_s17 }
  0x12   :  { %88 = dma.hbm_to_vmem [thread:$0]  %s81_s16, 1024, %s83_s17, [#allocation9], %s2656_s23, %s2656_s23, %s2657_s24  }
  0x13   :  { %2649 = dma.done.wait [#allocation4], 256  }
  0x14   :  { %2650 = vsyncadd [#allocation4], 4294967040 }
  0x15   :  { %2651 = dma.done.wait [#allocation6], 768  }
  0x16   :  { %2652 = vsyncadd [#allocation6], 4294966528 }
  0x17   :  { %2653 = dma.done.wait [#allocation9], 2048  }
  0x18   :  { %2654 = vsyncadd [#allocation9], 4294965248  ;;  %v157_v1 = vld [vmem:[#allocation5] sm:$0xff]  ;;  %v158_v2 = vld [vmem:[#allocation5 + $0x8] sm:$0xff]  ;;  %vm164_vm0 = vcmask 130048   ;;  %v2662_v13 = vmov 0  }
  0x19   :  { %v118_v3 = vld [vmem:[#allocation7 + $0x10] sm:$0xff]  ;;  %v159_v4 = vpack.c.bf16 %v158_v2, %v157_v1  ;;  %v119_v5 = vld [vmem:[#allocation7 + $0x18] sm:$0xff]  ;;  %v154_v6 = vld [vmem:[#allocation3] sm:$0xff]  ;;  %s2663_s18 = smov 32   ;;  %vm282_vm9 = vcmask 1041409   ;;  %vm182_vm10 = vcmask 261120  }
  0x1a   :  { %v155_v7 = vld [vmem:[#allocation3 + $0x8] sm:$0xff]  ;;  %v2739_v8 = vpack.c.bf16 %v119_v5, %v118_v3  ;;  %v116_v10 = vld [vmem:[#allocation7] sm:$0xff]  ;;  %v2264_v16 = vld [vmem:[%s3261_s3] ss:$0 sm:$0xff]  ;;  %s2664_s3 = smov 64   ;;  %vm289_vm11 = vcmask 523264  }
  0x1b   :  { %v156_v9 = vpack.c.bf16 %v155_v7, %v154_v6  ;;  %v117_v11 = vld [vmem:[#allocation7 + $0x8] sm:$0xff]  ;;  %175 = vmatpush.bf16.msra.mxu0 %v159_v4  ;;  %v128_v0 = vld [vmem:[#allocation8 + $0x30] sm:$0xff]  ;;  %v129_v1 = vld [vmem:[#allocation8 + $0x38] sm:$0xff]  ;;  %s2665_s21 = smov 96  }
  0x1c   :  { %192 = vmatpush.bf16.msra.mxu1 %v2739_v8  ;;  %v2742_v12 = vpack.c.bf16 %v117_v11, %v116_v10  ;;  %v126_v2 = vld [vmem:[#allocation8 + $0x20] sm:$0xff]  ;;  %v2768_v3 = vpack.c.bf16 %v129_v1, %v128_v0  ;;  %v127_v4 = vld [vmem:[#allocation8 + $0x28] sm:$0xff]  ;;  %v124_v6 = vld [vmem:[#allocation8 + $0x10] sm:$0xff] }
  0x1d   :  { %v2771_v5 = vpack.c.bf16 %v127_v4, %v126_v2  ;;  %v125_v7 = vld [vmem:[#allocation8 + $0x18] sm:$0xff] }
  0x1e   :  { %2182 = vmatmul.msk.bf16.vlgmr.msra.gmra.mxu0 %vm164_vm0, %v156_v9  ;;  %297 = vmatpush.bf16.msra.mxu2 %v2768_v3  ;;  %v2776_v9 = vpack.c.bf16 %v125_v7, %v124_v6 }
  0x1f   :  { %422 = vmatpush.bf16.msrb.mxu0 %v2739_v8 }
  0x20   :  { %193 = vmatpush.bf16.msra.mxu1 %v2742_v12 }
  0x22   :  { %298 = vmatpush.bf16.msra.mxu2 %v2771_v5 }
  0x23   :  { %423 = vmatpush.bf16.msrb.mxu0 %v2742_v12  ;;  %194 = vmatmul.bf16.vlgmr.msra.gmra.mxu1 %v2662_v13 }
  0x24   :  { %543 = vmatpush.bf16.msrb.mxu1 %v2768_v3 }
  0x26   :  { %299 = vmatpush.bf16.msra.mxu2 %v2776_v9 }
  0x27   :  { %789 = vmatpush.bf16.msra.mxu0 %v2768_v3 }
  0x28   :  { %544 = vmatpush.bf16.msrb.mxu1 %v2771_v5 }
  0x2b   :  { %790 = vmatpush.bf16.msra.mxu0 %v2771_v5 }
  0x2c   :  { %545 = vmatpush.bf16.msrb.mxu1 %v2776_v9 }
  0x2f   :  { %791 = vmatpush.bf16.msra.mxu0 %v2776_v9 }
  0x9b   :  { %v177_v14 = vpop.f32.mrf.mxu0 }
  0x9c   :  { %v2753_v22 = vadd.f32 %v2264_v16, %v177_v14 }
  0xa0   :  { %v195_v15 = vpop.f32.mrf.mxu1 }
  0xa1   :  { %v200_v17 = vrot.slane %v195_v15, 1  ;;  %v203_v23 = vadd.f32 %v195_v15, %v2753_v22 }
  0xa3   :  { %v179_v18 = vpop.f32.mrf.mxu0  ;;  %v2183_v27 = vmul.f32 -1.442695, %v203_v23 }
  0xa4   :  { %v2750_v19 = vadd.f32 %v2264_v16, %v179_v18 }
  0xa6   :  { %v204_v20 = vadd.f32 %v200_v17, %v2750_v19 }
  0xa8   :  { %v197_v21 = vpop.f32.mrf.mxu1  ;;  %2269 = vtanh.f32 %v204_v20  ;;  %v2184_v26 = vmul.f32 -1.442695, %v204_v20 }
  0xa9   :  { %2271 = vtanh.f32 %v203_v23 }
  0xaa   :  { %2273 = vpow2.f32 %v2184_v26  ;;  %v122_v26 = vld [vmem:[#allocation8] sm:$0xff] }
  0xab   :  { %2275 = vpow2.f32 %v2183_v27  ;;  %v123_v27 = vld [vmem:[#allocation8 + $0x8] sm:$0xff] }
  0xae   :  { %v2270_v24 = vpop.eup %2269 }
  0xaf   :  { %251 = vrot.lane.b32.xlu0 %v2270_v24, %s2663_s18  ;;  %v2272_v25 = vpop.eup %2271 }
  0xb0   :  { %v2274_v28 = vpop.eup %2273 }
  0xb1   :  { %v212_v29 = vadd.f32 1.0, %v2274_v28  ;;  %v2276_v30 = vpop.eup %2275  ;;  %v2787_v28 = vpack.c.bf16 %v123_v27, %v122_v26 }
  0xb2   :  { %v211_v31 = vadd.f32 1.0, %v2276_v30 }
  0xb3   :  { %2277 = vrcp.f32 %v212_v29  ;;  %v239_v40 = vand.u32 2147483648, %v212_v29  ;;  %vm233_vm2 = vweird.f32 %v212_v29  ;;  %v237_v41 = vand.u32 2147483647, %v212_v29  ;;  %300 = vmatpush.bf16.msra.mxu2 %v2787_v28  ;;  %546 = vmatpush.bf16.msrb.mxu1 %v2787_v28 }
  0xb4   :  { %2279 = vrcp.f32 %v211_v31  ;;  %v224_v49 = vand.u32 2147483648, %v211_v31  ;;  %vm218_vm6 = vweird.f32 %v211_v31  ;;  %v222_v50 = vand.u32 2147483647, %v211_v31  ;;  %792 = vmatpush.bf16.msra.mxu0 %v2787_v28 }
  0xb5   :  { %v240_v44 = vor.u32 1.1754944e-38, %v239_v40  ;;  %vm238_vm4 = vcmp.eq.f32.partialorder %v237_v41, 8.507059e+37 }
  0xb6   :  { %v225_v52 = vor.u32 1.1754944e-38, %v224_v49  ;;  %vm223_vm8 = vcmp.eq.f32.partialorder %v222_v50, 8.507059e+37 }
  0xb7   :  { %249 = vrot.lane.b32.xlu0 %v2272_v25, %s2663_s18 }
  0xb9   :  { %v2278_v32 = vpop.eup %2277 }
  0xba   :  { %v229_v33 = vmul.f32 %v2278_v32, %v212_v29  ;;  %v2280_v35 = vpop.eup %2279  ;;  %vm234_vm1 = vweird.f32 %v2278_v32 }
  0xbb   :  { %v214_v37 = vmul.f32 %v2280_v35, %v211_v31  ;;  %vm235_vm3 = vmor %vm233_vm2, %vm234_vm1  ;;  %vm219_vm5 = vweird.f32 %v2280_v35 }
  0xbc   :  { %v230_v34 = vsub.f32 1.0, %v229_v33  ;;  %vm220_vm7 = vmor %vm218_vm6, %vm219_vm5 }
  0xbd   :  { %v215_v39 = vsub.f32 1.0, %v214_v37 }
  0xbe   :  { %v231_v36 = vmul.f32 %v2278_v32, %v230_v34 }
  0xbf   :  { %v216_v43 = vmul.f32 %v2280_v35, %v215_v39 }
  0xc0   :  { %v232_v38 = vadd.f32 %v2278_v32, %v231_v36  ;;  %v2799_v36 = vld [vmem:[%s3263_s5] ss:$0 sm:$0xff] }
  0xc1   :  { %v217_v48 = vadd.f32 %v2280_v35, %v216_v43 }
  0xc2   :  { %v236_v42 = vsel %vm235_vm3, %v2278_v32, %v232_v38 }
  0xc3   :  { %v241_v46 = vsel %vm238_vm4, %v240_v44, %v236_v42  ;;  %v221_v51 = vsel %vm220_vm7, %v2280_v35, %v217_v48 }
  0xc4   :  { %v226_v53 = vsel %vm223_vm8, %v225_v52, %v221_v51  ;;  %v246_v56 = vmul.f32 0.0, %v241_v46  ;;  %vm518_vm8 = vcmask 1042434  }
  0xc5   :  { %v245_v59 = vmul.f32 0.0, %v226_v53 }
 0x121   :  { %v252_v45 = vpop.permute.xlu0 %251 }
 0x122   :  { %v256_v47 = vmul.f32 %v252_v45, %v241_v46 }
 0x124   :  { %261 = vrot.lane.b32.xlu1 %v256_v47, %s2663_s18 }
 0x129   :  { %v250_v54 = vpop.permute.xlu0 %249 }
 0x12a   :  { %v255_v55 = vmul.f32 %v250_v54, %v226_v53 }
 0x12c   :  { %259 = vrot.lane.b32.xlu1 %v255_v55, %s2663_s18 }
 0x196   :  { %v262_v57 = vpop.permute.xlu1 %261 }
 0x197   :  { %v2760_v58 = vadd.f32 %v262_v57, %v246_v56 }
 0x199   :  { %2281 = vtanh.f32 %v2760_v58 }
 0x19e   :  { %v260_v60 = vpop.permute.xlu1 %259 }
 0x19f   :  { %v2282_v61 = vpop.eup %2281  ;;  %v2763_v62 = vadd.f32 %v260_v60, %v245_v59 }
 0x1a0   :  { %273 = vrot.lane.b32.xlu2 %v2282_v61, %s2663_s18 }
 0x1a1   :  { %2283 = vtanh.f32 %v2763_v62 }
 0x1a7   :  { %v2284_v63 = vpop.eup %2283 }
 0x1a8   :  { %271 = vrot.lane.b32.xlu2 %v2284_v63, %s2663_s18 }
 0x1fa   :  { %v274_v10 = vpop.permute.xlu2 %273 }
 0x1fb   :  { %v278_v11 = vmul.f32 %v274_v10, %v241_v46 }
 0x1fd   :  { %v403_v13 = vpack.c.bf16 %v278_v11, %v278_v11  ;;  %v281_v15 = vrot.slane %v278_v11, 7 }
 0x1ff   :  { %v407_v16 = vunpack.c.l.b16 %v403_v13 }
 0x201   :  { %v408_v21 = vrot.slane %v407_v16, 7 }
 0x202   :  { %v272_v14 = vpop.permute.xlu2 %271 }
 0x203   :  { %v277_v17 = vmul.f32 %v272_v14, %v226_v53 }
 0x205   :  { %v402_v18 = vpack.c.bf16 %v277_v17, %v277_v17  ;;  %v283_v20 = vsel %vm282_vm9, %v281_v15, %v277_v17 }
 0x206   :  { %284 = vrot.lane.b32.xlu0 %v283_v20, %s2664_s3 }
 0x207   :  { %v406_v23 = vunpack.c.l.b16 %v402_v18 }
 0x209   :  { %v409_v24 = vsel %vm282_vm9, %v408_v21, %v406_v23 }
 0x20a   :  { %v410_v25 = vpack.c.b16 %v409_v24, %v409_v24 }
 0x20c   :  { %411 = vrot.lane.b32.xlu1 %v410_v25, %s2664_s3 }
 0x278   :  { %v285_v29 = vpop.permute.xlu0 %284 }
 0x279   :  { %v287_v30 = vsel %vm182_vm10, %v285_v29, 0.0 }
 0x27a   :  { %v288_v31 = vpack.c.bf16 %v287_v30, %v287_v30 }
 0x27c   :  { %2185 = vmatmul.msk.bf16.vlgmr.msra.gmra.mxu2 %vm289_vm11, %v288_v31 }
 0x27e   :  { %v412_v32 = vpop.permute.xlu1 %411 }
 0x27f   :  { %2189 = vmatmul.msk.bf16.vlgmr.msrb.gmra.mxu0 %vm182_vm10, %v412_v32 }
 0x2fc   :  { %v425_v33 = vpop.f32.mrf.mxu0 }
 0x2fd   :  { %v430_v34 = vrot.slane %v425_v33, 7  ;;  %v434_v35 = vadd.f32 %v425_v33, %v2750_v19 }
 0x2ff   :  { %v433_v37 = vadd.f32 %v430_v34, %v2753_v22  ;;  %2285 = vtanh.f32 %v434_v35  ;;  %v302_v38 = vpop.f32.mrf.mxu2  ;;  %v2191_v48 = vmul.f32 -1.442695, %v434_v35 }
 0x300   :  { %v303_v39 = vadd.f32 %v2799_v36, %v302_v38 }
 0x301   :  { %2287 = vtanh.f32 %v433_v37  ;;  %v2190_v49 = vmul.f32 -1.442695, %v433_v37 }
 0x302   :  { %2289 = vtanh.f32 %v303_v39  ;;  %v2186_v45 = vmul.f32 -1.442695, %v303_v39 }
 0x304   :  { %v427_v40 = vpop.f32.mrf.mxu0  ;;  %2291 = vpow2.f32 %v2186_v45 }
 0x305   :  { %v2286_v41 = vpop.eup %2285 }
 0x306   :  { %487 = vrot.lane.b32.xlu0 %v2286_v41, %s2663_s18  ;;  %v478_v41 = vrot.slane %v2760_v58, 7 }
 0x307   :  { %v304_v42 = vpop.f32.mrf.mxu2  ;;  %v2288_v43 = vpop.eup %2287 }
 0x308   :  { %485 = vrot.lane.b32.xlu1 %v2288_v43, %s2663_s18  ;;  %v2290_v44 = vpop.eup %2289  ;;  %v477_v43 = vrot.slane %v2763_v62, 7 }
 0x309   :  { %328 = vrot.lane.b32.xlu2 %v2290_v44, %s2663_s18 }
 0x30a   :  { %v2292_v46 = vpop.eup %2291 }
 0x30b   :  { %v309_v47 = vadd.f32 1.0, %v2292_v46 }
 0x30d   :  { %2293 = vrcp.f32 %v309_v47  ;;  %v321_v60 = vand.u32 2147483648, %v309_v47  ;;  %vm315_vm13 = vweird.f32 %v309_v47  ;;  %v319_v61 = vand.u32 2147483647, %v309_v47 }
 0x30e   :  { %2295 = vpow2.f32 %v2191_v48 }
 0x30f   :  { %2297 = vpow2.f32 %v2190_v49  ;;  %v322_v1 = vor.u32 1.1754944e-38, %v321_v60  ;;  %vm320_vm15 = vcmp.eq.f32.partialorder %v319_v61, 8.507059e+37  ;;  %v137_v60 = vld [vmem:[#allocation10 + $0x18] sm:$0xff] }
 0x313   :  { %v2294_v50 = vpop.eup %2293 }
 0x314   :  { %v311_v51 = vmul.f32 %v2294_v50, %v309_v47  ;;  %v2296_v52 = vpop.eup %2295  ;;  %vm316_vm12 = vweird.f32 %v2294_v50 }
 0x315   :  { %v2298_v54 = vpop.eup %2297  ;;  %v442_v55 = vadd.f32 1.0, %v2296_v52  ;;  %vm317_vm14 = vmor %vm315_vm13, %vm316_vm12  ;;  %v140_v52 = vld [vmem:[#allocation10 + $0x30] sm:$0xff] }
 0x316   :  { %v312_v53 = vsub.f32 1.0, %v311_v51  ;;  %v441_v56 = vadd.f32 1.0, %v2298_v54 }
 0x317   :  { %2299 = vrcp.f32 %v442_v55  ;;  %v469_v18 = vand.u32 2147483648, %v442_v55  ;;  %vm463_vm1 = vweird.f32 %v442_v55  ;;  %v467_v20 = vand.u32 2147483647, %v442_v55 }
 0x318   :  { %v313_v57 = vmul.f32 %v2294_v50, %v312_v53  ;;  %2301 = vrcp.f32 %v441_v56  ;;  %v454_v24 = vand.u32 2147483648, %v441_v56  ;;  %vm448_vm4 = vweird.f32 %v441_v56  ;;  %v141_v53 = vld [vmem:[#allocation10 + $0x38] sm:$0xff] }
 0x319   :  { %v470_v25 = vor.u32 1.1754944e-38, %v469_v18  ;;  %v452_v26 = vand.u32 2147483647, %v441_v56  ;;  %vm468_vm5 = vcmp.eq.f32.partialorder %v467_v20, 8.507059e+37  ;;  %v2833_v54 = vpack.c.bf16 %v141_v53, %v140_v52 }
 0x31a   :  { %v314_v59 = vadd.f32 %v2294_v50, %v313_v57  ;;  %v455_v32 = vor.u32 1.1754944e-38, %v454_v24  ;;  %v136_v57 = vld [vmem:[#allocation10 + $0x10] sm:$0xff] }
 0x31b   :  { %vm453_vm7 = vcmp.eq.f32.partialorder %v452_v26, 8.507059e+37  ;;  %356 = vmatpush.bf16.msra.mxu3 %v2833_v54  ;;  %606 = vmatpush.bf16.msrb.mxu2 %v2833_v54  ;;  %v2842_v61 = vpack.c.bf16 %v137_v60, %v136_v57 }
 0x31c   :  { %v318_v0 = vsel %vm317_vm14, %v2294_v50, %v314_v59  ;;  %852 = vmatpush.bf16.msra.mxu1 %v2833_v54  ;;  %1105 = vmatpush.bf16.msrb.mxu0 %v2833_v54 }
 0x31d   :  { %v2300_v63 = vpop.eup %2299  ;;  %v323_v7 = vsel %vm320_vm15, %v322_v1, %v318_v0  ;;  %v135_v0 = vld [vmem:[#allocation10 + $0x8] sm:$0xff] }
 0x31e   :  { %v2302_v2 = vpop.eup %2301  ;;  %v459_v4 = vmul.f32 %v2300_v63, %v442_v55  ;;  %vm464_vm0 = vweird.f32 %v2300_v63  ;;  %v326_v37 = vmul.f32 0.0, %v323_v7  ;;  %v138_v55 = vld [vmem:[#allocation10 + $0x20] sm:$0xff] }
 0x31f   :  { %v444_v11 = vmul.f32 %v2302_v2, %v441_v56  ;;  %vm465_vm2 = vmor %vm463_vm1, %vm464_vm0  ;;  %vm449_vm3 = vweird.f32 %v2302_v2  ;;  %v139_v56 = vld [vmem:[#allocation10 + $0x28] sm:$0xff] }
 0x320   :  { %v460_v13 = vsub.f32 1.0, %v459_v4  ;;  %vm450_vm6 = vmor %vm448_vm4, %vm449_vm3  ;;  %v2839_v59 = vpack.c.bf16 %v139_v56, %v138_v55 }
 0x321   :  { %v445_v14 = vsub.f32 1.0, %v444_v11 }
 0x322   :  { %v461_v15 = vmul.f32 %v2300_v63, %v460_v13  ;;  %357 = vmatpush.bf16.msra.mxu3 %v2839_v59  ;;  %607 = vmatpush.bf16.msrb.mxu2 %v2839_v59 }
 0x323   :  { %v446_v16 = vmul.f32 %v2302_v2, %v445_v14  ;;  %853 = vmatpush.bf16.msra.mxu1 %v2839_v59  ;;  %1106 = vmatpush.bf16.msrb.mxu0 %v2839_v59 }
 0x324   :  { %v462_v17 = vadd.f32 %v2300_v63, %v461_v15 }
 0x325   :  { %v447_v21 = vadd.f32 %v2302_v2, %v446_v16 }
 0x326   :  { %v466_v23 = vsel %vm465_vm2, %v2300_v63, %v462_v17  ;;  %358 = vmatpush.bf16.msra.mxu3 %v2842_v61  ;;  %608 = vmatpush.bf16.msrb.mxu2 %v2842_v61  ;;  %v134_v63 = vld [vmem:[#allocation10] sm:$0xff] }
 0x327   :  { %v2807_v27 = vsel %vm468_vm5, %v470_v25, %v466_v23  ;;  %v451_v30 = vsel %vm450_vm6, %v2302_v2, %v447_v21  ;;  %854 = vmatpush.bf16.msra.mxu1 %v2842_v61  ;;  %1107 = vmatpush.bf16.msrb.mxu0 %v2842_v61  ;;  %v2851_v1 = vpack.c.bf16 %v135_v0, %v134_v63 }
 0x328   :  { %v2810_v34 = vsel %vm453_vm7, %v455_v32, %v451_v30  ;;  %v482_v42 = vmul.f32 %v478_v41, %v2807_v27 }
 0x329   :  { %v481_v46 = vmul.f32 %v477_v43, %v2810_v34 }
 0x32a   :  { %359 = vmatpush.bf16.msra.mxu3 %v2851_v1  ;;  %609 = vmatpush.bf16.msrb.mxu2 %v2851_v1 }
 0x32b   :  { %855 = vmatpush.bf16.msra.mxu1 %v2851_v1  ;;  %1108 = vmatpush.bf16.msrb.mxu0 %v2851_v1 }
 0x32e   :  { %672 = vmatpush.bf16.msrb.mxu3 %v2739_v8  ;;  %919 = vmatpush.bf16.msra.mxu2 %v2739_v8 }
 0x332   :  { %673 = vmatpush.bf16.msrb.mxu3 %v2742_v12  ;;  %920 = vmatpush.bf16.msra.mxu2 %v2742_v12 }
 0x363   :  { %v329_v6 = vpop.permute.xlu2 %328 }
 0x364   :  { %v331_v10 = vmul.f32 %v329_v6, %v323_v7 }
 0x366   :  { %333 = vrot.lane.b32.xlu2 %v331_v10, %s2663_s18 }
 0x378   :  { %v488_v29 = vpop.permute.xlu0 %487 }
 0x379   :  { %v492_v31 = vmul.f32 %v488_v29, %v2807_v27 }
 0x37a   :  { %v486_v33 = vpop.permute.xlu1 %485 }
 0x37b   :  { %497 = vrot.lane.b32.xlu0 %v492_v31, %s2663_s18  ;;  %v491_v35 = vmul.f32 %v486_v33, %v2810_v34 }
 0x37d   :  { %495 = vrot.lane.b32.xlu1 %v491_v35, %s2663_s18  ;;  %v2884_v35 = vld [vmem:[%s3265_s7] ss:$0 sm:$0xff] }
 0x3c0   :  { %v334_v38 = vpop.permute.xlu2 %333 }
 0x3c1   :  { %v2815_v39 = vadd.f32 %v334_v38, %v326_v37 }
 0x3c3   :  { %2303 = vtanh.f32 %v2815_v39 }
 0x3c9   :  { %v2304_v40 = vpop.eup %2303 }
 0x3ca   :  { %339 = vrot.lane.b32.xlu2 %v2304_v40, %s2663_s18 }
 0x3ed   :  { %v498_v44 = vpop.permute.xlu0 %497 }
 0x3ee   :  { %v2822_v45 = vadd.f32 %v498_v44, %v482_v42 }
 0x3ef   :  { %v496_v47 = vpop.permute.xlu1 %495 }
 0x3f0   :  { %2305 = vtanh.f32 %v2822_v45  ;;  %v2826_v48 = vadd.f32 %v496_v47, %v481_v46 }
 0x3f2   :  { %2307 = vtanh.f32 %v2826_v48 }
 0x3f6   :  { %v2306_v49 = vpop.eup %2305 }
 0x3f7   :  { %509 = vrot.lane.b32.xlu0 %v2306_v49, %s2663_s18 }
 0x3f8   :  { %v2308_v58 = vpop.eup %2307 }
 0x3f9   :  { %507 = vrot.lane.b32.xlu1 %v2308_v58, %s2663_s18 }
 0x424   :  { %v340_v50 = vpop.permute.xlu2 %339 }
 0x425   :  { %v342_v62 = vmul.f32 %v340_v50, %v323_v7 }
 0x427   :  { %v523_v51 = vrot.slane %v342_v62, 7  ;;  %344 = vrot.lane.b32.xlu2 %v342_v62, %s2664_s3 }
 0x429   :  { %524 = vrot.lane.b32.xlu1 %v523_v51, %s2665_s21 }
 0x469   :  { %v510_v2 = vpop.permute.xlu0 %509 }
 0x46a   :  { %v514_v4 = vmul.f32 %v510_v2, %v2807_v27 }
 0x46b   :  { %v508_v7 = vpop.permute.xlu1 %507 }
 0x46c   :  { %v517_v6 = vrot.slane %v514_v4, 7  ;;  %v513_v10 = vmul.f32 %v508_v7, %v2810_v34  ;;  %v653_v11 = vpack.c.bf16 %v514_v4, %v514_v4 }
 0x46e   :  { %v652_v13 = vpack.c.bf16 %v513_v10, %v513_v10  ;;  %v519_v14 = vsel %vm518_vm8, %v517_v6, %v513_v10  ;;  %v657_v16 = vunpack.c.l.b16 %v653_v11 }
 0x46f   :  { %520 = vrot.lane.b32.xlu0 %v519_v14, %s2664_s3 }
 0x470   :  { %v656_v15 = vunpack.c.l.b16 %v652_v13 }
 0x472   :  { %v658_v17 = vrot.slane %v656_v15, 1 }
 0x474   :  { %v659_v18 = vsel %vm282_vm9, %v657_v16, %v658_v17 }
 0x475   :  { %v660_v20 = vpack.c.b16 %v659_v18, %v659_v18 }
 0x477   :  { %661 = vrot.lane.b32.xlu2 %v660_v20, %s2664_s3 }
 0x481   :  { %v345_v21 = vpop.permute.xlu2 %344 }
 0x482   :  { %v347_v23 = vsel %vm182_vm10, %v345_v21, 0.0 }
 0x483   :  { %v348_v24 = vpack.c.bf16 %v347_v23, %v347_v23 }
 0x485   :  { %2187 = vmatmul.msk.bf16.vlgmr.msra.gmra.mxu3 %vm289_vm11, %v348_v24 }
 0x486   :  { %1042 = vmatpush.bf16.msra.mxu3 %v2768_v3 }
 0x48a   :  { %1043 = vmatpush.bf16.msra.mxu3 %v2771_v5 }
 0x48e   :  { %1044 = vmatpush.bf16.msra.mxu3 %v2776_v9 }
 0x492   :  { %1045 = vmatpush.bf16.msra.mxu3 %v2787_v28 }
 0x49b   :  { %v525_v26 = vpop.permute.xlu1 %524 }
 0x4d1   :  { %v662_v25 = vpop.permute.xlu2 %661 }
 0x4d2   :  { %2196 = vmatmul.msk.bf16.vlgmr.msrb.gmra.mxu3 %vm182_vm10, %v662_v25 }
 0x4d3   :  { %1352 = vmatpush.bf16.msrb.mxu3 %v2833_v54 }
 0x4d7   :  { %1353 = vmatpush.bf16.msrb.mxu3 %v2839_v59 }
 0x4db   :  { %1354 = vmatpush.bf16.msrb.mxu3 %v2842_v61 }
 0x4df   :  { %1355 = vmatpush.bf16.msrb.mxu3 %v2851_v1 }
 0x4e1   :  { %v521_v27 = vpop.permute.xlu0 %520 }
 0x4e2   :  { %v527_v29 = vsel %vm182_vm10, %v521_v27, %v525_v26 }
 0x4e3   :  { %v528_v30 = vpack.c.bf16 %v527_v29, %v527_v29 }
 0x4e5   :  { %v532_v31 = vshll.u32 %v528_v30, 16  ;;  %v530_v32 = vshrl.u32 %v528_v30, 16 }
 0x4e7   :  { %v534_v33 = vrot.slane %v532_v31, 1 }
 0x4e9   :  { %v535_v34 = vor.u32 %v534_v33, %v530_v32 }
 0x4eb   :  { %2192 = vmatmul.msk.bf16.vlgmr.msrb.gmra.mxu1 %vm289_vm11, %v535_v34 }
 0x4ec   :  { %1172 = vmatpush.bf16.msrb.mxu1 %v2739_v8 }
 0x4f0   :  { %1173 = vmatpush.bf16.msrb.mxu1 %v2742_v12 }
 0x508   :  { %v361_v37 = vpop.f32.mrf.mxu3 }
 0x509   :  { %v362_v38 = vadd.f32 %v2884_v35, %v361_v37 }
 0x50b   :  { %2309 = vtanh.f32 %v362_v38  ;;  %v2188_v49 = vmul.f32 -1.442695, %v362_v38 }
 0x510   :  { %v363_v40 = vpop.f32.mrf.mxu3 }
 0x511   :  { %v2310_v41 = vpop.eup %2309 }
 0x512   :  { %387 = vrot.lane.b32.xlu0 %v2310_v41, %s2663_s18 }
 0x555   :  { %v675_v42 = vpop.f32.mrf.mxu3 }
 0x556   :  { %v680_v43 = vrot.slane %v675_v42, 6  ;;  %v681_v44 = vrot.slane %v675_v42, 7 }
 0x558   :  { %v684_v46 = vadd.f32 %v680_v43, %v2753_v22  ;;  %v685_v47 = vadd.f32 %v681_v44, %v2750_v19 }
 0x55a   :  { %2311 = vtanh.f32 %v684_v46  ;;  %v2197_v16 = vmul.f32 -1.442695, %v684_v46  ;;  %v2198_v21 = vmul.f32 -1.442695, %v685_v47 }
 0x55b   :  { %2313 = vtanh.f32 %v685_v47 }
 0x55c   :  { %2315 = vpow2.f32 %v2188_v49 }
 0x55d   :  { %v677_v58 = vpop.f32.mrf.mxu3 }
 0x560   :  { %v2312_v50 = vpop.eup %2311 }
 0x561   :  { %v2314_v62 = vpop.eup %2313  ;;  %736 = vrot.lane.b32.xlu2 %v2312_v50, %s2663_s18 }
 0x562   :  { %738 = vrot.lane.b32.xlu0 %v2314_v62, %s2663_s18  ;;  %v2316_v51 = vpop.eup %2315 }
 0x563   :  { %v368_v52 = vadd.f32 1.0, %v2316_v51 }
 0x565   :  { %2317 = vrcp.f32 %v368_v52  ;;  %v380_v6 = vand.u32 2147483648, %v368_v52  ;;  %vm374_vm13 = vweird.f32 %v368_v52  ;;  %v378_v7 = vand.u32 2147483647, %v368_v52 }
 0x567   :  { %v381_v11 = vor.u32 1.1754944e-38, %v380_v6  ;;  %vm379_vm15 = vcmp.eq.f32.partialorder %v378_v7, 8.507059e+37 }
 0x568   :  { %v548_v53 = vpop.f32.mrf.mxu1 }
 0x569   :  { %v549_v55 = vadd.f32 %v2799_v36, %v548_v53 }
 0x56b   :  { %2319 = vtanh.f32 %v549_v55  ;;  %v2318_v56 = vpop.eup %2317  ;;  %v2193_v32 = vmul.f32 -1.442695, %v549_v55 }
 0x56c   :  { %v370_v63 = vmul.f32 %v2318_v56, %v368_v52  ;;  %vm375_vm12 = vweird.f32 %v2318_v56  ;;  %2321 = vpow2.f32 %v2197_v16 }
 0x56d   :  { %vm376_vm14 = vmor %vm374_vm13, %vm375_vm12 }
 0x56e   :  { %v371_v0 = vsub.f32 1.0, %v370_v63 }
 0x570   :  { %v550_v57 = vpop.f32.mrf.mxu1  ;;  %v372_v2 = vmul.f32 %v2318_v56, %v371_v0 }
 0x571   :  { %v2320_v60 = vpop.eup %2319 }
 0x572   :  { %574 = vrot.lane.b32.xlu1 %v2320_v60, %s2663_s18  ;;  %v373_v4 = vadd.f32 %v2318_v56, %v372_v2  ;;  %v2322_v17 = vpop.eup %2321 }
 0x573   :  { %v692_v18 = vadd.f32 1.0, %v2322_v17 }
 0x574   :  { %v377_v10 = vsel %vm376_vm14, %v2318_v56, %v373_v4 }
 0x575   :  { %v2894_v13 = vsel %vm379_vm15, %v381_v11, %v377_v10  ;;  %2323 = vrcp.f32 %v692_v18  ;;  %v705_v30 = vand.u32 2147483648, %v692_v18  ;;  %vm699_vm1 = vweird.f32 %v692_v18 }
 0x576   :  { %2325 = vpow2.f32 %v2198_v21  ;;  %v703_v31 = vand.u32 2147483647, %v692_v18  ;;  %vm769_vm15 = vcmask 1043459  }
 0x577   :  { %v706_v34 = vor.u32 1.1754944e-38, %v705_v30  ;;  %v729_v30 = vrot.slane %v2822_v45, 7 }
 0x578   :  { %vm704_vm3 = vcmp.eq.f32.partialorder %v703_v31, 8.507059e+37 }
 0x57b   :  { %v2324_v20 = vpop.eup %2323 }
 0x57c   :  { %v695_v23 = vmul.f32 %v2324_v20, %v692_v18  ;;  %v2326_v26 = vpop.eup %2325  ;;  %vm700_vm0 = vweird.f32 %v2324_v20 }
 0x57d   :  { %v693_v27 = vadd.f32 1.0, %v2326_v26  ;;  %vm701_vm2 = vmor %vm699_vm1, %vm700_vm0 }
 0x57e   :  { %v696_v24 = vsub.f32 1.0, %v695_v23 }
 0x57f   :  { %2327 = vrcp.f32 %v693_v27  ;;  %v720_v50 = vand.u32 2147483648, %v693_v27  ;;  %vm714_vm5 = vweird.f32 %v693_v27  ;;  %v718_v62 = vand.u32 2147483647, %v693_v27 }
 0x580   :  { %v697_v25 = vmul.f32 %v2324_v20, %v696_v24  ;;  %2329 = vpow2.f32 %v2193_v32 }
 0x581   :  { %v721_v53 = vor.u32 1.1754944e-38, %v720_v50  ;;  %vm719_vm7 = vcmp.eq.f32.partialorder %v718_v62, 8.507059e+37 }
 0x582   :  { %v698_v29 = vadd.f32 %v2324_v20, %v697_v25 }
 0x584   :  { %v388_v14 = vpop.permute.xlu0 %387  ;;  %v702_v33 = vsel %vm701_vm2, %v2324_v20, %v698_v29  ;;  %v728_v20 = vrot.slane %v2826_v48, 7 }
 0x585   :  { %v390_v15 = vmul.f32 %v388_v14, %v2894_v13  ;;  %v2898_v38 = vsel %vm704_vm3, %v706_v34, %v702_v33  ;;  %v2328_v41 = vpop.eup %2327 }
 0x586   :  { %v2330_v42 = vpop.eup %2329  ;;  %v710_v43 = vmul.f32 %v2328_v41, %v693_v27  ;;  %vm715_vm4 = vweird.f32 %v2328_v41  ;;  %v732_v21 = vmul.f32 %v728_v20, %v2898_v38 }
 0x587   :  { %392 = vrot.lane.b32.xlu1 %v390_v15, %s2663_s18  ;;  %v555_v44 = vadd.f32 1.0, %v2330_v42  ;;  %vm716_vm6 = vmor %vm714_vm5, %vm715_vm4  ;;  %v385_v15 = vmul.f32 0.0, %v2894_v13 }
 0x588   :  { %v711_v46 = vsub.f32 1.0, %v710_v43 }
 0x589   :  { %2331 = vrcp.f32 %v555_v44  ;;  %v567_v2 = vand.u32 2147483648, %v555_v44  ;;  %vm561_vm12 = vweird.f32 %v555_v44  ;;  %v565_v4 = vand.u32 2147483647, %v555_v44 }
 0x58a   :  { %v712_v47 = vmul.f32 %v2328_v41, %v711_v46 }
 0x58b   :  { %v568_v7 = vor.u32 1.1754944e-38, %v567_v2  ;;  %vm566_vm14 = vcmp.eq.f32.partialorder %v565_v4, 8.507059e+37 }
 0x58c   :  { %v713_v49 = vadd.f32 %v2328_v41, %v712_v47 }
 0x58e   :  { %v717_v51 = vsel %vm716_vm6, %v2328_v41, %v713_v49 }
 0x58f   :  { %v2332_v58 = vpop.eup %2331  ;;  %v722_v55 = vsel %vm719_vm7, %v721_v53, %v717_v51 }
 0x590   :  { %v557_v52 = vmul.f32 %v2332_v58, %v555_v44  ;;  %vm562_vm8 = vweird.f32 %v2332_v58  ;;  %v733_v48 = vmul.f32 %v729_v30, %v722_v55 }
 0x591   :  { %vm563_vm13 = vmor %vm561_vm12, %vm562_vm8 }
 0x592   :  { %v558_v60 = vsub.f32 1.0, %v557_v52 }
 0x594   :  { %v559_v63 = vmul.f32 %v2332_v58, %v558_v60 }
 0x596   :  { %v560_v0 = vadd.f32 %v2332_v58, %v559_v63 }
 0x598   :  { %v564_v6 = vsel %vm563_vm13, %v2332_v58, %v560_v0 }
 0x599   :  { %v569_v11 = vsel %vm566_vm14, %v568_v7, %v564_v6 }
 0x59a   :  { %v572_v26 = vmul.f32 %v569_v11, %v2815_v39 }
 0x5bb   :  { %v737_v37 = vpop.permute.xlu2 %736 }
 0x5bc   :  { %v742_v40 = vmul.f32 %v737_v37, %v2898_v38 }
 0x5be   :  { %746 = vrot.lane.b32.xlu0 %v742_v40, %s2663_s18 }
 0x5d4   :  { %v739_v56 = vpop.permute.xlu0 %738 }
 0x5d5   :  { %v743_v57 = vmul.f32 %v739_v56, %v722_v55 }
 0x5d7   :  { %748 = vrot.lane.b32.xlu1 %v743_v57, %s2663_s18 }
 0x5e4   :  { %v575_v10 = vpop.permute.xlu1 %574 }
 0x5e5   :  { %v577_v14 = vmul.f32 %v575_v10, %v569_v11 }
 0x5e7   :  { %579 = vrot.lane.b32.xlu2 %v577_v14, %s2663_s18 }
 0x5f9   :  { %v393_v16 = vpop.permute.xlu1 %392 }
 0x5fa   :  { %v2905_v17 = vadd.f32 %v393_v16, %v385_v15 }
 0x5fc   :  { %2333 = vtanh.f32 %v2905_v17 }
 0x602   :  { %v2334_v18 = vpop.eup %2333 }
 0x603   :  { %398 = vrot.lane.b32.xlu2 %v2334_v18, %s2663_s18 }
 0x630   :  { %v747_v23 = vpop.permute.xlu0 %746 }
 0x631   :  { %v2911_v24 = vadd.f32 %v747_v23, %v732_v21 }
 0x633   :  { %2335 = vtanh.f32 %v2911_v24 }
 0x639   :  { %v2336_v25 = vpop.eup %2335 }
 0x63a   :  { %758 = vrot.lane.b32.xlu1 %v2336_v25, %s2663_s18 }
 0x641   :  { %v580_v27 = vpop.permute.xlu2 %579 }
 0x642   :  { %v2916_v29 = vadd.f32 %v580_v27, %v572_v26 }
 0x644   :  { %2337 = vtanh.f32 %v2916_v29 }
 0x649   :  { %v749_v31 = vpop.permute.xlu1 %748 }
 0x64a   :  { %v2338_v32 = vpop.eup %2337  ;;  %v2920_v33 = vadd.f32 %v749_v31, %v733_v48 }
 0x64b   :  { %585 = vrot.lane.b32.xlu0 %v2338_v32, %s2663_s18 }
 0x64c   :  { %2339 = vtanh.f32 %v2920_v33 }
 0x652   :  { %v2340_v34 = vpop.eup %2339 }
 0x653   :  { %760 = vrot.lane.b32.xlu2 %v2340_v34, %s2663_s18 }
 0x65d   :  { %v399_v39 = vpop.permute.xlu2 %398 }
 0x65e   :  { %v401_v37 = vmul.f32 %v399_v39, %v2894_v13 }
 0x660   :  { %594 = vrot.lane.b32.xlu1 %v401_v37, %s2665_s21 }
 0x6ac   :  { %v759_v40 = vpop.permute.xlu1 %758 }
 0x6ad   :  { %v764_v45 = vmul.f32 %v759_v40, %v2898_v38  ;;  %v761_v41 = vpop.permute.xlu2 %760 }
 0x6ae   :  { %v765_v42 = vmul.f32 %v761_v41, %v722_v55 }
 0x6af   :  { %v898_v43 = vpack.c.bf16 %v764_v45, %v764_v45 }
 0x6b0   :  { %v899_v44 = vpack.c.bf16 %v765_v42, %v765_v42  ;;  %v768_v38 = vrot.slane %v765_v42, 7 }
 0x6b1   :  { %v902_v46 = vunpack.c.l.b16 %v898_v43 }
 0x6b2   :  { %v903_v47 = vunpack.c.l.b16 %v899_v44  ;;  %v770_v53 = vsel %vm769_vm15, %v768_v38, %v764_v45 }
 0x6b3   :  { %v904_v49 = vrot.slane %v902_v46, 2 }
 0x6b4   :  { %v905_v58 = vrot.slane %v903_v47, 1 }
 0x6b6   :  { %v906_v50 = vsel %vm282_vm9, %v905_v58, %v904_v49 }
 0x6b7   :  { %v907_v62 = vpack.c.b16 %v906_v50, %v906_v50 }
 0x6b9   :  { %908 = vrot.lane.b32.xlu2 %v907_v62, %s2664_s3 }
 0x6bd   :  { %v586_v51 = vpop.permute.xlu0 %585 }
 0x6be   :  { %v588_v13 = vmul.f32 %v586_v51, %v569_v11 }
 0x6c0   :  { %v774_v52 = vrot.slane %v588_v13, 6  ;;  %590 = vrot.lane.b32.xlu0 %v588_v13, %s2664_s3 }
 0x6c2   :  { %775 = vrot.lane.b32.xlu1 %v774_v52, %s2665_s21 }
 0x6c8   :  { %771 = vrot.lane.b32.xlu0 %v770_v53, %s2664_s3 }
 0x6d2   :  { %v595_v55 = vpop.permute.xlu1 %594 }
 0x713   :  { %v909_v7 = vpop.permute.xlu2 %908 }
 0x732   :  { %v591_v56 = vpop.permute.xlu0 %590 }
 0x733   :  { %v597_v57 = vsel %vm182_vm10, %v591_v56, %v595_v55 }
 0x734   :  { %v598_v60 = vpack.c.bf16 %v597_v57, %v597_v57  ;;  %v776_v63 = vpop.permute.xlu1 %775 }
 0x736   :  { %2194 = vmatmul.msk.bf16.vlgmr.msrb.gmra.mxu2 %vm289_vm11, %v598_v60 }
 0x737   :  { %1289 = vmatpush.bf16.msrb.mxu2 %v2768_v3 }
 0x73a   :  { %v772_v0 = vpop.permute.xlu0 %771 }
 0x73b   :  { %v778_v2 = vsel %vm182_vm10, %v772_v0, %v776_v63  ;;  %1290 = vmatpush.bf16.msrb.mxu2 %v2771_v5 }
 0x73c   :  { %v779_v4 = vpack.c.bf16 %v778_v2, %v778_v2 }
 0x73e   :  { %v781_v6 = vrot.slane %v779_v4, 1 }
 0x73f   :  { %1291 = vmatpush.bf16.msrb.mxu2 %v2776_v9 }
 0x740   :  { %2199 = vmatmul.msk.bf16.vlgmr.msra.gmra.mxu0 %vm289_vm11, %v781_v6 }
 0x741   :  { %1419 = vmatpush.bf16.msra.mxu0 %v2739_v8 }
 0x743   :  { %1292 = vmatpush.bf16.msrb.mxu2 %v2787_v28 }
 0x745   :  { %1420 = vmatpush.bf16.msra.mxu0 %v2742_v12 }
 0x746   :  { %2203 = vmatmul.msk.bf16.vlgmr.msra.gmra.mxu2 %vm182_vm10, %v909_v7 }
 0x747   :  { %1605 = vmatpush.bf16.msra.mxu2 %v2833_v54 }
 0x74b   :  { %1606 = vmatpush.bf16.msra.mxu2 %v2839_v59 }
 0x74f   :  { %1607 = vmatpush.bf16.msra.mxu2 %v2842_v61 }
 0x753   :  { %1608 = vmatpush.bf16.msra.mxu2 %v2851_v1 }
 0x7b9   :  { %v611_v10 = vpop.f32.mrf.mxu2 }
 0x7ba   :  { %v612_v11 = vadd.f32 %v2884_v35, %v611_v10 }
 0x7bc   :  { %2341 = vtanh.f32 %v612_v11  ;;  %v2195_v32 = vmul.f32 -1.442695, %v612_v11 }
 0x7bd   :  { %v794_v14 = vpop.f32.mrf.mxu0 }
 0x7be   :  { %v795_v15 = vadd.f32 %v2799_v36, %v794_v14 }
 0x7c0   :  { %2343 = vtanh.f32 %v795_v15  ;;  %v2200_v42 = vmul.f32 -1.442695, %v795_v15 }
 0x7c1   :  { %v613_v16 = vpop.f32.mrf.mxu2 }
 0x7c2   :  { %v2342_v18 = vpop.eup %2341 }
 0x7c3   :  { %637 = vrot.lane.b32.xlu2 %v2342_v18, %s2663_s18 }
 0x7c5   :  { %v796_v20 = vpop.f32.mrf.mxu0 }
 0x7c6   :  { %v2344_v21 = vpop.eup %2343 }
 0x7c7   :  { %820 = vrot.lane.b32.xlu0 %v2344_v21, %s2663_s18 }
 0x7c9   :  { %v922_v23 = vpop.f32.mrf.mxu2 }
 0x7ca   :  { %v927_v25 = vrot.slane %v922_v23, 5  ;;  %v928_v26 = vrot.slane %v922_v23, 6 }
 0x7cc   :  { %v931_v27 = vadd.f32 %v927_v25, %v2753_v22  ;;  %v932_v30 = vadd.f32 %v928_v26, %v2750_v19 }
 0x7ce   :  { %2345 = vtanh.f32 %v931_v27  ;;  %v2204_v37 = vmul.f32 -1.442695, %v931_v27  ;;  %v2205_v52 = vmul.f32 -1.442695, %v932_v30 }
 0x7cf   :  { %2347 = vtanh.f32 %v932_v30 }
 0x7d0   :  { %2349 = vpow2.f32 %v2195_v32 }
 0x7d1   :  { %v924_v48 = vpop.f32.mrf.mxu2 }
 0x7d4   :  { %v2346_v36 = vpop.eup %2345 }
 0x7d5   :  { %v2348_v31 = vpop.eup %2347  ;;  %983 = vrot.lane.b32.xlu2 %v2346_v36, %s2663_s18 }
 0x7d6   :  { %985 = vrot.lane.b32.xlu1 %v2348_v31, %s2663_s18  ;;  %v2350_v34 = vpop.eup %2349 }
 0x7d7   :  { %v618_v39 = vadd.f32 1.0, %v2350_v34 }
 0x7d9   :  { %2351 = vrcp.f32 %v618_v39  ;;  %v630_v58 = vand.u32 2147483648, %v618_v39  ;;  %vm624_vm1 = vweird.f32 %v618_v39  ;;  %v628_v50 = vand.u32 2147483647, %v618_v39 }
 0x7da   :  { %2353 = vpow2.f32 %v2204_v37 }
 0x7db   :  { %2355 = vpow2.f32 %v2200_v42  ;;  %v631_v38 = vor.u32 1.1754944e-38, %v630_v58  ;;  %vm629_vm3 = vcmp.eq.f32.partialorder %v628_v50, 8.507059e+37 }
 0x7df   :  { %v2352_v40 = vpop.eup %2351 }
 0x7e0   :  { %v620_v45 = vmul.f32 %v2352_v40, %v618_v39  ;;  %v2354_v41 = vpop.eup %2353  ;;  %vm625_vm0 = vweird.f32 %v2352_v40 }
 0x7e1   :  { %v939_v44 = vadd.f32 1.0, %v2354_v41  ;;  %v2356_v47 = vpop.eup %2355  ;;  %vm626_vm2 = vmor %vm624_vm1, %vm625_vm0 }
 0x7e2   :  { %v621_v43 = vsub.f32 1.0, %v620_v45  ;;  %v801_v51 = vadd.f32 1.0, %v2356_v47 }
 0x7e3   :  { %2357 = vrcp.f32 %v939_v44  ;;  %v952_v10 = vand.u32 2147483648, %v939_v44  ;;  %vm946_vm5 = vweird.f32 %v939_v44  ;;  %v950_v11 = vand.u32 2147483647, %v939_v44 }
 0x7e4   :  { %v622_v46 = vmul.f32 %v2352_v40, %v621_v43  ;;  %2359 = vrcp.f32 %v801_v51  ;;  %v813_v27 = vand.u32 2147483648, %v801_v51  ;;  %vm807_vm12 = vweird.f32 %v801_v51 }
 0x7e5   :  { %2361 = vpow2.f32 %v2205_v52  ;;  %v953_v16 = vor.u32 1.1754944e-38, %v952_v10  ;;  %vm951_vm7 = vcmp.eq.f32.partialorder %v950_v11, 8.507059e+37  ;;  %v811_v30 = vand.u32 2147483647, %v801_v51 }
 0x7e6   :  { %v623_v49 = vadd.f32 %v2352_v40, %v622_v46  ;;  %v814_v31 = vor.u32 1.1754944e-38, %v813_v27  ;;  %v976_v52 = vrot.slane %v2920_v33, 7 }
 0x7e7   :  { %vm812_vm14 = vcmp.eq.f32.partialorder %v811_v30, 8.507059e+37 }
 0x7e8   :  { %v627_v13 = vsel %vm626_vm2, %v2352_v40, %v623_v49 }
 0x7e9   :  { %v2358_v62 = vpop.eup %2357  ;;  %v2956_v56 = vsel %vm629_vm3, %v631_v38, %v627_v13  ;;  %v975_v13 = vrot.slane %v2911_v24, 7  ;;  %vm1016_vm3 = vcmask 1044484  }
 0x7ea   :  { %v942_v53 = vmul.f32 %v2358_v62, %v939_v44  ;;  %v2360_v63 = vpop.eup %2359  ;;  %vm947_vm4 = vweird.f32 %v2358_v62  ;;  %v635_v58 = vmul.f32 %v2956_v56, %v2905_v17 }
 0x7eb   :  { %v2362_v2 = vpop.eup %2361  ;;  %v803_v4 = vmul.f32 %v2360_v63, %v801_v51  ;;  %vm948_vm6 = vmor %vm946_vm5, %vm947_vm4  ;;  %vm808_vm8 = vweird.f32 %v2360_v63 }
 0x7ec   :  { %v943_v60 = vsub.f32 1.0, %v942_v53  ;;  %v940_v6 = vadd.f32 1.0, %v2362_v2  ;;  %vm809_vm13 = vmor %vm807_vm12, %vm808_vm8 }
 0x7ed   :  { %v804_v14 = vsub.f32 1.0, %v803_v4 }
 0x7ee   :  { %v944_v0 = vmul.f32 %v2358_v62, %v943_v60  ;;  %2363 = vrcp.f32 %v940_v6  ;;  %v967_v41 = vand.u32 2147483648, %v940_v6  ;;  %vm961_vm0 = vweird.f32 %v940_v6 }
 0x7ef   :  { %v805_v18 = vmul.f32 %v2360_v63, %v804_v14  ;;  %v965_v42 = vand.u32 2147483647, %v940_v6 }
 0x7f0   :  { %v945_v7 = vadd.f32 %v2358_v62, %v944_v0  ;;  %v968_v44 = vor.u32 1.1754944e-38, %v967_v41 }
 0x7f1   :  { %v806_v26 = vadd.f32 %v2360_v63, %v805_v18  ;;  %vm966_vm2 = vcmp.eq.f32.partialorder %v965_v42, 8.507059e+37 }
 0x7f2   :  { %v949_v15 = vsel %vm948_vm6, %v2358_v62, %v945_v7 }
 0x7f3   :  { %v2960_v20 = vsel %vm951_vm7, %v953_v16, %v949_v15  ;;  %v810_v36 = vsel %vm809_vm13, %v2360_v63, %v806_v26 }
 0x7f4   :  { %v2364_v25 = vpop.eup %2363  ;;  %v815_v34 = vsel %vm812_vm14, %v814_v31, %v810_v36  ;;  %v979_v38 = vmul.f32 %v975_v13, %v2960_v20 }
 0x7f5   :  { %v957_v48 = vmul.f32 %v2364_v25, %v940_v6  ;;  %vm962_vm15 = vweird.f32 %v2364_v25  ;;  %v818_v0 = vmul.f32 %v815_v34, %v2916_v29 }
 0x7f6   :  { %vm963_vm1 = vmor %vm961_vm0, %vm962_vm15 }
 0x7f7   :  { %v958_v39 = vsub.f32 1.0, %v957_v48 }
 0x7f9   :  { %v959_v40 = vmul.f32 %v2364_v25, %v958_v39 }
 0x7fb   :  { %v960_v45 = vadd.f32 %v2364_v25, %v959_v40 }
 0x7fd   :  { %v964_v43 = vsel %vm963_vm1, %v2364_v25, %v960_v45 }
 0x7fe   :  { %v969_v46 = vsel %vm966_vm2, %v968_v44, %v964_v43 }
 0x81d   :  { %v638_v55 = vpop.permute.xlu2 %637 }
 0x81e   :  { %v640_v57 = vmul.f32 %v638_v55, %v2956_v56  ;;  %v980_v55 = vmul.f32 %v976_v52, %v969_v46 }
 0x820   :  { %642 = vrot.lane.b32.xlu0 %v640_v57, %s2663_s18 }
 0x82f   :  { %v984_v21 = vpop.permute.xlu2 %983 }
 0x830   :  { %v989_v23 = vmul.f32 %v984_v21, %v2960_v20 }
 0x832   :  { %993 = vrot.lane.b32.xlu0 %v989_v23, %s2663_s18 }
 0x839   :  { %v821_v32 = vpop.permute.xlu0 %820 }
 0x83a   :  { %v823_v37 = vmul.f32 %v821_v32, %v815_v34 }
 0x83c   :  { %825 = vrot.lane.b32.xlu1 %v823_v37, %s2663_s18 }
 0x848   :  { %v986_v47 = vpop.permute.xlu1 %985 }
 0x849   :  { %v990_v49 = vmul.f32 %v986_v47, %v969_v46 }
 0x84b   :  { %995 = vrot.lane.b32.xlu2 %v990_v49, %s2663_s18 }
 0x892   :  { %v643_v50 = vpop.permute.xlu0 %642 }
 0x893   :  { %v2968_v62 = vadd.f32 %v643_v50, %v635_v58 }
 0x895   :  { %2365 = vtanh.f32 %v2968_v62 }
 0x89b   :  { %v2366_v51 = vpop.eup %2365 }
 0x89c   :  { %648 = vrot.lane.b32.xlu1 %v2366_v51, %s2663_s18 }
 0x8a4   :  { %v994_v53 = vpop.permute.xlu0 %993 }
 0x8a5   :  { %v2975_v57 = vadd.f32 %v994_v53, %v979_v38  ;;  %v996_v60 = vpop.permute.xlu2 %995 }
 0x8a6   :  { %v2977_v17 = vadd.f32 %v996_v60, %v980_v55 }
 0x8a7   :  { %2367 = vtanh.f32 %v2975_v57 }
 0x8a8   :  { %2369 = vtanh.f32 %v2977_v17 }
 0x8ad   :  { %v2368_v63 = vpop.eup %2367 }
 0x8ae   :  { %v2370_v2 = vpop.eup %2369  ;;  %1005 = vrot.lane.b32.xlu1 %v2368_v63, %s2663_s18  ;;  %v826_v24 = vpop.permute.xlu1 %825 }
 0x8af   :  { %1007 = vrot.lane.b32.xlu0 %v2370_v2, %s2663_s18  ;;  %v2984_v33 = vadd.f32 %v826_v24, %v818_v0  ;;  %v3015_v0 = vld [vmem:[%s3263_s5] ss:$0 sm:$0xff] }
 0x8b1   :  { %2371 = vtanh.f32 %v2984_v33 }
 0x8b7   :  { %v2372_v4 = vpop.eup %2371 }
 0x8b8   :  { %831 = vrot.lane.b32.xlu2 %v2372_v4, %s2663_s18 }
 0x90e   :  { %v649_v6 = vpop.permute.xlu1 %648 }
 0x90f   :  { %v651_v7 = vmul.f32 %v649_v6, %v2956_v56 }
 0x911   :  { %840 = vrot.lane.b32.xlu0 %v651_v7, %s2665_s21 }
 0x912   :  { %v832_v10 = vpop.permute.xlu2 %831 }
 0x913   :  { %v834_v29 = vmul.f32 %v832_v10, %v815_v34 }
 0x915   :  { %v1021_v11 = vrot.slane %v834_v29, 5 }
 0x917   :  { %1022 = vrot.lane.b32.xlu1 %v1021_v11, %s2665_s21 }
 0x920   :  { %v1006_v14 = vpop.permute.xlu1 %1005 }
 0x921   :  { %v1008_v15 = vpop.permute.xlu0 %1007  ;;  %v1011_v16 = vmul.f32 %v1006_v14, %v2960_v20 }
 0x922   :  { %v1012_v18 = vmul.f32 %v1008_v15, %v969_v46 }
 0x923   :  { %v1151_v21 = vpack.c.bf16 %v1011_v16, %v1011_v16 }
 0x924   :  { %v1015_v23 = vrot.slane %v1012_v18, 7  ;;  %v1152_v25 = vpack.c.bf16 %v1012_v18, %v1012_v18 }
 0x925   :  { %v1155_v26 = vunpack.c.l.b16 %v1151_v21 }
 0x926   :  { %v1156_v27 = vunpack.c.l.b16 %v1152_v25  ;;  %v1017_v30 = vsel %vm1016_vm3, %v1015_v23, %v1011_v16 }
 0x927   :  { %v2249_v56 = vpack.i.bf16 %v1017_v30, %v834_v29  ;;  %v1157_v36 = vrot.slane %v1155_v26, 3 }
 0x928   :  { %v1158_v48 = vrot.slane %v1156_v27, 2 }
 0x929   :  { %2250 = vrot.lane.b32.xlu2 %v2249_v56, %s2664_s3 }
 0x92a   :  { %v1159_v31 = vsel %vm282_vm9, %v1158_v48, %v1157_v36 }
 0x92b   :  { %v1160_v32 = vpack.c.b16 %v1159_v31, %v1159_v31 }
 0x931   :  { %1161 = vrot.lane.b32.xlu2 %v1160_v32, %s2664_s3 }
 0x983   :  { %v2251_v34 = vpop.permute.xlu2 %2250  ;;  %v841_v20 = vpop.permute.xlu0 %840 }
 0x984   :  { %v2252_v39 = vunpack.i.l.bf16 %v2251_v34  ;;  %v2253_v45 = vunpack.i.h.bf16 %v2251_v34 }
 0x986   :  { %v843_v37 = vsel %vm182_vm10, %v2252_v39, %v841_v20 }
 0x987   :  { %v844_v40 = vpack.c.bf16 %v843_v37, %v843_v37 }
 0x989   :  { %2201 = vmatmul.msk.bf16.vlgmr.msra.gmra.mxu1 %vm289_vm11, %v844_v40  ;;  %v1023_v41 = vpop.permute.xlu1 %1022 }
 0x98a   :  { %v1025_v42 = vsel %vm182_vm10, %v2253_v45, %v1023_v41  ;;  %1542 = vmatpush.bf16.msra.mxu1 %v2768_v3 }
 0x98b   :  { %v1026_v43 = vpack.c.bf16 %v1025_v42, %v1025_v42  ;;  %v1162_v50 = vpop.permute.xlu2 %1161 }
 0x98d   :  { %v1028_v44 = vshrl.u32 %v1026_v43, 16  ;;  %v1031_v46 = vshll.u32 %v1026_v43, 16 }
 0x98e   :  { %1543 = vmatpush.bf16.msra.mxu1 %v2771_v5 }
 0x98f   :  { %v1030_v47 = vrot.slane %v1028_v44, 1  ;;  %v1033_v49 = vrot.slane %v1031_v46, 2 }
 0x991   :  { %v1034_v58 = vor.u32 %v1033_v49, %v1030_v47 }
 0x992   :  { %1544 = vmatpush.bf16.msra.mxu1 %v2776_v9 }
 0x993   :  { %2206 = vmatmul.msk.bf16.vlgmr.msra.gmra.mxu3 %vm289_vm11, %v1034_v58 }
 0x994   :  { %1672 = vmatpush.bf16.msra.mxu3 %v2739_v8 }
 0x996   :  { %1545 = vmatpush.bf16.msra.mxu1 %v2787_v28 }
 0x998   :  { %1673 = vmatpush.bf16.msra.mxu3 %v2742_v12 }
 0x999   :  { %2210 = vmatmul.msk.bf16.vlgmr.msrb.gmra.mxu1 %vm182_vm10, %v1162_v50 }
 0x99a   :  { %1852 = vmatpush.bf16.msrb.mxu1 %v2833_v54 }
 0x99e   :  { %1853 = vmatpush.bf16.msrb.mxu1 %v2839_v59 }
 0x9a2   :  { %1854 = vmatpush.bf16.msrb.mxu1 %v2842_v61 }
 0x9a6   :  { %1855 = vmatpush.bf16.msrb.mxu1 %v2851_v1 }
 0xa06   :  { %v857_v51 = vpop.f32.mrf.mxu1 }
 0xa07   :  { %v858_v13 = vadd.f32 %v2884_v35, %v857_v51 }
 0xa09   :  { %2373 = vtanh.f32 %v858_v13  ;;  %v2202_v14 = vmul.f32 -1.442695, %v858_v13 }
 0xa0e   :  { %v859_v52 = vpop.f32.mrf.mxu1 }
 0xa0f   :  { %v2374_v38 = vpop.eup %2373 }
 0xa10   :  { %883 = vrot.lane.b32.xlu0 %v2374_v38, %s2663_s18 }
 0xa16   :  { %v1175_v53 = vpop.f32.mrf.mxu1  ;;  %v1047_v55 = vpop.f32.mrf.mxu3 }
 0xa17   :  { %v1180_v60 = vrot.slane %v1175_v53, 4  ;;  %v1181_v63 = vrot.slane %v1175_v53, 5  ;;  %v1048_v2 = vadd.f32 %v3015_v0, %v1047_v55 }
 0xa19   :  { %v1184_v24 = vadd.f32 %v1180_v60, %v2753_v22  ;;  %v1185_v35 = vadd.f32 %v1181_v63, %v2750_v19  ;;  %2375 = vtanh.f32 %v1048_v2  ;;  %v2207_v23 = vmul.f32 -1.442695, %v1048_v2 }
 0xa1b   :  { %2377 = vtanh.f32 %v1184_v24  ;;  %v2212_v11 = vmul.f32 -1.442695, %v1185_v35  ;;  %v2211_v26 = vmul.f32 -1.442695, %v1184_v24 }
 0xa1c   :  { %2379 = vtanh.f32 %v1185_v35 }
 0xa1d   :  { %2381 = vpow2.f32 %v2212_v11 }
 0xa1e   :  { %v1177_v4 = vpop.f32.mrf.mxu1  ;;  %v1049_v6 = vpop.f32.mrf.mxu3  ;;  %2383 = vpow2.f32 %v2202_v14 }
 0xa1f   :  { %v2376_v7 = vpop.eup %2375 }
 0xa20   :  { %1073 = vrot.lane.b32.xlu1 %v2376_v7, %s2663_s18 }
 0xa21   :  { %v2378_v10 = vpop.eup %2377 }
 0xa22   :  { %v2380_v29 = vpop.eup %2379  ;;  %1236 = vrot.lane.b32.xlu0 %v2378_v10, %s2663_s18 }
 0xa23   :  { %1238 = vrot.lane.b32.xlu2 %v2380_v29, %s2663_s18  ;;  %v2382_v15 = vpop.eup %2381 }
 0xa24   :  { %v1193_v16 = vadd.f32 1.0, %v2382_v15  ;;  %v2384_v18 = vpop.eup %2383 }
 0xa25   :  { %v864_v21 = vadd.f32 1.0, %v2384_v18 }
 0xa26   :  { %2385 = vrcp.f32 %v1193_v16  ;;  %v1220_v40 = vand.u32 2147483648, %v1193_v16  ;;  %vm1214_vm5 = vweird.f32 %v1193_v16  ;;  %v1218_v41 = vand.u32 2147483647, %v1193_v16 }
 0xa27   :  { %2387 = vrcp.f32 %v864_v21  ;;  %v876_v47 = vand.u32 2147483648, %v864_v21  ;;  %vm870_vm12 = vweird.f32 %v864_v21  ;;  %v874_v50 = vand.u32 2147483647, %v864_v21 }
 0xa28   :  { %2389 = vpow2.f32 %v2207_v23  ;;  %v1221_v43 = vor.u32 1.1754944e-38, %v1220_v40  ;;  %vm1219_vm8 = vcmp.eq.f32.partialorder %v1218_v41, 8.507059e+37 }
 0xa29   :  { %2391 = vpow2.f32 %v2211_v26  ;;  %v877_v53 = vor.u32 1.1754944e-38, %v876_v47  ;;  %vm875_vm14 = vcmp.eq.f32.partialorder %v874_v50, 8.507059e+37 }
 0xa2c   :  { %v2386_v25 = vpop.eup %2385 }
 0xa2d   :  { %v1210_v27 = vmul.f32 %v2386_v25, %v1193_v16  ;;  %v2388_v30 = vpop.eup %2387  ;;  %vm1215_vm4 = vweird.f32 %v2386_v25 }
 0xa2e   :  { %v2390_v48 = vpop.eup %2389  ;;  %v866_v36 = vmul.f32 %v2388_v30, %v864_v21  ;;  %vm1216_vm6 = vmor %vm1214_vm5, %vm1215_vm4  ;;  %vm871_vm7 = vweird.f32 %v2388_v30 }
 0xa2f   :  { %v1211_v56 = vsub.f32 1.0, %v1210_v27  ;;  %v2392_v31 = vpop.eup %2391  ;;  %v1054_v32 = vadd.f32 1.0, %v2390_v48  ;;  %vm872_vm13 = vmor %vm870_vm12, %vm871_vm7  ;;  %vm1269_vm7 = vcmask 1045509  }
 0xa30   :  { %v867_v20 = vsub.f32 1.0, %v866_v36  ;;  %v1192_v39 = vadd.f32 1.0, %v2392_v31  ;;  %v1229_v31 = vrot.slane %v2977_v17, 7 }
 0xa31   :  { %v1212_v34 = vmul.f32 %v2386_v25, %v1211_v56  ;;  %2393 = vrcp.f32 %v1054_v32  ;;  %v1066_v10 = vand.u32 2147483648, %v1054_v32  ;;  %vm1060_vm0 = vweird.f32 %v1054_v32 }
 0xa32   :  { %v868_v45 = vmul.f32 %v2388_v30, %v867_v20  ;;  %2395 = vrcp.f32 %v1192_v39  ;;  %v1064_v29 = vand.u32 2147483647, %v1054_v32  ;;  %v1205_v14 = vand.u32 2147483648, %v1192_v39 }
 0xa33   :  { %v1213_v37 = vadd.f32 %v2386_v25, %v1212_v34  ;;  %vm1199_vm3 = vweird.f32 %v1192_v39  ;;  %v1203_v16 = vand.u32 2147483647, %v1192_v39  ;;  %v1067_v18 = vor.u32 1.1754944e-38, %v1066_v10 }
 0xa34   :  { %v869_v44 = vadd.f32 %v2388_v30, %v868_v45  ;;  %vm1065_vm5 = vcmp.eq.f32.partialorder %v1064_v29, 8.507059e+37  ;;  %v1206_v26 = vor.u32 1.1754944e-38, %v1205_v14 }
 0xa35   :  { %v1217_v42 = vsel %vm1216_vm6, %v2386_v25, %v1213_v37  ;;  %vm1204_vm6 = vcmp.eq.f32.partialorder %v1203_v16, 8.507059e+37 }
 0xa36   :  { %v3023_v58 = vsel %vm1219_vm8, %v1221_v43, %v1217_v42  ;;  %v873_v52 = vsel %vm872_vm13, %v2388_v30, %v869_v44  ;;  %v1228_v43 = vrot.slane %v2975_v57, 7 }
 0xa37   :  { %v2394_v46 = vpop.eup %2393  ;;  %v878_v63 = vsel %vm875_vm14, %v877_v53, %v873_v52  ;;  %v1233_v20 = vmul.f32 %v1229_v31, %v3023_v58 }
 0xa38   :  { %v2396_v51 = vpop.eup %2395  ;;  %v1056_v38 = vmul.f32 %v2394_v46, %v1054_v32  ;;  %vm1061_vm15 = vweird.f32 %v2394_v46  ;;  %v881_v40 = vmul.f32 %v878_v63, %v2968_v62 }
 0xa39   :  { %v1195_v55 = vmul.f32 %v2396_v51, %v1192_v39  ;;  %vm1200_vm1 = vweird.f32 %v2396_v51  ;;  %vm1062_vm2 = vmor %vm1060_vm0, %vm1061_vm15 }
 0xa3a   :  { %v1057_v24 = vsub.f32 1.0, %v1056_v38  ;;  %vm1201_vm4 = vmor %vm1199_vm3, %vm1200_vm1 }
 0xa3b   :  { %v1196_v35 = vsub.f32 1.0, %v1195_v55 }
 0xa3c   :  { %v1058_v4 = vmul.f32 %v2394_v46, %v1057_v24 }
 0xa3d   :  { %v1197_v6 = vmul.f32 %v2396_v51, %v1196_v35 }
 0xa3e   :  { %v1059_v7 = vadd.f32 %v2394_v46, %v1058_v4 }
 0xa3f   :  { %v1198_v11 = vadd.f32 %v2396_v51, %v1197_v6 }
 0xa40   :  { %v1063_v15 = vsel %vm1062_vm2, %v2394_v46, %v1059_v7 }
 0xa41   :  { %v1202_v21 = vsel %vm1201_vm4, %v2396_v51, %v1198_v11  ;;  %v1068_v25 = vsel %vm1065_vm5, %v1067_v18, %v1063_v15 }
 0xa42   :  { %v1207_v30 = vsel %vm1204_vm6, %v1206_v26, %v1202_v21  ;;  %v1071_v36 = vmul.f32 %v1068_v25, %v2984_v33 }
 0xa43   :  { %v1232_v44 = vmul.f32 %v1228_v43, %v1207_v30 }
 0xa7d   :  { %v1239_v49 = vpop.permute.xlu2 %1238 }
 0xa7e   :  { %v1243_v13 = vmul.f32 %v1239_v49, %v3023_v58 }
 0xa80   :  { %1248 = vrot.lane.b32.xlu0 %v1243_v13, %s2663_s18 }
 0xa82   :  { %v884_v60 = vpop.permute.xlu0 %883 }
 0xa83   :  { %v886_v2 = vmul.f32 %v884_v60, %v878_v63 }
 0xa85   :  { %888 = vrot.lane.b32.xlu1 %v886_v2, %s2663_s18 }
 0xa92   :  { %v1074_v23 = vpop.permute.xlu1 %1073 }
 0xa93   :  { %v1076_v27 = vmul.f32 %v1074_v23, %v1068_v25 }
 0xa94   :  { %v1237_v56 = vpop.permute.xlu0 %1236 }
 0xa95   :  { %v1242_v48 = vmul.f32 %v1237_v56, %v1207_v30  ;;  %1078 = vrot.lane.b32.xlu2 %v1076_v27, %s2663_s18 }
 0xa97   :  { %1246 = vrot.lane.b32.xlu1 %v1242_v48, %s2663_s18 }
 0xaef   :  { %v1079_v32 = vpop.permute.xlu2 %1078 }
 0xaf0   :  { %v3032_v34 = vadd.f32 %v1079_v32, %v1071_v36 }
 0xaf2   :  { %2397 = vtanh.f32 %v3032_v34  ;;  %v1249_v39 = vpop.permute.xlu0 %1248 }
 0xaf3   :  { %v3036_v37 = vadd.f32 %v1249_v39, %v1233_v20 }
 0xaf5   :  { %2399 = vtanh.f32 %v3036_v37 }
 0xaf7   :  { %v889_v45 = vpop.permute.xlu1 %888 }
 0xaf8   :  { %v2398_v41 = vpop.eup %2397  ;;  %v3040_v42 = vadd.f32 %v889_v45, %v881_v40 }
 0xaf9   :  { %1084 = vrot.lane.b32.xlu0 %v2398_v41, %s2663_s18 }
 0xafa   :  { %2401 = vtanh.f32 %v3040_v42 }
 0xafb   :  { %v2400_v17 = vpop.eup %2399 }
 0xafc   :  { %1260 = vrot.lane.b32.xlu1 %v2400_v17, %s2663_s18 }
 0xb00   :  { %v2402_v33 = vpop.eup %2401 }
 0xb01   :  { %894 = vrot.lane.b32.xlu2 %v2402_v33, %s2663_s18 }
 0xb09   :  { %v1247_v46 = vpop.permute.xlu1 %1246 }
 0xb0a   :  { %v3047_v47 = vadd.f32 %v1247_v46, %v1232_v44 }
 0xb0c   :  { %2403 = vtanh.f32 %v3047_v47 }
 0xb12   :  { %v2404_v62 = vpop.eup %2403 }
 0xb13   :  { %1258 = vrot.lane.b32.xlu2 %v2404_v62, %s2663_s18 }
 0xb5b   :  { %v895_v49 = vpop.permute.xlu2 %894 }
 0xb5c   :  { %v897_v50 = vmul.f32 %v895_v49, %v878_v63 }
 0xb5e   :  { %1093 = vrot.lane.b32.xlu1 %v897_v50, %s2665_s21 }
 0xb6b   :  { %v1085_v51 = vpop.permute.xlu0 %1084 }
 0xb6c   :  { %v1087_v13 = vmul.f32 %v1085_v51, %v1068_v25 }
 0xb6d   :  { %v1259_v52 = vpop.permute.xlu2 %1258 }
 0xb6e   :  { %v1274_v38 = vrot.slane %v1087_v13, 4  ;;  %v1261_v53 = vpop.permute.xlu1 %1260  ;;  %v1264_v55 = vmul.f32 %v1259_v52, %v1207_v30 }
 0xb6f   :  { %v1265_v57 = vmul.f32 %v1261_v53, %v3023_v58 }
 0xb70   :  { %v1398_v60 = vpack.c.bf16 %v1264_v55, %v1264_v55  ;;  %1275 = vrot.lane.b32.xlu2 %v1274_v38, %s2665_s21 }
 0xb71   :  { %v1268_v2 = vrot.slane %v1265_v57, 7  ;;  %v1399_v24 = vpack.c.bf16 %v1265_v57, %v1265_v57 }
 0xb72   :  { %v1402_v35 = vunpack.c.l.b16 %v1398_v60 }
 0xb73   :  { %v1403_v4 = vunpack.c.l.b16 %v1399_v24  ;;  %v1270_v6 = vsel %vm1269_vm7, %v1268_v2, %v1264_v55 }
 0xb74   :  { %v2254_v63 = vpack.i.bf16 %v1270_v6, %v1087_v13  ;;  %v1404_v10 = vrot.slane %v1402_v35, 4 }
 0xb75   :  { %v1405_v7 = vrot.slane %v1403_v4, 3 }
 0xb76   :  { %2255 = vrot.lane.b32.xlu0 %v2254_v63, %s2664_s3 }
 0xb77   :  { %v1406_v29 = vsel %vm282_vm9, %v1405_v7, %v1404_v10 }
 0xb78   :  { %v1407_v11 = vpack.c.b16 %v1406_v29, %v1406_v29 }
 0xb7e   :  { %1408 = vrot.lane.b32.xlu0 %v1407_v11, %s2664_s3 }
 0xbca   :  { %v1276_v16 = vpop.permute.xlu2 %1275 }
 0xbd0   :  { %v1094_v18 = vpop.permute.xlu1 %1093 }
 0xbe8   :  { %v2256_v58 = vpop.permute.xlu0 %2255 }
 0xbe9   :  { %v2258_v14 = vunpack.i.h.bf16 %v2256_v58  ;;  %v2257_v15 = vunpack.i.l.bf16 %v2256_v58 }
 0xbeb   :  { %v1096_v21 = vsel %vm182_vm10, %v2257_v15, %v1094_v18  ;;  %v1278_v23 = vsel %vm182_vm10, %v2258_v14, %v1276_v16 }
 0xbec   :  { %v1097_v25 = vpack.c.bf16 %v1096_v21, %v1096_v21  ;;  %v1279_v26 = vpack.c.bf16 %v1278_v23, %v1278_v23 }
 0xbee   :  { %v1281_v27 = vrot.slane %v1279_v26, 2  ;;  %2208 = vmatmul.msk.bf16.vlgmr.msrb.gmra.mxu0 %vm289_vm11, %v1097_v25 }
 0xbef   :  { %1789 = vmatpush.bf16.msrb.mxu0 %v2768_v3 }
 0xbf0   :  { %2213 = vmatmul.msk.bf16.vlgmr.msrb.gmra.mxu2 %vm289_vm11, %v1281_v27  ;;  %v1409_v30 = vpop.permute.xlu0 %1408 }
 0xbf1   :  { %1919 = vmatpush.bf16.msrb.mxu2 %v2739_v8 }
 0xbf3   :  { %1790 = vmatpush.bf16.msrb.mxu0 %v2771_v5 }
 0xbf5   :  { %1920 = vmatpush.bf16.msrb.mxu2 %v2742_v12  ;;  %v3075_v12 = vld [vmem:[%s3265_s7] ss:$0 sm:$0xff] }
 0xbf7   :  { %1791 = vmatpush.bf16.msrb.mxu0 %v2776_v9 }
 0xbfb   :  { %1792 = vmatpush.bf16.msrb.mxu0 %v2787_v28 }
 0xbfe   :  { %2217 = vmatmul.msk.bf16.vlgmr.msra.gmra.mxu0 %vm182_vm10, %v1409_v30 }
 0xbff   :  { %2107 = vmatpush.bf16.msra.mxu0 %v2833_v54 }
 0xc03   :  { %2108 = vmatpush.bf16.msra.mxu0 %v2839_v59 }
 0xc07   :  { %2109 = vmatpush.bf16.msra.mxu0 %v2842_v61 }
 0xc0b   :  { %2110 = vmatpush.bf16.msra.mxu0 %v2851_v1 }
 0xc6b   :  { %v1110_v8 = vpop.f32.mrf.mxu0 }
 0xc6c   :  { %v1111_v56 = vadd.f32 %v3075_v12, %v1110_v8 }
 0xc6e   :  { %2405 = vtanh.f32 %v1111_v56  ;;  %v2209_v46 = vmul.f32 -1.442695, %v1111_v56 }
 0xc73   :  { %v1112_v48 = vpop.f32.mrf.mxu0  ;;  %v1294_v36 = vpop.f32.mrf.mxu2 }
 0xc74   :  { %v2406_v31 = vpop.eup %2405  ;;  %v1295_v54 = vadd.f32 %v3015_v0, %v1294_v36 }
 0xc75   :  { %1136 = vrot.lane.b32.xlu1 %v2406_v31, %s2663_s18 }
 0xc76   :  { %2407 = vtanh.f32 %v1295_v54  ;;  %v2214_v33 = vmul.f32 -1.442695, %v1295_v54 }
 0xc7b   :  { %v1296_v59 = vpop.f32.mrf.mxu2  ;;  %v1422_v61 = vpop.f32.mrf.mxu0 }
 0xc7c   :  { %v2408_v1 = vpop.eup %2407  ;;  %v1427_v32 = vrot.slane %v1422_v61, 3  ;;  %v1428_v20 = vrot.slane %v1422_v61, 4 }
 0xc7d   :  { %1320 = vrot.lane.b32.xlu2 %v2408_v1, %s2663_s18 }
 0xc7e   :  { %v1431_v39 = vadd.f32 %v1427_v32, %v2753_v22  ;;  %v1432_v40 = vadd.f32 %v1428_v20, %v2750_v19 }
 0xc80   :  { %2409 = vtanh.f32 %v1431_v39  ;;  %v2218_v52 = vmul.f32 -1.442695, %v1431_v39  ;;  %v2219_v53 = vmul.f32 -1.442695, %v1432_v40 }
 0xc81   :  { %2411 = vtanh.f32 %v1432_v40 }
 0xc82   :  { %2413 = vpow2.f32 %v2214_v33 }
 0xc83   :  { %v1424_v45 = vpop.f32.mrf.mxu0 }
 0xc86   :  { %v2410_v41 = vpop.eup %2409 }
 0xc87   :  { %1483 = vrot.lane.b32.xlu1 %v2410_v41, %s2663_s18  ;;  %v2412_v17 = vpop.eup %2411 }
 0xc88   :  { %1485 = vrot.lane.b32.xlu0 %v2412_v17, %s2663_s18  ;;  %v2414_v43 = vpop.eup %2413 }
 0xc89   :  { %v1301_v44 = vadd.f32 1.0, %v2414_v43 }
 0xc8b   :  { %2415 = vrcp.f32 %v1301_v44  ;;  %v1313_v60 = vand.u32 2147483648, %v1301_v44  ;;  %vm1307_vm12 = vweird.f32 %v1301_v44  ;;  %v1311_v2 = vand.u32 2147483647, %v1301_v44 }
 0xc8c   :  { %2417 = vpow2.f32 %v2209_v46 }
 0xc8d   :  { %v1314_v4 = vor.u32 1.1754944e-38, %v1313_v60  ;;  %vm1312_vm14 = vcmp.eq.f32.partialorder %v1311_v2, 8.507059e+37  ;;  %v1475_v2 = vrot.slane %v3047_v47, 7 }
 0xc91   :  { %v2416_v62 = vpop.eup %2415 }
 0xc92   :  { %v2418_v49 = vpop.eup %2417  ;;  %v1303_v50 = vmul.f32 %v2416_v62, %v1301_v44  ;;  %vm1308_vm8 = vweird.f32 %v2416_v62 }
 0xc93   :  { %v1117_v51 = vadd.f32 1.0, %v2418_v49  ;;  %vm1309_vm13 = vmor %vm1307_vm12, %vm1308_vm8 }
 0xc94   :  { %v1304_v13 = vsub.f32 1.0, %v1303_v50 }
 0xc95   :  { %2419 = vrcp.f32 %v1117_v51  ;;  %v1129_v18 = vand.u32 2147483648, %v1117_v51  ;;  %vm1123_vm0 = vweird.f32 %v1117_v51  ;;  %v1127_v21 = vand.u32 2147483647, %v1117_v51 }
 0xc96   :  { %v1305_v38 = vmul.f32 %v2416_v62, %v1304_v13  ;;  %2421 = vpow2.f32 %v2218_v52 }
 0xc97   :  { %2423 = vpow2.f32 %v2219_v53  ;;  %v1130_v26 = vor.u32 1.1754944e-38, %v1129_v18  ;;  %vm1128_vm2 = vcmp.eq.f32.partialorder %v1127_v21, 8.507059e+37 }
 0xc98   :  { %v1306_v55 = vadd.f32 %v2416_v62, %v1305_v38 }
 0xc9a   :  { %v1310_v24 = vsel %vm1309_vm13, %v2416_v62, %v1306_v55 }
 0xc9b   :  { %v2420_v57 = vpop.eup %2419  ;;  %v3085_v7 = vsel %vm1312_vm14, %v1314_v4, %v1310_v24  ;;  %vm1516_vm14 = vcmask 1046534  }
 0xc9c   :  { %v1119_v35 = vmul.f32 %v2420_v57, %v1117_v51  ;;  %v2422_v6 = vpop.eup %2421  ;;  %vm1124_vm15 = vweird.f32 %v2420_v57  ;;  %v1318_v53 = vmul.f32 %v3085_v7, %v3032_v34 }
 0xc9d   :  { %v1439_v11 = vadd.f32 1.0, %v2422_v6  ;;  %v2424_v58 = vpop.eup %2423  ;;  %vm1125_vm1 = vmor %vm1123_vm0, %vm1124_vm15  ;;  %v1476_v6 = vrot.slane %v3036_v37, 7 }
 0xc9e   :  { %v1120_v29 = vsub.f32 1.0, %v1119_v35  ;;  %v1440_v15 = vadd.f32 1.0, %v2424_v58 }
 0xc9f   :  { %2425 = vrcp.f32 %v1439_v11  ;;  %v1452_v32 = vand.u32 2147483648, %v1439_v11  ;;  %vm1446_vm4 = vweird.f32 %v1439_v11  ;;  %v1450_v20 = vand.u32 2147483647, %v1439_v11 }
 0xca0   :  { %v1121_v14 = vmul.f32 %v2420_v57, %v1120_v29  ;;  %2427 = vrcp.f32 %v1440_v15  ;;  %v1467_v45 = vand.u32 2147483648, %v1440_v15  ;;  %vm1461_vm7 = vweird.f32 %v1440_v15 }
 0xca1   :  { %v1453_v41 = vor.u32 1.1754944e-38, %v1452_v32  ;;  %v1465_v17 = vand.u32 2147483647, %v1440_v15  ;;  %vm1451_vm8 = vcmp.eq.f32.partialorder %v1450_v20, 8.507059e+37 }
 0xca2   :  { %v1122_v16 = vadd.f32 %v2420_v57, %v1121_v14  ;;  %v1468_v62 = vor.u32 1.1754944e-38, %v1467_v45 }
 0xca3   :  { %vm1466_vm13 = vcmp.eq.f32.partialorder %v1465_v17, 8.507059e+37 }
 0xca4   :  { %v1126_v25 = vsel %vm1125_vm1, %v2420_v57, %v1122_v16 }
 0xca5   :  { %v2426_v23 = vpop.eup %2425  ;;  %v1131_v56 = vsel %vm1128_vm2, %v1130_v26, %v1126_v25 }
 0xca6   :  { %v1442_v27 = vmul.f32 %v2426_v23, %v1439_v11  ;;  %v2428_v30 = vpop.eup %2427  ;;  %vm1447_vm3 = vweird.f32 %v2426_v23  ;;  %v1134_v13 = vmul.f32 %v1131_v56, %v3040_v42 }
 0xca7   :  { %v1457_v36 = vmul.f32 %v2428_v30, %v1440_v15  ;;  %vm1448_vm5 = vmor %vm1446_vm4, %vm1447_vm3  ;;  %vm1462_vm6 = vweird.f32 %v2428_v30 }
 0xca8   :  { %v1443_v31 = vsub.f32 1.0, %v1442_v27  ;;  %vm1463_vm12 = vmor %vm1461_vm7, %vm1462_vm6 }
 0xca9   :  { %v1458_v54 = vsub.f32 1.0, %v1457_v36 }
 0xcaa   :  { %v1444_v59 = vmul.f32 %v2426_v23, %v1443_v31 }
 0xcab   :  { %v1459_v61 = vmul.f32 %v2428_v30, %v1458_v54 }
 0xcac   :  { %v1445_v1 = vadd.f32 %v2426_v23, %v1444_v59 }
 0xcad   :  { %v1460_v39 = vadd.f32 %v2428_v30, %v1459_v61 }
 0xcae   :  { %v1449_v40 = vsel %vm1448_vm5, %v2426_v23, %v1445_v1 }
 0xcaf   :  { %v1454_v33 = vsel %vm1451_vm8, %v1453_v41, %v1449_v40  ;;  %v1464_v44 = vsel %vm1463_vm12, %v2428_v30, %v1460_v39 }
 0xcb0   :  { %v1469_v50 = vsel %vm1466_vm13, %v1468_v62, %v1464_v44  ;;  %v1479_v42 = vmul.f32 %v1475_v2, %v1454_v33 }
 0xcd7   :  { %v1321_v63 = vpop.permute.xlu2 %1320 }
 0xcd8   :  { %v1323_v10 = vmul.f32 %v1321_v63, %v3085_v7  ;;  %v1480_v63 = vmul.f32 %v1476_v6, %v1469_v50 }
 0xcda   :  { %1325 = vrot.lane.b32.xlu0 %v1323_v10, %s2663_s18 }
 0xce7   :  { %v1137_v8 = vpop.permute.xlu1 %1136 }
 0xce8   :  { %v1139_v48 = vmul.f32 %v1137_v8, %v1131_v56 }
 0xcea   :  { %1141 = vrot.lane.b32.xlu2 %v1139_v48, %s2663_s18 }
 0xcf9   :  { %v1484_v43 = vpop.permute.xlu1 %1483 }
 0xcfa   :  { %v1489_v46 = vmul.f32 %v1484_v43, %v1454_v33  ;;  %v1486_v49 = vpop.permute.xlu0 %1485 }
 0xcfb   :  { %v1490_v51 = vmul.f32 %v1486_v49, %v1469_v50 }
 0xcfc   :  { %1493 = vrot.lane.b32.xlu2 %v1489_v46, %s2663_s18 }
 0xcfd   :  { %1495 = vrot.lane.b32.xlu1 %v1490_v51, %s2663_s18 }
 0xd44   :  { %v1142_v52 = vpop.permute.xlu2 %1141 }
 0xd45   :  { %v3093_v38 = vadd.f32 %v1142_v52, %v1134_v13 }
 0xd47   :  { %2429 = vtanh.f32 %v3093_v38 }
 0xd4c   :  { %v1326_v55 = vpop.permute.xlu0 %1325 }
 0xd4d   :  { %v2430_v57 = vpop.eup %2429  ;;  %v3098_v60 = vadd.f32 %v1326_v55, %v1318_v53 }
 0xd4e   :  { %1147 = vrot.lane.b32.xlu0 %v2430_v57, %s2663_s18 }
 0xd4f   :  { %2431 = vtanh.f32 %v3098_v60 }
 0xd55   :  { %v2432_v24 = vpop.eup %2431 }
 0xd56   :  { %v1494_v35 = vpop.permute.xlu2 %1493  ;;  %1331 = vrot.lane.b32.xlu1 %v2432_v24, %s2663_s18 }
 0xd57   :  { %v3104_v4 = vadd.f32 %v1494_v35, %v1479_v42 }
 0xd59   :  { %2433 = vtanh.f32 %v3104_v4 }
 0xd5f   :  { %v2434_v34 = vpop.eup %2433 }
 0xd60   :  { %1505 = vrot.lane.b32.xlu0 %v2434_v34, %s2663_s18 }
 0xd6f   :  { %v1496_v10 = vpop.permute.xlu1 %1495 }
 0xd70   :  { %v3109_v29 = vadd.f32 %v1496_v10, %v1480_v63 }
 0xd72   :  { %2435 = vtanh.f32 %v3109_v29 }
 0xd78   :  { %v2436_v47 = vpop.eup %2435 }
 0xd79   :  { %1507 = vrot.lane.b32.xlu2 %v2436_v47, %s2663_s18 }
 0xdc0   :  { %v1148_v11 = vpop.permute.xlu0 %1147 }
 0xdc1   :  { %v1150_v58 = vmul.f32 %v1148_v11, %v1131_v56 }
 0xdc3   :  { %1340 = vrot.lane.b32.xlu2 %v1150_v58, %s2665_s21 }
 0xdc8   :  { %v1332_v14 = vpop.permute.xlu1 %1331 }
 0xdc9   :  { %v1334_v15 = vmul.f32 %v1332_v14, %v3085_v7 }
 0xdcb   :  { %1336 = vrot.lane.b32.xlu1 %v1334_v15, %s2664_s3  ;;  %v1521_v16 = vrot.slane %v1334_v15, 3 }
 0xdd2   :  { %v1506_v37 = vpop.permute.xlu0 %1505 }
 0xdd3   :  { %v1511_v18 = vmul.f32 %v1506_v37, %v1454_v33  ;;  %1522 = vrot.lane.b32.xlu1 %v1521_v16, %s2665_s21  ;;  %v1508_v23 = vpop.permute.xlu2 %1507 }
 0xdd4   :  { %v1512_v25 = vmul.f32 %v1508_v23, %v1469_v50 }
 0xdd5   :  { %v1651_v21 = vpack.c.bf16 %v1511_v18, %v1511_v18 }
 0xdd6   :  { %v1515_v27 = vrot.slane %v1512_v25, 7  ;;  %v1652_v30 = vpack.c.bf16 %v1512_v25, %v1512_v25 }
 0xdd7   :  { %v1655_v26 = vunpack.c.l.b16 %v1651_v21 }
 0xdd8   :  { %v1656_v8 = vunpack.c.l.b16 %v1652_v30  ;;  %v1517_v48 = vsel %vm1516_vm14, %v1515_v27, %v1511_v18 }
 0xdd9   :  { %v1657_v56 = vrot.slane %v1655_v26, 5  ;;  %1518 = vrot.lane.b32.xlu0 %v1517_v48, %s2664_s3 }
 0xdda   :  { %v1658_v7 = vrot.slane %v1656_v8, 4 }
 0xddc   :  { %v1659_v36 = vsel %vm282_vm9, %v1658_v7, %v1657_v56 }
 0xddd   :  { %v1660_v31 = vpack.c.b16 %v1659_v36, %v1659_v36 }
 0xddf   :  { %1661 = vrot.lane.b32.xlu2 %v1660_v31, %s2664_s3 }
 0xe1d   :  { %v1341_v54 = vpop.permute.xlu2 %1340 }
 0xe39   :  { %v1662_v40 = vpop.permute.xlu2 %1661 }
 0xe3d   :  { %v1337_v59 = vpop.permute.xlu1 %1336 }
 0xe3e   :  { %v1343_v61 = vsel %vm182_vm10, %v1337_v59, %v1341_v54 }
 0xe3f   :  { %v1344_v1 = vpack.c.bf16 %v1343_v61, %v1343_v61 }
 0xe41   :  { %2215 = vmatmul.msk.bf16.vlgmr.msrb.gmra.mxu3 %vm289_vm11, %v1344_v1 }
 0xe42   :  { %2044 = vmatpush.bf16.msrb.mxu3 %v2768_v3 }
 0xe45   :  { %v1523_v32 = vpop.permute.xlu1 %1522 }
 0xe46   :  { %2045 = vmatpush.bf16.msrb.mxu3 %v2771_v5 }
 0xe4a   :  { %2046 = vmatpush.bf16.msrb.mxu3 %v2776_v9 }
 0xe4b   :  { %v1519_v20 = vpop.permute.xlu0 %1518 }
 0xe4c   :  { %v1525_v39 = vsel %vm182_vm10, %v1519_v20, %v1523_v32 }
 0xe4d   :  { %v1526_v45 = vpack.c.bf16 %v1525_v39, %v1525_v39 }
 0xe4e   :  { %2047 = vmatpush.bf16.msrb.mxu3 %v2787_v28 }
 0xe4f   :  { %v1528_v41 = vshrl.u32 %v1526_v45, 16  ;;  %v1531_v17 = vshll.u32 %v1526_v45, 16 }
 0xe51   :  { %2224 = vmatmul.msk.bf16.vlgmr.msra.gmra.mxu3 %vm182_vm10, %v1662_v40  ;;  %v1530_v33 = vrot.slane %v1528_v41, 2  ;;  %v1533_v43 = vrot.slane %v1531_v17, 3 }
 0xe53   :  { %v1534_v44 = vor.u32 %v1533_v43, %v1530_v33 }
 0xe55   :  { %2220 = vmatmul.msk.bf16.vlgmr.msra.gmra.mxu1 %vm289_vm11, %v1534_v44 }
 0xec4   :  { %v1357_v3 = vpop.f32.mrf.mxu3 }
 0xec5   :  { %v1358_v5 = vadd.f32 %v3075_v12, %v1357_v3 }
 0xec7   :  { %2437 = vtanh.f32 %v1358_v5 }
 0xecc   :  { %v1359_v9 = vpop.f32.mrf.mxu3 }
 0xecd   :  { %v2438_v46 = vpop.eup %2437 }
 0xece   :  { %1383 = vrot.lane.b32.xlu0 %v2438_v46, %s2663_s18 }
 0xed2   :  { %v1547_v62 = vpop.f32.mrf.mxu1 }
 0xed3   :  { %v1548_v51 = vadd.f32 %v3015_v0, %v1547_v62  ;;  %v2216_v0 = vmul.f32 -1.442695, %v1358_v5 }
 0xed4   :  { %v1675_v28 = vpop.f32.mrf.mxu3 }
 0xed5   :  { %v1680_v49 = vrot.slane %v1675_v28, 2  ;;  %v1681_v50 = vrot.slane %v1675_v28, 3  ;;  %2439 = vtanh.f32 %v1548_v51  ;;  %v2221_v47 = vmul.f32 -1.442695, %v1548_v51 }
 0xed7   :  { %v1684_v13 = vadd.f32 %v1680_v49, %v2753_v22  ;;  %v1685_v52 = vadd.f32 %v1681_v50, %v2750_v19 }
 0xed9   :  { %2441 = vtanh.f32 %v1684_v13  ;;  %v2225_v42 = vmul.f32 -1.442695, %v1684_v13  ;;  %v2226_v58 = vmul.f32 -1.442695, %v1685_v52 }
 0xeda   :  { %2443 = vtanh.f32 %v1685_v52  ;;  %v1549_v55 = vpop.f32.mrf.mxu1 }
 0xedb   :  { %v2440_v57 = vpop.eup %2439  ;;  %2445 = vpow2.f32 %v2225_v42 }
 0xedc   :  { %v1677_v53 = vpop.f32.mrf.mxu3  ;;  %1573 = vrot.lane.b32.xlu1 %v2440_v57, %s2663_s18  ;;  %2447 = vpow2.f32 %v2216_v0 }
 0xedf   :  { %v2442_v2 = vpop.eup %2441 }
 0xee0   :  { %1736 = vrot.lane.b32.xlu2 %v2442_v2, %s2663_s18  ;;  %v2444_v24 = vpop.eup %2443 }
 0xee1   :  { %1738 = vrot.lane.b32.xlu0 %v2444_v24, %s2663_s18  ;;  %v2446_v35 = vpop.eup %2445 }
 0xee2   :  { %v1692_v34 = vadd.f32 1.0, %v2446_v35  ;;  %v2448_v6 = vpop.eup %2447 }
 0xee3   :  { %v1364_v63 = vadd.f32 1.0, %v2448_v6 }
 0xee4   :  { %2449 = vrcp.f32 %v1692_v34  ;;  %v1705_v27 = vand.u32 2147483648, %v1692_v34  ;;  %vm1699_vm0 = vweird.f32 %v1692_v34  ;;  %v1703_v30 = vand.u32 2147483647, %v1692_v34 }
 0xee5   :  { %2451 = vrcp.f32 %v1364_v63  ;;  %v1376_v59 = vand.u32 2147483648, %v1364_v63  ;;  %vm1370_vm4 = vweird.f32 %v1364_v63  ;;  %v1374_v32 = vand.u32 2147483647, %v1364_v63 }
 0xee6   :  { %2453 = vpow2.f32 %v2221_v47  ;;  %v1706_v7 = vor.u32 1.1754944e-38, %v1705_v27  ;;  %vm1704_vm2 = vcmp.eq.f32.partialorder %v1703_v30, 8.507059e+37 }
 0xee7   :  { %2455 = vpow2.f32 %v2226_v58  ;;  %v1377_v39 = vor.u32 1.1754944e-38, %v1376_v59  ;;  %vm1375_vm6 = vcmp.eq.f32.partialorder %v1374_v32, 8.507059e+37 }
 0xeea   :  { %v2450_v10 = vpop.eup %2449 }
 0xeeb   :  { %v1695_v11 = vmul.f32 %v2450_v10, %v1692_v34  ;;  %v2452_v14 = vpop.eup %2451  ;;  %vm1700_vm15 = vweird.f32 %v2450_v10  ;;  %v1728_v34 = vrot.slane %v3104_v4, 7 }
 0xeec   :  { %v1366_v16 = vmul.f32 %v2452_v14, %v1364_v63  ;;  %v2454_v37 = vpop.eup %2453  ;;  %vm1701_vm1 = vmor %vm1699_vm0, %vm1700_vm15  ;;  %vm1371_vm3 = vweird.f32 %v2452_v14 }
 0xeed   :  { %v1696_v15 = vsub.f32 1.0, %v1695_v11  ;;  %v1554_v21 = vadd.f32 1.0, %v2454_v37  ;;  %v2456_v25 = vpop.eup %2455  ;;  %vm1372_vm5 = vmor %vm1370_vm4, %vm1371_vm3 }
 0xeee   :  { %v1367_v23 = vsub.f32 1.0, %v1366_v16  ;;  %v1693_v56 = vadd.f32 1.0, %v2456_v25 }
 0xeef   :  { %v1697_v18 = vmul.f32 %v2450_v10, %v1696_v15  ;;  %2457 = vrcp.f32 %v1554_v21  ;;  %v1566_v46 = vand.u32 2147483648, %v1554_v21  ;;  %vm1560_vm8 = vweird.f32 %v1554_v21 }
 0xef0   :  { %v1368_v8 = vmul.f32 %v2452_v14, %v1367_v23  ;;  %2459 = vrcp.f32 %v1693_v56  ;;  %v1564_v62 = vand.u32 2147483647, %v1554_v21  ;;  %v1720_v13 = vand.u32 2147483648, %v1693_v56 }
 0xef1   :  { %v1698_v26 = vadd.f32 %v2450_v10, %v1697_v18  ;;  %v1567_v50 = vor.u32 1.1754944e-38, %v1566_v46  ;;  %vm1714_vm15 = vweird.f32 %v1693_v56  ;;  %v1718_v55 = vand.u32 2147483647, %v1693_v56 }
 0xef2   :  { %v1369_v36 = vadd.f32 %v2452_v14, %v1368_v8  ;;  %vm1565_vm14 = vcmp.eq.f32.partialorder %v1564_v62, 8.507059e+37  ;;  %v1721_v24 = vor.u32 1.1754944e-38, %v1720_v13  ;;  %v1729_v18 = vrot.slane %v3109_v29, 7 }
 0xef3   :  { %v1702_v48 = vsel %vm1701_vm1, %v2450_v10, %v1698_v26  ;;  %vm1719_vm1 = vcmp.eq.f32.partialorder %v1718_v55, 8.507059e+37 }
 0xef4   :  { %v3137_v54 = vsel %vm1704_vm2, %v1706_v7, %v1702_v48  ;;  %v1373_v20 = vsel %vm1372_vm5, %v2452_v14, %v1369_v36  ;;  %vm1769_vm2 = vcmask 1047559  }
 0xef5   :  { %v2458_v61 = vpop.eup %2457  ;;  %v1378_v17 = vsel %vm1375_vm6, %v1377_v39, %v1373_v20  ;;  %v1732_v10 = vmul.f32 %v1728_v34, %v3137_v54 }
 0xef6   :  { %v1556_v40 = vmul.f32 %v2458_v61, %v1554_v21  ;;  %v2460_v45 = vpop.eup %2459  ;;  %vm1561_vm7 = vweird.f32 %v2458_v61  ;;  %v1381_v14 = vmul.f32 %v1378_v17, %v3093_v38 }
 0xef7   :  { %v1710_v44 = vmul.f32 %v2460_v45, %v1693_v56  ;;  %vm1562_vm12 = vmor %vm1560_vm8, %vm1561_vm7  ;;  %vm1715_vm13 = vweird.f32 %v2460_v45 }
 0xef8   :  { %v1557_v43 = vsub.f32 1.0, %v1556_v40  ;;  %vm1716_vm0 = vmor %vm1714_vm15, %vm1715_vm13 }
 0xef9   :  { %v1711_v5 = vsub.f32 1.0, %v1710_v44 }
 0xefa   :  { %v1558_v3 = vmul.f32 %v2458_v61, %v1557_v43 }
 0xefb   :  { %v1712_v28 = vmul.f32 %v2460_v45, %v1711_v5 }
 0xefc   :  { %v1559_v9 = vadd.f32 %v2458_v61, %v1558_v3 }
 0xefd   :  { %v1713_v51 = vadd.f32 %v2460_v45, %v1712_v28 }
 0xefe   :  { %v1563_v49 = vsel %vm1562_vm12, %v2458_v61, %v1559_v9 }
 0xeff   :  { %v1568_v53 = vsel %vm1565_vm14, %v1567_v50, %v1563_v49  ;;  %v1717_v2 = vsel %vm1716_vm0, %v2460_v45, %v1713_v51  ;;  %v3180_v50 = vld [vmem:[%s3263_s5] ss:$0 sm:$0xff] }
 0xf00   :  { %v1722_v42 = vsel %vm1719_vm1, %v1721_v24, %v1717_v2  ;;  %v1571_v6 = vmul.f32 %v1568_v53, %v3098_v60 }
 0xf01   :  { %v1733_v21 = vmul.f32 %v1729_v18, %v1722_v42 }
 0xf3a   :  { %v1737_v31 = vpop.permute.xlu2 %1736 }
 0xf3b   :  { %v1742_v1 = vmul.f32 %v1737_v31, %v3137_v54 }
 0xf3d   :  { %1746 = vrot.lane.b32.xlu0 %v1742_v1, %s2663_s18 }
 0xf40   :  { %v1384_v41 = vpop.permute.xlu0 %1383 }
 0xf41   :  { %v1386_v33 = vmul.f32 %v1384_v41, %v1378_v17 }
 0xf43   :  { %1388 = vrot.lane.b32.xlu1 %v1386_v33, %s2663_s18 }
 0xf4e   :  { %v1574_v52 = vpop.permute.xlu1 %1573 }
 0xf4f   :  { %v1576_v57 = vmul.f32 %v1574_v52, %v1568_v53 }
 0xf51   :  { %1578 = vrot.lane.b32.xlu2 %v1576_v57, %s2663_s18 }
 0xf53   :  { %v1739_v0 = vpop.permute.xlu0 %1738 }
 0xf54   :  { %v1743_v35 = vmul.f32 %v1739_v0, %v1722_v42 }
 0xf56   :  { %1748 = vrot.lane.b32.xlu1 %v1743_v35, %s2663_s18 }
 0xfab   :  { %v1579_v63 = vpop.permute.xlu2 %1578 }
 0xfac   :  { %v3147_v47 = vadd.f32 %v1579_v63, %v1571_v6 }
 0xfae   :  { %2461 = vtanh.f32 %v3147_v47 }
 0xfaf   :  { %v1747_v11 = vpop.permute.xlu0 %1746 }
 0xfb0   :  { %v3149_v58 = vadd.f32 %v1747_v11, %v1732_v10 }
 0xfb2   :  { %2463 = vtanh.f32 %v3149_v58 }
 0xfb4   :  { %v2462_v4 = vpop.eup %2461 }
 0xfb5   :  { %v1389_v15 = vpop.permute.xlu1 %1388  ;;  %1584 = vrot.lane.b32.xlu0 %v2462_v4, %s2663_s18 }
 0xfb6   :  { %v3154_v16 = vadd.f32 %v1389_v15, %v1381_v14 }
 0xfb8   :  { %v2464_v37 = vpop.eup %2463  ;;  %2465 = vtanh.f32 %v3154_v16 }
 0xfb9   :  { %1758 = vrot.lane.b32.xlu1 %v2464_v37, %s2663_s18 }
 0xfbe   :  { %v2466_v60 = vpop.eup %2465 }
 0xfbf   :  { %1394 = vrot.lane.b32.xlu2 %v2466_v60, %s2663_s18 }
 0xfc8   :  { %v1749_v23 = vpop.permute.xlu1 %1748 }
 0xfc9   :  { %v3161_v25 = vadd.f32 %v1749_v23, %v1733_v21 }
 0xfcb   :  { %2467 = vtanh.f32 %v3161_v25 }
 0xfd1   :  { %v2468_v38 = vpop.eup %2467 }
 0xfd2   :  { %1760 = vrot.lane.b32.xlu2 %v2468_v38, %s2663_s18 }
0x1019   :  { %v1395_v26 = vpop.permute.xlu2 %1394 }
0x101a   :  { %v1397_v27 = vmul.f32 %v1395_v26, %v1378_v17 }
0x101c   :  { %1593 = vrot.lane.b32.xlu1 %v1397_v27, %s2665_s21 }
0x1027   :  { %v1585_v30 = vpop.permute.xlu0 %1584 }
0x1028   :  { %v1587_v8 = vmul.f32 %v1585_v30, %v1568_v53 }
0x102a   :  { %v1774_v7 = vrot.slane %v1587_v8, 2  ;;  %1589 = vrot.lane.b32.xlu0 %v1587_v8, %s2664_s3 }
0x102b   :  { %v1759_v56 = vpop.permute.xlu1 %1758 }
0x102c   :  { %v1764_v48 = vmul.f32 %v1759_v56, %v3137_v54  ;;  %v1761_v36 = vpop.permute.xlu2 %1760  ;;  %1775 = vrot.lane.b32.xlu1 %v1774_v7, %s2665_s21 }
0x102d   :  { %v1765_v59 = vmul.f32 %v1761_v36, %v1722_v42 }
0x102e   :  { %v1898_v29 = vpack.c.bf16 %v1764_v48, %v1764_v48 }
0x102f   :  { %v1768_v61 = vrot.slane %v1765_v59, 7  ;;  %v1899_v1 = vpack.c.bf16 %v1765_v59, %v1765_v59 }
0x1030   :  { %v1902_v31 = vunpack.c.l.b16 %v1898_v29 }
0x1031   :  { %v1903_v20 = vunpack.c.l.b16 %v1899_v1  ;;  %v1770_v39 = vsel %vm1769_vm2, %v1768_v61, %v1764_v48 }
0x1032   :  { %v1904_v32 = vrot.slane %v1902_v31, 6  ;;  %1771 = vrot.lane.b32.xlu0 %v1770_v39, %s2664_s3 }
0x1033   :  { %v1905_v40 = vrot.slane %v1903_v20, 5 }
0x1035   :  { %v1906_v54 = vsel %vm282_vm9, %v1905_v40, %v1904_v32 }
0x1036   :  { %v1907_v45 = vpack.c.b16 %v1906_v54, %v1906_v54 }
0x1038   :  { %1908 = vrot.lane.b32.xlu2 %v1907_v45, %s2664_s3 }
0x108e   :  { %v1594_v41 = vpop.permute.xlu1 %1593 }
0x1092   :  { %v1909_v28 = vpop.permute.xlu2 %1908 }
0x109c   :  { %v1590_v17 = vpop.permute.xlu0 %1589 }
0x109d   :  { %v1596_v33 = vsel %vm182_vm10, %v1590_v17, %v1594_v41 }
0x109e   :  { %v1597_v43 = vpack.c.bf16 %v1596_v33, %v1596_v33  ;;  %v1776_v44 = vpop.permute.xlu1 %1775 }
0x10a0   :  { %2222 = vmatmul.msk.bf16.vlgmr.msra.gmra.mxu2 %vm289_vm11, %v1597_v43 }
0x10a4   :  { %v1772_v3 = vpop.permute.xlu0 %1771 }
0x10a5   :  { %v1778_v5 = vsel %vm182_vm10, %v1772_v3, %v1776_v44 }
0x10a6   :  { %v1779_v9 = vpack.c.bf16 %v1778_v5, %v1778_v5 }
0x10a8   :  { %v1781_v46 = vrot.slane %v1779_v9, 3 }
0x10aa   :  { %2227 = vmatmul.msk.bf16.vlgmr.msrb.gmra.mxu0 %vm289_vm11, %v1781_v46 }
0x10b0   :  { %2231 = vmatmul.msk.bf16.vlgmr.msrb.gmra.mxu2 %vm182_vm10, %v1909_v28 }
0x1123   :  { %v1610_v62 = vpop.f32.mrf.mxu2 }
0x1124   :  { %v1611_v52 = vadd.f32 %v3075_v12, %v1610_v62 }
0x1126   :  { %v2223_v10 = vmul.f32 -1.442695, %v1611_v52 }
0x1127   :  { %v1794_v49 = vpop.f32.mrf.mxu0 }
0x1128   :  { %v1795_v51 = vadd.f32 %v3180_v50, %v1794_v49 }
0x112a   :  { %2469 = vtanh.f32 %v1795_v51  ;;  %v2228_v63 = vmul.f32 -1.442695, %v1795_v51 }
0x112b   :  { %v1612_v13 = vpop.f32.mrf.mxu2  ;;  %2471 = vtanh.f32 %v1611_v52 }
0x112f   :  { %v1796_v53 = vpop.f32.mrf.mxu0 }
0x1130   :  { %v2470_v55 = vpop.eup %2469 }
0x1131   :  { %1820 = vrot.lane.b32.xlu2 %v2470_v55, %s2663_s18  ;;  %v2472_v35 = vpop.eup %2471 }
0x1133   :  { %v1922_v57 = vpop.f32.mrf.mxu2 }
0x1134   :  { %v1927_v2 = vrot.slane %v1922_v57, 1  ;;  %v1928_v24 = vrot.slane %v1922_v57, 2 }
0x1136   :  { %v1931_v42 = vadd.f32 %v1927_v2, %v2753_v22  ;;  %v1932_v0 = vadd.f32 %v1928_v24, %v2750_v19 }
0x1138   :  { %2473 = vtanh.f32 %v1931_v42  ;;  %v2232_v23 = vmul.f32 -1.442695, %v1931_v42  ;;  %v2233_v27 = vmul.f32 -1.442695, %v1932_v0 }
0x1139   :  { %2475 = vtanh.f32 %v1932_v0  ;;  %1636 = vrot.lane.b32.xlu2 %v2472_v35, %s2663_s18 }
0x113a   :  { %2477 = vpow2.f32 %v2228_v63 }
0x113b   :  { %v1924_v34 = vpop.f32.mrf.mxu2  ;;  %2479 = vpow2.f32 %v2223_v10 }
0x113e   :  { %v2474_v6 = vpop.eup %2473 }
0x113f   :  { %v2476_v12 = vpop.eup %2475  ;;  %1983 = vrot.lane.b32.xlu1 %v2474_v6, %s2663_s18 }
0x1140   :  { %1985 = vrot.lane.b32.xlu0 %v2476_v12, %s2663_s18  ;;  %v2478_v11 = vpop.eup %2477 }
0x1141   :  { %v1801_v22 = vadd.f32 1.0, %v2478_v11  ;;  %v2480_v19 = vpop.eup %2479 }
0x1142   :  { %v1617_v14 = vadd.f32 1.0, %v2480_v19 }
0x1143   :  { %2481 = vrcp.f32 %v1801_v22  ;;  %v1813_v30 = vand.u32 2147483648, %v1801_v22  ;;  %vm1807_vm3 = vweird.f32 %v1801_v22  ;;  %v1811_v8 = vand.u32 2147483647, %v1801_v22 }
0x1144   :  { %2483 = vrcp.f32 %v1617_v14  ;;  %v1629_v61 = vand.u32 2147483648, %v1617_v14  ;;  %vm1623_vm7 = vweird.f32 %v1617_v14  ;;  %v1627_v32 = vand.u32 2147483647, %v1617_v14 }
0x1145   :  { %2485 = vpow2.f32 %v2232_v23  ;;  %v1814_v7 = vor.u32 1.1754944e-38, %v1813_v30  ;;  %vm1812_vm5 = vcmp.eq.f32.partialorder %v1811_v8, 8.507059e+37 }
0x1146   :  { %2487 = vpow2.f32 %v2233_v27  ;;  %v1630_v54 = vor.u32 1.1754944e-38, %v1629_v61  ;;  %vm1628_vm12 = vcmp.eq.f32.partialorder %v1627_v32, 8.507059e+37 }
0x1149   :  { %v2482_v15 = vpop.eup %2481 }
0x114a   :  { %v1803_v4 = vmul.f32 %v2482_v15, %v1801_v22  ;;  %v2484_v60 = vpop.eup %2483  ;;  %vm1808_vm9 = vweird.f32 %v2482_v15 }
0x114b   :  { %v1619_v21 = vmul.f32 %v2484_v60, %v1617_v14  ;;  %vm1809_vm4 = vmor %vm1807_vm3, %vm1808_vm9  ;;  %vm1624_vm6 = vweird.f32 %v2484_v60  ;;  %v2486_v1 = vpop.eup %2485 }
0x114c   :  { %v1804_v37 = vsub.f32 1.0, %v1803_v4  ;;  %v2488_v20 = vpop.eup %2487  ;;  %vm1625_vm8 = vmor %vm1623_vm7, %vm1624_vm6  ;;  %v1939_v40 = vadd.f32 1.0, %v2486_v1 }
0x114d   :  { %v1620_v26 = vsub.f32 1.0, %v1619_v21  ;;  %v1940_v45 = vadd.f32 1.0, %v2488_v20 }
0x114e   :  { %v1805_v18 = vmul.f32 %v2482_v15, %v1804_v37  ;;  %2489 = vrcp.f32 %v1939_v40  ;;  %v1952_v13 = vand.u32 2147483648, %v1939_v40  ;;  %vm1946_vm15 = vweird.f32 %v1939_v40 }
0x114f   :  { %v1621_v48 = vmul.f32 %v2484_v60, %v1620_v26  ;;  %2491 = vrcp.f32 %v1940_v45  ;;  %v1967_v52 = vand.u32 2147483648, %v1940_v45  ;;  %v1950_v53 = vand.u32 2147483647, %v1939_v40 }
0x1150   :  { %v1806_v38 = vadd.f32 %v2482_v15, %v1805_v18  ;;  %vm1961_vm0 = vweird.f32 %v1940_v45  ;;  %v1965_v55 = vand.u32 2147483647, %v1940_v45  ;;  %v1953_v24 = vor.u32 1.1754944e-38, %v1952_v13 }
0x1151   :  { %v1622_v59 = vadd.f32 %v2484_v60, %v1621_v48  ;;  %v1968_v42 = vor.u32 1.1754944e-38, %v1967_v52  ;;  %vm1951_vm9 = vcmp.eq.f32.partialorder %v1950_v53, 8.507059e+37  ;;  %v1975_v37 = vrot.slane %v3149_v58, 7 }
0x1152   :  { %v1810_v56 = vsel %vm1809_vm4, %v2482_v15, %v1806_v38  ;;  %vm1966_vm3 = vcmp.eq.f32.partialorder %v1965_v55, 8.507059e+37 }
0x1153   :  { %v3190_v36 = vsel %vm1812_vm5, %v1814_v7, %v1810_v56  ;;  %v1626_v39 = vsel %vm1625_vm8, %v2484_v60, %v1622_v59 }
0x1154   :  { %v3194_v41 = vsel %vm1628_vm12, %v1630_v54, %v1626_v39  ;;  %v2490_v43 = vpop.eup %2489  ;;  %v1818_v10 = vmul.f32 %v3190_v36, %v3147_v47 }
0x1155   :  { %v2492_v44 = vpop.eup %2491  ;;  %v1942_v3 = vmul.f32 %v2490_v43, %v1939_v40  ;;  %vm1947_vm13 = vweird.f32 %v2490_v43  ;;  %v1634_v19 = vmul.f32 %v3194_v41, %v3154_v16  ;;  %v1976_v16 = vrot.slane %v3161_v25, 7 }
0x1156   :  { %v1957_v5 = vmul.f32 %v2492_v44, %v1940_v45  ;;  %vm1962_vm14 = vweird.f32 %v2492_v44  ;;  %vm1948_vm1 = vmor %vm1946_vm15, %vm1947_vm13 }
0x1157   :  { %v1943_v9 = vsub.f32 1.0, %v1942_v3  ;;  %vm1963_vm2 = vmor %vm1961_vm0, %vm1962_vm14 }
0x1158   :  { %v1958_v46 = vsub.f32 1.0, %v1957_v5 }
0x1159   :  { %v1944_v28 = vmul.f32 %v2490_v43, %v1943_v9 }
0x115a   :  { %v1959_v62 = vmul.f32 %v2492_v44, %v1958_v46 }
0x115b   :  { %v1945_v49 = vadd.f32 %v2490_v43, %v1944_v28 }
0x115c   :  { %v1960_v51 = vadd.f32 %v2492_v44, %v1959_v62  ;;  %v3230_v62 = vld [vmem:[%s3265_s7] ss:$0 sm:$0xff] }
0x115d   :  { %v1949_v57 = vsel %vm1948_vm1, %v2490_v43, %v1945_v49  ;;  %vm2164_vm1 = vcmask 254976  }
0x115e   :  { %v1964_v2 = vsel %vm1963_vm2, %v2492_v44, %v1960_v51  ;;  %v1954_v0 = vsel %vm1951_vm9, %v1953_v24, %v1949_v57  ;;  %vm2173_vm2 = vcmask 1024  }
0x115f   :  { %v1969_v34 = vsel %vm1966_vm3, %v1968_v42, %v1964_v2  ;;  %v1979_v60 = vmul.f32 %v1975_v37, %v1954_v0 }
0x1160   :  { %v1980_v38 = vmul.f32 %v1976_v16, %v1969_v34 }
0x118b   :  { %v1821_v29 = vpop.permute.xlu2 %1820 }
0x118c   :  { %v1823_v31 = vmul.f32 %v1821_v29, %v3190_v36 }
0x118e   :  { %1825 = vrot.lane.b32.xlu0 %v1823_v31, %s2663_s18 }
0x1193   :  { %v1637_v17 = vpop.permute.xlu2 %1636 }
0x1194   :  { %v1639_v33 = vmul.f32 %v1637_v17, %v3194_v41 }
0x1196   :  { %1641 = vrot.lane.b32.xlu0 %v1639_v33, %s2663_s18 }
0x11b1   :  { %v1984_v35 = vpop.permute.xlu1 %1983 }
0x11b2   :  { %v1986_v6 = vpop.permute.xlu0 %1985  ;;  %v1989_v12 = vmul.f32 %v1984_v35, %v1954_v0 }
0x11b3   :  { %v1990_v63 = vmul.f32 %v1986_v6, %v1969_v34 }
0x11b4   :  { %1993 = vrot.lane.b32.xlu2 %v1989_v12, %s2663_s18 }
0x11b5   :  { %1995 = vrot.lane.b32.xlu1 %v1990_v63, %s2663_s18 }
0x1200   :  { %v1826_v11 = vpop.permute.xlu0 %1825 }
0x1201   :  { %v3202_v22 = vadd.f32 %v1826_v11, %v1818_v10 }
0x1203   :  { %2493 = vtanh.f32 %v3202_v22 }
0x1208   :  { %v1642_v14 = vpop.permute.xlu0 %1641 }
0x1209   :  { %v2494_v15 = vpop.eup %2493  ;;  %v3207_v4 = vadd.f32 %v1642_v14, %v1634_v19 }
0x120a   :  { %1831 = vrot.lane.b32.xlu1 %v2494_v15, %s2663_s18 }
0x120b   :  { %2495 = vtanh.f32 %v3207_v4 }
0x120e   :  { %v1994_v47 = vpop.permute.xlu2 %1993 }
0x120f   :  { %v1999_v18 = vadd.f32 %v1994_v47, %v1979_v60 }
0x1211   :  { %v2496_v21 = vpop.eup %2495  ;;  %2497 = vtanh.f32 %v1999_v18 }
0x1212   :  { %1647 = vrot.lane.b32.xlu1 %v2496_v21, %s2663_s18 }
0x1217   :  { %v2498_v23 = vpop.eup %2497 }
0x1218   :  { %2005 = vrot.lane.b32.xlu0 %v2498_v23, %s2663_s18 }
0x1227   :  { %v1996_v26 = vpop.permute.xlu1 %1995 }
0x1228   :  { %v2000_v27 = vadd.f32 %v1996_v26, %v1980_v38 }
0x122a   :  { %2499 = vtanh.f32 %v2000_v27 }
0x1230   :  { %v2500_v30 = vpop.eup %2499 }
0x1231   :  { %2007 = vrot.lane.b32.xlu2 %v2500_v30, %s2663_s18 }
0x127c   :  { %v1832_v58 = vpop.permute.xlu1 %1831 }
0x127d   :  { %v1834_v8 = vmul.f32 %v1832_v58, %v3190_v36 }
0x127f   :  { %v2022_v56 = vrot.slane %v1834_v8, 1  ;;  %1836 = vrot.lane.b32.xlu1 %v1834_v8, %s2664_s3 }
0x1281   :  { %2023 = vrot.lane.b32.xlu0 %v2022_v56, %s2665_s21 }
0x1284   :  { %v1648_v61 = vpop.permute.xlu1 %1647 }
0x1285   :  { %v1650_v1 = vmul.f32 %v1648_v61, %v3194_v41 }
0x128a   :  { %v2006_v48 = vpop.permute.xlu0 %2005 }
0x128b   :  { %v2008_v7 = vpop.permute.xlu2 %2007  ;;  %v2011_v31 = vmul.f32 %v2006_v48, %v1954_v0 }
0x128c   :  { %v2012_v29 = vmul.f32 %v2008_v7, %v1969_v34 }
0x128e   :  { %v2015_v25 = vrot.slane %v2012_v29, 7 }
0x1290   :  { %v2259_v59 = vpack.i.bf16 %v2015_v25, %v2011_v31 }
0x1292   :  { %2260 = vrot.lane.b32.xlu2 %v2259_v59, %s2664_s3 }
0x129a   :  { %1840 = vrot.lane.b32.xlu2 %v1650_v1, %s2665_s21 }
0x12ec   :  { %v2261_v32 = vpop.permute.xlu2 %2260 }
0x12ed   :  { %v2263_v36 = vunpack.i.h.bf16 %v2261_v32  ;;  %v2262_v20 = vunpack.i.l.bf16 %v2261_v32 }
0x12f1   :  { %v1837_v40 = vpop.permute.xlu1 %1836 }
0x12f3   :  { %v2024_v39 = vpop.permute.xlu0 %2023 }
0x12f4   :  { %v2026_v54 = vsel %vm182_vm10, %v2262_v20, %v2024_v39  ;;  %v2027_v45 = vsel %vm182_vm10, %v2263_v36, %v2024_v39  ;;  %v1841_v17 = vpop.permute.xlu2 %1840 }
0x12f5   :  { %v2028_v33 = vpack.c.bf16 %v2027_v45, %v2026_v54  ;;  %v1843_v43 = vsel %vm182_vm10, %v1837_v40, %v1841_v17 }
0x12f6   :  { %v1844_v44 = vpack.c.bf16 %v1843_v43, %v1843_v43 }
0x12f7   :  { %v2030_v3 = vshrl.u32 %v2028_v33, 16  ;;  %v2033_v5 = vshll.u32 %v2028_v33, 16 }
0x12f8   :  { %2229 = vmatmul.msk.bf16.vlgmr.msrb.gmra.mxu1 %vm289_vm11, %v1844_v44 }
0x12f9   :  { %v2032_v41 = vrot.slane %v2030_v3, 3  ;;  %v2035_v9 = vrot.slane %v2033_v5, 4 }
0x12fb   :  { %v2036_v46 = vor.u32 %v2035_v9, %v2032_v41 }
0x12fd   :  { %2234 = vmatmul.msk.bf16.vlgmr.msrb.gmra.mxu3 %vm289_vm11, %v2036_v46 }
0x1375   :  { %v1857_v28 = vpop.f32.mrf.mxu1 }
0x1376   :  { %v1858_v49 = vadd.f32 %v3230_v62, %v1857_v28 }
0x1378   :  { %2501 = vtanh.f32 %v1858_v49  ;;  %v2230_v2 = vmul.f32 -1.442695, %v1858_v49 }
0x137d   :  { %v1859_v51 = vpop.f32.mrf.mxu1 }
0x137e   :  { %v2502_v13 = vpop.eup %2501 }
0x137f   :  { %1883 = vrot.lane.b32.xlu0 %v2502_v13, %s2663_s18 }
0x1380   :  { %v2049_v52 = vpop.f32.mrf.mxu3 }
0x1381   :  { %v2050_v53 = vadd.f32 %v3180_v50, %v2049_v52 }
0x1383   :  { %2503 = vtanh.f32 %v2050_v53  ;;  %v2235_v42 = vmul.f32 -1.442695, %v2050_v53 }
0x1384   :  { %2505 = vpow2.f32 %v2230_v2 }
0x1385   :  { %2507 = vpow2.f32 %v2235_v42 }
0x1388   :  { %v2051_v55 = vpop.f32.mrf.mxu3 }
0x1389   :  { %v2504_v57 = vpop.eup %2503 }
0x138a   :  { %2075 = vrot.lane.b32.xlu1 %v2504_v57, %s2663_s18  ;;  %v2506_v24 = vpop.eup %2505 }
0x138b   :  { %v1864_v0 = vadd.f32 1.0, %v2506_v24  ;;  %v2508_v35 = vpop.eup %2507  ;;  %v2267_v24 = vld [vmem:[%s3266_s8] ss:$0 sm:$0xff] }
0x138c   :  { %v2056_v6 = vadd.f32 1.0, %v2508_v35 }
0x138d   :  { %2509 = vrcp.f32 %v1864_v0  ;;  %v1876_v14 = vand.u32 2147483648, %v1864_v0  ;;  %vm1870_vm5 = vweird.f32 %v1864_v0  ;;  %v1874_v15 = vand.u32 2147483647, %v1864_v0 }
0x138e   :  { %2511 = vrcp.f32 %v2056_v6  ;;  %v2068_v26 = vand.u32 2147483648, %v2056_v6  ;;  %vm2062_vm12 = vweird.f32 %v2056_v6  ;;  %v2066_v27 = vand.u32 2147483647, %v2056_v6 }
0x138f   :  { %v1877_v47 = vor.u32 1.1754944e-38, %v1876_v14  ;;  %vm1875_vm7 = vcmp.eq.f32.partialorder %v1874_v15, 8.507059e+37 }
0x1390   :  { %v2069_v58 = vor.u32 1.1754944e-38, %v2068_v26  ;;  %vm2067_vm14 = vcmp.eq.f32.partialorder %v2066_v27, 8.507059e+37 }
0x1393   :  { %v2510_v34 = vpop.eup %2509 }
0x1394   :  { %v1866_v12 = vmul.f32 %v2510_v34, %v1864_v0  ;;  %v2512_v50 = vpop.eup %2511  ;;  %vm1871_vm4 = vweird.f32 %v2510_v34 }
0x1395   :  { %v2058_v19 = vmul.f32 %v2512_v50, %v2056_v6  ;;  %vm1872_vm6 = vmor %vm1870_vm5, %vm1871_vm4  ;;  %vm2063_vm8 = vweird.f32 %v2512_v50 }
0x1396   :  { %v1867_v63 = vsub.f32 1.0, %v1866_v12  ;;  %vm2064_vm13 = vmor %vm2062_vm12, %vm2063_vm8 }
0x1397   :  { %v2059_v60 = vsub.f32 1.0, %v2058_v19  ;;  %v2268_v19 = vld [vmem:[#allocation2] ss:$0 sm:$0xff] }
0x1398   :  { %v1868_v10 = vmul.f32 %v2510_v34, %v1867_v63 }
0x1399   :  { %v2060_v16 = vmul.f32 %v2512_v50, %v2059_v60 }
0x139a   :  { %v1869_v11 = vadd.f32 %v2510_v34, %v1868_v10 }
0x139b   :  { %v2061_v38 = vadd.f32 %v2512_v50, %v2060_v16 }
0x139c   :  { %v1873_v37 = vsel %vm1872_vm6, %v2510_v34, %v1869_v11 }
0x139d   :  { %v1878_v21 = vsel %vm1875_vm7, %v1877_v47, %v1873_v37  ;;  %v2065_v30 = vsel %vm2064_vm13, %v2512_v50, %v2061_v38 }
0x139e   :  { %v2070_v8 = vsel %vm2067_vm14, %v2069_v58, %v2065_v30  ;;  %v1881_v7 = vmul.f32 %v1878_v21, %v3207_v4 }
0x139f   :  { %v2073_v59 = vmul.f32 %v2070_v8, %v3202_v22 }
0x13f1   :  { %v1884_v18 = vpop.permute.xlu0 %1883 }
0x13f2   :  { %v1886_v23 = vmul.f32 %v1884_v18, %v1878_v21 }
0x13f4   :  { %1888 = vrot.lane.b32.xlu2 %v1886_v23, %s2663_s18 }
0x13fc   :  { %v2076_v56 = vpop.permute.xlu1 %2075 }
0x13fd   :  { %v2078_v48 = vmul.f32 %v2076_v56, %v2070_v8 }
0x13ff   :  { %2080 = vrot.lane.b32.xlu0 %v2078_v48, %s2663_s18 }
0x144e   :  { %v1889_v29 = vpop.permute.xlu2 %1888 }
0x144f   :  { %v1891_v31 = vadd.f32 %v1889_v29, %v1881_v7 }
0x1451   :  { %2513 = vtanh.f32 %v1891_v31 }
0x1457   :  { %v2514_v25 = vpop.eup %2513 }
0x1458   :  { %1894 = vrot.lane.b32.xlu1 %v2514_v25, %s2663_s18 }
0x1471   :  { %v2081_v61 = vpop.permute.xlu0 %2080 }
0x1472   :  { %v2083_v1 = vadd.f32 %v2081_v61, %v2073_v59 }
0x1474   :  { %2515 = vtanh.f32 %v2083_v1 }
0x147a   :  { %v2516_v32 = vpop.eup %2515 }
0x147b   :  { %2086 = vrot.lane.b32.xlu2 %v2516_v32, %s2663_s18 }
0x14ca   :  { %v1895_v36 = vpop.permute.xlu1 %1894 }
0x14cb   :  { %v1897_v20 = vmul.f32 %v1895_v36, %v1878_v21 }
0x14cd   :  { %2095 = vrot.lane.b32.xlu1 %v1897_v20, %s2665_s21 }
0x14d5   :  { %v2087_v39 = vpop.permute.xlu2 %2086 }
0x14d6   :  { %v2089_v4 = vmul.f32 %v2087_v39, %v2070_v8 }
0x14d8   :  { %2091 = vrot.lane.b32.xlu0 %v2089_v4, %s2664_s3 }
0x153f   :  { %v2096_v40 = vpop.permute.xlu1 %2095 }
0x154a   :  { %v2092_v54 = vpop.permute.xlu0 %2091 }
0x154b   :  { %v2098_v45 = vsel %vm182_vm10, %v2092_v54, %v2096_v40 }
0x154c   :  { %v2099_v17 = vpack.c.bf16 %v2098_v45, %v2098_v45 }
0x154e   :  { %2236 = vmatmul.msk.bf16.vlgmr.msra.gmra.mxu0 %vm289_vm11, %v2099_v17 }
0x15cb   :  { %v2112_v22 = vpop.f32.mrf.mxu0 }
0x15cc   :  { %v2113_v33 = vadd.f32 %v3230_v62, %v2112_v22 }
0x15ce   :  { %2517 = vtanh.f32 %v2113_v33  ;;  %v2237_v3 = vmul.f32 -1.442695, %v2113_v33 }
0x15d0   :  { %2519 = vpow2.f32 %v2237_v3 }
0x15d3   :  { %v2114_v43 = vpop.f32.mrf.mxu0 }
0x15d4   :  { %v2518_v44 = vpop.eup %2517 }
0x15d5   :  { %2138 = vrot.lane.b32.xlu2 %v2518_v44, %s2663_s18 }
0x15d6   :  { %v2520_v5 = vpop.eup %2519 }
0x15d7   :  { %v2119_v41 = vadd.f32 1.0, %v2520_v5 }
0x15d9   :  { %2521 = vrcp.f32 %v2119_v41  ;;  %v2131_v13 = vand.u32 2147483648, %v2119_v41  ;;  %vm2125_vm11 = vweird.f32 %v2119_v41  ;;  %v2129_v52 = vand.u32 2147483647, %v2119_v41 }
0x15db   :  { %v2132_v53 = vor.u32 1.1754944e-38, %v2131_v13  ;;  %vm2130_vm0 = vcmp.eq.f32.partialorder %v2129_v52, 8.507059e+37 }
0x15dd   :  { %2156 = vrot.lane.b32.xlu2 %v2267_v24, %s2664_s3 }
0x15df   :  { %v2522_v9 = vpop.eup %2521 }
0x15e0   :  { %v2121_v46 = vmul.f32 %v2522_v9, %v2119_v41  ;;  %vm2126_vm10 = vweird.f32 %v2522_v9 }
0x15e1   :  { %vm2127_vm15 = vmor %vm2125_vm11, %vm2126_vm10 }
0x15e2   :  { %v2122_v28 = vsub.f32 1.0, %v2121_v46 }
0x15e4   :  { %v2123_v49 = vmul.f32 %v2522_v9, %v2122_v28 }
0x15e6   :  { %v2124_v51 = vadd.f32 %v2522_v9, %v2123_v49 }
0x15e8   :  { %v2128_v62 = vsel %vm2127_vm15, %v2522_v9, %v2124_v51 }
0x15e9   :  { %v2133_v57 = vsel %vm2130_vm0, %v2132_v53, %v2128_v62 }
0x15ea   :  { %v2136_v42 = vmul.f32 %v2133_v57, %v1891_v31 }
0x162f   :  { %v2139_v55 = vpop.permute.xlu2 %2138 }
0x1630   :  { %v2141_v2 = vmul.f32 %v2139_v55, %v2133_v57 }
0x1632   :  { %2143 = vrot.lane.b32.xlu0 %v2141_v2, %s2663_s18 }
0x1637   :  { %v2157_v12 = vpop.permute.xlu2 %2156 }
0x16a4   :  { %v2144_v0 = vpop.permute.xlu0 %2143 }
0x16a5   :  { %v2146_v35 = vadd.f32 %v2144_v0, %v2136_v42 }
0x16a7   :  { %2523 = vtanh.f32 %v2146_v35 }
0x16ad   :  { %v2524_v34 = vpop.eup %2523 }
0x16ae   :  { %2149 = vrot.lane.b32.xlu1 %v2524_v34, %s2663_s18 }
0x1720   :  { %v2150_v6 = vpop.permute.xlu1 %2149 }
0x1721   :  { %v2152_v63 = vmul.f32 %v2150_v6, %v2133_v57 }
0x1723   :  { %v2159_v10 = vmul.f32 %v2157_v12, %v2152_v63 }
0x1725   :  { %2161 = vrot.lane.b32.xlu0 %v2159_v10, %s2664_s3 }
0x1797   :  { %v2162_v50 = vpop.permute.xlu0 %2161 }
0x1798   :  { %v2165_v11 = vsel %vm2164_vm1, %v2162_v50, 0.0 }
0x1799   :  { %2166 = vadd.xlane.f32.xlu1 %v2165_v11 }
0x180c   :  { %v2167_v14 = vpop.xlane.xlu1 %2166 }
0x180d   :  { %v2172_v15 = vadd.f32 %v2268_v19, %v2167_v14 }
0x180f   :  { %2174 = vst.msk [vmem:[%s3268_s10] sm:$0x3] %vm2173_vm2, %v2172_v15 }
0x1810   :  { %2179 = vsyncpa [#allocation4], 1 }
0x1811   :  { %2180 = vsyncpa [#allocation6], 1 }
0x1812   :  { %2181 = vsyncpa [#allocation9], 1 }

</bundles_post_ra>
